<compile_context>
chip_gen: v7x
topology: tpu7x:2x2x1
jax: 0.10.0
libtpu: 0.0.40
codegen_flags: <defaults>
</compile_context>

<pallas_src>
import jax
import jax.numpy as jnp
from jax.experimental import pallas as pl
from jax.experimental.pallas import tpu as pltpu


# ---------------------------------------------------------------------------
# Fused Conv2d(5x5, stride 1, pad 2) + bias + MaxPool2d(2)
# ---------------------------------------------------------------------------

def conv_pool_kernel(x_ref, w_ref, b_ref, o_ref):
    """One batch block.

    x_ref: (bn, 4, HW, K)  bf16  im2col patches; axis 1 is the 2x2 pool offset
           (ph, pw), HW = (H//2)*(W//2) pooled pixels, K = 25*Cin.
    w_ref: (K, Cout)       bf16  flattened 5x5 conv weights.
    b_ref: (1, Cout)       f32   conv bias.
    o_ref: (bn, HW, Cout)  f32   pooled output (NHWC, spatial flattened).
    """
    bn, _, hw, k = x_ref.shape
    cout = w_ref.shape[-1]
    # Single well-shaped MXU matmul: (bn*4*HW, K) x (K, Cout), f32 accumulate.
    lhs = x_ref[...].reshape(bn * 4 * hw, k)          # leading-dim merge only
    acc = jnp.dot(lhs, w_ref[...], preferred_element_type=jnp.float32)
    acc = acc.reshape(bn, 4, hw, cout)                # leading-dim split only
    # MaxPool2d(2): elementwise max over the four pool offsets, then bias.
    pooled = jnp.maximum(jnp.maximum(acc[:, 0], acc[:, 1]),
                         jnp.maximum(acc[:, 2], acc[:, 3]))
    o_ref[...] = (pooled + b_ref[...]).astype(o_ref.dtype)


def _im2col_pool_cosets(x):
    """x: (N, H, W, C) -> (N, 4, (H//2)*(W//2), 25*C) bf16 patches.

    patches[n, 2*ph+pw, hh*(W//2)+ww, (5*dh+dw)*C + ci]
        == x_pad[n, 2*hh+ph+dh, 2*ww+pw+dw, ci]
    so each row is the full 5x5xC receptive field of one conv output pixel,
    grouped by its 2x2 pool offset (coset).
    """
    n, h, w, c = x.shape
    hh, wh = h // 2, w // 2
    xp = jnp.pad(x.astype(jnp.bfloat16), ((0, 0), (2, 2), (2, 2), (0, 0)))
    cosets = []
    for ph in range(2):
        for pw in range(2):
            taps = []
            for dh in range(5):
                for dw in range(5):
                    r0, c0 = ph + dh, pw + dw
                    taps.append(xp[:, r0:r0 + 2 * hh:2, c0:c0 + 2 * wh:2, :])
            cosets.append(jnp.concatenate(taps, axis=-1))      # (N,Hh,Wh,25C)
    patches = jnp.stack(cosets, axis=1)                        # (N,4,Hh,Wh,25C)
    return patches.reshape(n, 4, hh * wh, 25 * c)


def _batch_block(n, cap=8):
    for b in range(min(n, cap), 0, -1):
        if n % b == 0:
            return b
    return 1


def conv5x5_pool2(x, w, b):
    """x: (N, H, W, Cin) f32 -> (N, H//2, W//2, Cout) f32.

    w: (5, 5, Cin, Cout), b: (1, Cout).
    """
    n, h, wd, cin = x.shape
    cout = w.shape[-1]
    hh, wh = h // 2, wd // 2
    hw = hh * wh
    k = 25 * cin
    patches = _im2col_pool_cosets(x)                       # (N, 4, HW, K) bf16
    wf = w.reshape(k, cout).astype(jnp.bfloat16)
    bf = b.astype(jnp.float32)
    bn = _batch_block(n)
    out = pl.pallas_call(
        conv_pool_kernel,
        out_shape=jax.ShapeDtypeStruct((n, hw, cout), jnp.float32),
        grid=(n // bn,),
        in_specs=[
            pl.BlockSpec((bn, 4, hw, k), lambda i: (i, 0, 0, 0)),
            pl.BlockSpec((k, cout), lambda i: (0, 0)),
            pl.BlockSpec((1, cout), lambda i: (0, 0)),
        ],
        out_specs=pl.BlockSpec((bn, hw, cout), lambda i: (i, 0, 0)),
        compiler_params=pltpu.CompilerParams(
            dimension_semantics=("parallel",)),
    )(patches, wf, bf)
    return out.reshape(n, hh, wh, cout)


# ---------------------------------------------------------------------------
# Fused Linear(1024, 64) + Linear(64, 10) (logits padded to 128 lanes)
# ---------------------------------------------------------------------------

def mlp_kernel(x_ref, w1_ref, b1_ref, w2_ref, b2_ref, o_ref):
    h = jnp.dot(x_ref[...], w1_ref[...],
                preferred_element_type=jnp.float32) + b1_ref[...]
    o = jnp.dot(h.astype(w2_ref.dtype), w2_ref[...],
                preferred_element_type=jnp.float32) + b2_ref[...]
    o_ref[...] = o.astype(o_ref.dtype)


def mlp(x, w1, b1, w2, b2):
    n = x.shape[0]
    vmem = pl.BlockSpec(memory_space=pltpu.MemorySpace.VMEM)
    return pl.pallas_call(
        mlp_kernel,
        out_shape=jax.ShapeDtypeStruct((n, w2.shape[1]), jnp.float32),
        in_specs=[vmem, vmem, vmem, vmem, vmem],
        out_specs=vmem,
    )(x, w1, b1, w2, b2)


# ---------------------------------------------------------------------------
# Parameters (PyTorch-default uniform init, torch layouts kept for wl1/wl2)
# ---------------------------------------------------------------------------

def init_params(key):
    ks = jax.random.split(key, 10)

    def conv_w(k, cin, cout):
        bound = 1.0 / (cin * 25) ** 0.5
        return jax.random.uniform(k, (5, 5, cin, cout), jnp.float32, -bound, bound)

    def bias(k, fan_in, n):
        bound = 1.0 / fan_in ** 0.5
        return jax.random.uniform(k, (1, n), jnp.float32, -bound, bound)

    def lin_w(k, fin, fout):
        bound = 1.0 / fin ** 0.5
        return jax.random.uniform(k, (fin, fout), jnp.float32, -bound, bound)

    return dict(
        w1=conv_w(ks[0], 3, 32),   b1=bias(ks[1], 3 * 25, 32),
        w2=conv_w(ks[2], 32, 32),  b2=bias(ks[3], 32 * 25, 32),
        w3=conv_w(ks[4], 32, 64),  b3=bias(ks[5], 32 * 25, 64),
        # wl1 rows are in PyTorch's NCHW-flatten (c, h, w) order.
        wl1=lin_w(ks[6], 64 * 4 * 4, 64), bl1=bias(ks[7], 64 * 4 * 4, 64),
        wl2=lin_w(ks[8], 64, 10),  bl2=bias(ks[9], 64, 10),
    )


@jax.jit
def tudui_forward(x_nchw, params):
    # NCHW -> NHWC at the boundary (channels on the lane dimension).
    x = jnp.transpose(x_nchw, (0, 2, 3, 1)).astype(jnp.float32)
    x = conv5x5_pool2(x, params["w1"], params["b1"])   # (N, 16, 16, 32)
    x = conv5x5_pool2(x, params["w2"], params["b2"])   # (N,  8,  8, 32)
    x = conv5x5_pool2(x, params["w3"], params["b3"])   # (N,  4,  4, 64)
    n = x.shape[0]
    # nn.Flatten on NCHW flattens (C, H, W); instead of transposing the
    # activations, fold that permutation into the first Linear weight
    # ((c,h,w)-ordered rows -> (h,w,c)-ordered rows to match NHWC flatten).
    x_flat = x.reshape(n, 4 * 4 * 64).astype(jnp.bfloat16)
    wl1 = (params["wl1"].reshape(64, 4, 4, 64)
           .transpose(1, 2, 0, 3).reshape(4 * 4 * 64, 64)).astype(jnp.bfloat16)
    # Pad the 10-wide logits to a full 128-lane output; slice in the wrapper.
    wl2 = jnp.pad(params["wl2"], ((0, 0), (0, 128 - 10))).astype(jnp.bfloat16)
    bl2 = jnp.pad(params["bl2"], ((0, 0), (0, 128 - 10)))
    logits = mlp(x_flat, wl1, params["bl1"], wl2, bl2)
    return logits[:, :10]


if __name__ == "__main__":
    key = jax.random.PRNGKey(0)
    kx, kp = jax.random.split(key)
    params = init_params(kp)
    # The Linear(64*4*4, 64) forces 32x32 spatial input; batch kept small.
    x = jax.random.normal(kx, (2, 3, 32, 32), jnp.float32)
    y = tudui_forward(x, params)
    jax.block_until_ready(y)
    assert y.shape == (2, 10) and y.dtype == jnp.float32
    print("KERNEL_OK")
</pallas_src>

<mosaic_0001>
module attributes {stable_mosaic.version = 11 : i64} {
  func.func @conv_pool_kernel(%arg0: i32, %arg1: memref<2x4x256x75xbf16, #tpu.memory_space<vmem>>, %arg2: memref<75x32xbf16, #tpu.memory_space<vmem>>, %arg3: memref<1x32xf32, #tpu.memory_space<vmem>>, %arg4: memref<2x256x32xf32, #tpu.memory_space<vmem>>) attributes {dimension_semantics = [#tpu.dimension_semantics<parallel>], iteration_bounds = array<i64: 1>, scalar_prefetch = 0 : i64, scratch_operands = 0 : i64, tpu.core_type = #tpu.core_type<tc>, window_params = [{transform_indices = @transform_0, window_bounds = array<i64: 2, 4, 256, 75>}, {pipeline_mode = #tpu.pipeline_mode<synchronous>, transform_indices = @transform_1, window_bounds = array<i64: 75, 32>}, {pipeline_mode = #tpu.pipeline_mode<synchronous>, transform_indices = @transform_2, window_bounds = array<i64: 1, 32>}, {transform_indices = @transform_3, window_bounds = array<i64: 2, 256, 32>}]} {
    %c0 = arith.constant 0 : index
    %c0_0 = arith.constant 0 : index
    %c0_1 = arith.constant 0 : index
    %c0_2 = arith.constant 0 : index
    %0 = vector.load %arg1[%c0, %c0_0, %c0_1, %c0_2] : memref<2x4x256x75xbf16, #tpu.memory_space<vmem>>, vector<2x4x256x75xbf16>
    %1 = vector.shape_cast %0 : vector<2x4x256x75xbf16> to vector<2048x75xbf16>
    %c0_3 = arith.constant 0 : index
    %c0_4 = arith.constant 0 : index
    %2 = vector.load %arg2[%c0_3, %c0_4] : memref<75x32xbf16, #tpu.memory_space<vmem>>, vector<75x32xbf16>
    %cst = arith.constant dense<0.000000e+00> : vector<2048x32xf32>
    %3 = tpu.matmul %1, %2, %cst {dimension_numbers = #tpu.dot_dimension_numbers<[1], [0], [0], [1], [0, 0, 1, 1], [], []>} : vector<2048x75xbf16>, vector<75x32xbf16>, vector<2048x32xf32> -> vector<2048x32xf32>
    %4 = vector.shape_cast %3 : vector<2048x32xf32> to vector<2x4x256x32xf32>
    %5 = vector.extract_strided_slice %4 {offsets = [0, 0, 0, 0], sizes = [2, 1, 256, 32], strides = [1, 1, 1, 1]} : vector<2x4x256x32xf32> to vector<2x1x256x32xf32>
    %6 = vector.shape_cast %5 : vector<2x1x256x32xf32> to vector<2x256x32xf32>
    %7 = vector.extract_strided_slice %4 {offsets = [0, 1, 0, 0], sizes = [2, 1, 256, 32], strides = [1, 1, 1, 1]} : vector<2x4x256x32xf32> to vector<2x1x256x32xf32>
    %8 = vector.shape_cast %7 : vector<2x1x256x32xf32> to vector<2x256x32xf32>
    %9 = arith.maximumf %6, %8 : vector<2x256x32xf32>
    %10 = vector.extract_strided_slice %4 {offsets = [0, 2, 0, 0], sizes = [2, 1, 256, 32], strides = [1, 1, 1, 1]} : vector<2x4x256x32xf32> to vector<2x1x256x32xf32>
    %11 = vector.shape_cast %10 : vector<2x1x256x32xf32> to vector<2x256x32xf32>
    %12 = vector.extract_strided_slice %4 {offsets = [0, 3, 0, 0], sizes = [2, 1, 256, 32], strides = [1, 1, 1, 1]} : vector<2x4x256x32xf32> to vector<2x1x256x32xf32>
    %13 = vector.shape_cast %12 : vector<2x1x256x32xf32> to vector<2x256x32xf32>
    %14 = arith.maximumf %11, %13 : vector<2x256x32xf32>
    %15 = arith.maximumf %9, %14 : vector<2x256x32xf32>
    %c0_5 = arith.constant 0 : index
    %c0_6 = arith.constant 0 : index
    %16 = vector.load %arg3[%c0_5, %c0_6] : memref<1x32xf32, #tpu.memory_space<vmem>>, vector<1x32xf32>
    %17 = vector.shape_cast %16 : vector<1x32xf32> to vector<1x1x32xf32>
    %18 = vector.broadcast %17 : vector<1x1x32xf32> to vector<2x256x32xf32>
    %19 = arith.addf %15, %18 : vector<2x256x32xf32>
    %c0_7 = arith.constant 0 : index
    %c0_8 = arith.constant 0 : index
    %c0_9 = arith.constant 0 : index
    %20 = vector.load %arg4[%c0_7, %c0_8, %c0_9] : memref<2x256x32xf32, #tpu.memory_space<vmem>>, vector<2x256x32xf32>
    tpu.vector_store %arg4[%c0_7, %c0_8, %c0_9], %19 {strides = array<i32>} : memref<2x256x32xf32, #tpu.memory_space<vmem>>, vector<2x256x32xf32>,
    return
  }
  func.func @transform_0(%arg0: i32) -> (i32, i32, i32, i32) {
    %c0_i32 = arith.constant 0 : i32
    %c0_i32_0 = arith.constant 0 : i32
    %c0_i32_1 = arith.constant 0 : i32
    %c0_i32_2 = arith.constant 0 : i32
    return %arg0, %c0_i32, %c0_i32_0, %c0_i32_1 : i32, i32, i32, i32
  }
  func.func @transform_1(%arg0: i32) -> (i32, i32) {
    %c0_i32 = arith.constant 0 : i32
    %c0_i32_0 = arith.constant 0 : i32
    %c0_i32_1 = arith.constant 0 : i32
    return %c0_i32, %c0_i32_0 : i32, i32
  }
  func.func @transform_2(%arg0: i32) -> (i32, i32) {
    %c0_i32 = arith.constant 0 : i32
    %c0_i32_0 = arith.constant 0 : i32
    %c0_i32_1 = arith.constant 0 : i32
    return %c0_i32, %c0_i32_0 : i32, i32
  }
  func.func @transform_3(%arg0: i32) -> (i32, i32, i32) {
    %c0_i32 = arith.constant 0 : i32
    %c0_i32_0 = arith.constant 0 : i32
    %c0_i32_1 = arith.constant 0 : i32
    return %arg0, %c0_i32, %c0_i32_0 : i32, i32, i32
  }
}

module attributes {stable_mosaic.version = 11 : i64} {
  func.func @conv_pool_kernel(%arg0: i32, %arg1: memref<2x4x64x800xbf16, #tpu.memory_space<vmem>>, %arg2: memref<800x32xbf16, #tpu.memory_space<vmem>>, %arg3: memref<1x32xf32, #tpu.memory_space<vmem>>, %arg4: memref<2x64x32xf32, #tpu.memory_space<vmem>>) attributes {dimension_semantics = [#tpu.dimension_semantics<parallel>], iteration_bounds = array<i64: 1>, scalar_prefetch = 0 : i64, scratch_operands = 0 : i64, tpu.core_type = #tpu.core_type<tc>, window_params = [{transform_indices = @transform_0, window_bounds = array<i64: 2, 4, 64, 800>}, {pipeline_mode = #tpu.pipeline_mode<synchronous>, transform_indices = @transform_1, window_bounds = array<i64: 800, 32>}, {pipeline_mode = #tpu.pipeline_mode<synchronous>, transform_indices = @transform_2, window_bounds = array<i64: 1, 32>}, {transform_indices = @transform_3, window_bounds = array<i64: 2, 64, 32>}]} {
    %c0 = arith.constant 0 : index
    %c0_0 = arith.constant 0 : index
    %c0_1 = arith.constant 0 : index
    %c0_2 = arith.constant 0 : index
    %0 = vector.load %arg1[%c0, %c0_0, %c0_1, %c0_2] : memref<2x4x64x800xbf16, #tpu.memory_space<vmem>>, vector<2x4x64x800xbf16>
    %1 = vector.shape_cast %0 : vector<2x4x64x800xbf16> to vector<512x800xbf16>
    %c0_3 = arith.constant 0 : index
    %c0_4 = arith.constant 0 : index
    %2 = vector.load %arg2[%c0_3, %c0_4] : memref<800x32xbf16, #tpu.memory_space<vmem>>, vector<800x32xbf16>
    %cst = arith.constant dense<0.000000e+00> : vector<512x32xf32>
    %3 = tpu.matmul %1, %2, %cst {dimension_numbers = #tpu.dot_dimension_numbers<[1], [0], [0], [1], [0, 0, 1, 1], [], []>} : vector<512x800xbf16>, vector<800x32xbf16>, vector<512x32xf32> -> vector<512x32xf32>
    %4 = vector.shape_cast %3 : vector<512x32xf32> to vector<2x4x64x32xf32>
    %5 = vector.extract_strided_slice %4 {offsets = [0, 0, 0, 0], sizes = [2, 1, 64, 32], strides = [1, 1, 1, 1]} : vector<2x4x64x32xf32> to vector<2x1x64x32xf32>
    %6 = vector.shape_cast %5 : vector<2x1x64x32xf32> to vector<2x64x32xf32>
    %7 = vector.extract_strided_slice %4 {offsets = [0, 1, 0, 0], sizes = [2, 1, 64, 32], strides = [1, 1, 1, 1]} : vector<2x4x64x32xf32> to vector<2x1x64x32xf32>
    %8 = vector.shape_cast %7 : vector<2x1x64x32xf32> to vector<2x64x32xf32>
    %9 = arith.maximumf %6, %8 : vector<2x64x32xf32>
    %10 = vector.extract_strided_slice %4 {offsets = [0, 2, 0, 0], sizes = [2, 1, 64, 32], strides = [1, 1, 1, 1]} : vector<2x4x64x32xf32> to vector<2x1x64x32xf32>
    %11 = vector.shape_cast %10 : vector<2x1x64x32xf32> to vector<2x64x32xf32>
    %12 = vector.extract_strided_slice %4 {offsets = [0, 3, 0, 0], sizes = [2, 1, 64, 32], strides = [1, 1, 1, 1]} : vector<2x4x64x32xf32> to vector<2x1x64x32xf32>
    %13 = vector.shape_cast %12 : vector<2x1x64x32xf32> to vector<2x64x32xf32>
    %14 = arith.maximumf %11, %13 : vector<2x64x32xf32>
    %15 = arith.maximumf %9, %14 : vector<2x64x32xf32>
    %c0_5 = arith.constant 0 : index
    %c0_6 = arith.constant 0 : index
    %16 = vector.load %arg3[%c0_5, %c0_6] : memref<1x32xf32, #tpu.memory_space<vmem>>, vector<1x32xf32>
    %17 = vector.shape_cast %16 : vector<1x32xf32> to vector<1x1x32xf32>
    %18 = vector.broadcast %17 : vector<1x1x32xf32> to vector<2x64x32xf32>
    %19 = arith.addf %15, %18 : vector<2x64x32xf32>
    %c0_7 = arith.constant 0 : index
    %c0_8 = arith.constant 0 : index
    %c0_9 = arith.constant 0 : index
    %20 = vector.load %arg4[%c0_7, %c0_8, %c0_9] : memref<2x64x32xf32, #tpu.memory_space<vmem>>, vector<2x64x32xf32>
    tpu.vector_store %arg4[%c0_7, %c0_8, %c0_9], %19 {strides = array<i32>} : memref<2x64x32xf32, #tpu.memory_space<vmem>>, vector<2x64x32xf32>,
    return
  }
  func.func @transform_0(%arg0: i32) -> (i32, i32, i32, i32) {
    %c0_i32 = arith.constant 0 : i32
    %c0_i32_0 = arith.constant 0 : i32
    %c0_i32_1 = arith.constant 0 : i32
    %c0_i32_2 = arith.constant 0 : i32
    return %arg0, %c0_i32, %c0_i32_0, %c0_i32_1 : i32, i32, i32, i32
  }
  func.func @transform_1(%arg0: i32) -> (i32, i32) {
    %c0_i32 = arith.constant 0 : i32
    %c0_i32_0 = arith.constant 0 : i32
    %c0_i32_1 = arith.constant 0 : i32
    return %c0_i32, %c0_i32_0 : i32, i32
  }
  func.func @transform_2(%arg0: i32) -> (i32, i32) {
    %c0_i32 = arith.constant 0 : i32
    %c0_i32_0 = arith.constant 0 : i32
    %c0_i32_1 = arith.constant 0 : i32
    return %c0_i32, %c0_i32_0 : i32, i32
  }
  func.func @transform_3(%arg0: i32) -> (i32, i32, i32) {
    %c0_i32 = arith.constant 0 : i32
    %c0_i32_0 = arith.constant 0 : i32
    %c0_i32_1 = arith.constant 0 : i32
    return %arg0, %c0_i32, %c0_i32_0 : i32, i32, i32
  }
}

module attributes {stable_mosaic.version = 11 : i64} {
  func.func @conv_pool_kernel(%arg0: i32, %arg1: memref<2x4x16x800xbf16, #tpu.memory_space<vmem>>, %arg2: memref<800x64xbf16, #tpu.memory_space<vmem>>, %arg3: memref<1x64xf32, #tpu.memory_space<vmem>>, %arg4: memref<2x16x64xf32, #tpu.memory_space<vmem>>) attributes {dimension_semantics = [#tpu.dimension_semantics<parallel>], iteration_bounds = array<i64: 1>, scalar_prefetch = 0 : i64, scratch_operands = 0 : i64, tpu.core_type = #tpu.core_type<tc>, window_params = [{transform_indices = @transform_0, window_bounds = array<i64: 2, 4, 16, 800>}, {pipeline_mode = #tpu.pipeline_mode<synchronous>, transform_indices = @transform_1, window_bounds = array<i64: 800, 64>}, {pipeline_mode = #tpu.pipeline_mode<synchronous>, transform_indices = @transform_2, window_bounds = array<i64: 1, 64>}, {transform_indices = @transform_3, window_bounds = array<i64: 2, 16, 64>}]} {
    %c0 = arith.constant 0 : index
    %c0_0 = arith.constant 0 : index
    %c0_1 = arith.constant 0 : index
    %c0_2 = arith.constant 0 : index
    %0 = vector.load %arg1[%c0, %c0_0, %c0_1, %c0_2] : memref<2x4x16x800xbf16, #tpu.memory_space<vmem>>, vector<2x4x16x800xbf16>
    %1 = vector.shape_cast %0 : vector<2x4x16x800xbf16> to vector<128x800xbf16>
    %c0_3 = arith.constant 0 : index
    %c0_4 = arith.constant 0 : index
    %2 = vector.load %arg2[%c0_3, %c0_4] : memref<800x64xbf16, #tpu.memory_space<vmem>>, vector<800x64xbf16>
    %cst = arith.constant dense<0.000000e+00> : vector<128x64xf32>
    %3 = tpu.matmul %1, %2, %cst {dimension_numbers = #tpu.dot_dimension_numbers<[1], [0], [0], [1], [0, 0, 1, 1], [], []>} : vector<128x800xbf16>, vector<800x64xbf16>, vector<128x64xf32> -> vector<128x64xf32>
    %4 = vector.shape_cast %3 : vector<128x64xf32> to vector<2x4x16x64xf32>
    %5 = vector.extract_strided_slice %4 {offsets = [0, 0, 0, 0], sizes = [2, 1, 16, 64], strides = [1, 1, 1, 1]} : vector<2x4x16x64xf32> to vector<2x1x16x64xf32>
    %6 = vector.shape_cast %5 : vector<2x1x16x64xf32> to vector<2x16x64xf32>
    %7 = vector.extract_strided_slice %4 {offsets = [0, 1, 0, 0], sizes = [2, 1, 16, 64], strides = [1, 1, 1, 1]} : vector<2x4x16x64xf32> to vector<2x1x16x64xf32>
    %8 = vector.shape_cast %7 : vector<2x1x16x64xf32> to vector<2x16x64xf32>
    %9 = arith.maximumf %6, %8 : vector<2x16x64xf32>
    %10 = vector.extract_strided_slice %4 {offsets = [0, 2, 0, 0], sizes = [2, 1, 16, 64], strides = [1, 1, 1, 1]} : vector<2x4x16x64xf32> to vector<2x1x16x64xf32>
    %11 = vector.shape_cast %10 : vector<2x1x16x64xf32> to vector<2x16x64xf32>
    %12 = vector.extract_strided_slice %4 {offsets = [0, 3, 0, 0], sizes = [2, 1, 16, 64], strides = [1, 1, 1, 1]} : vector<2x4x16x64xf32> to vector<2x1x16x64xf32>
    %13 = vector.shape_cast %12 : vector<2x1x16x64xf32> to vector<2x16x64xf32>
    %14 = arith.maximumf %11, %13 : vector<2x16x64xf32>
    %15 = arith.maximumf %9, %14 : vector<2x16x64xf32>
    %c0_5 = arith.constant 0 : index
    %c0_6 = arith.constant 0 : index
    %16 = vector.load %arg3[%c0_5, %c0_6] : memref<1x64xf32, #tpu.memory_space<vmem>>, vector<1x64xf32>
    %17 = vector.shape_cast %16 : vector<1x64xf32> to vector<1x1x64xf32>
    %18 = vector.broadcast %17 : vector<1x1x64xf32> to vector<2x16x64xf32>
    %19 = arith.addf %15, %18 : vector<2x16x64xf32>
    %c0_7 = arith.constant 0 : index
    %c0_8 = arith.constant 0 : index
    %c0_9 = arith.constant 0 : index
    %20 = vector.load %arg4[%c0_7, %c0_8, %c0_9] : memref<2x16x64xf32, #tpu.memory_space<vmem>>, vector<2x16x64xf32>
    tpu.vector_store %arg4[%c0_7, %c0_8, %c0_9], %19 {strides = array<i32>} : memref<2x16x64xf32, #tpu.memory_space<vmem>>, vector<2x16x64xf32>,
    return
  }
  func.func @transform_0(%arg0: i32) -> (i32, i32, i32, i32) {
    %c0_i32 = arith.constant 0 : i32
    %c0_i32_0 = arith.constant 0 : i32
    %c0_i32_1 = arith.constant 0 : i32
    %c0_i32_2 = arith.constant 0 : i32
    return %arg0, %c0_i32, %c0_i32_0, %c0_i32_1 : i32, i32, i32, i32
  }
  func.func @transform_1(%arg0: i32) -> (i32, i32) {
    %c0_i32 = arith.constant 0 : i32
    %c0_i32_0 = arith.constant 0 : i32
    %c0_i32_1 = arith.constant 0 : i32
    return %c0_i32, %c0_i32_0 : i32, i32
  }
  func.func @transform_2(%arg0: i32) -> (i32, i32) {
    %c0_i32 = arith.constant 0 : i32
    %c0_i32_0 = arith.constant 0 : i32
    %c0_i32_1 = arith.constant 0 : i32
    return %c0_i32, %c0_i32_0 : i32, i32
  }
  func.func @transform_3(%arg0: i32) -> (i32, i32, i32) {
    %c0_i32 = arith.constant 0 : i32
    %c0_i32_0 = arith.constant 0 : i32
    %c0_i32_1 = arith.constant 0 : i32
    return %arg0, %c0_i32, %c0_i32_0 : i32, i32, i32
  }
}

module attributes {stable_mosaic.version = 11 : i64} {
  func.func @mlp_kernel(%arg0: memref<2x1024xbf16, #tpu.memory_space<vmem>>, %arg1: memref<1024x64xbf16, #tpu.memory_space<vmem>>, %arg2: memref<1x64xf32, #tpu.memory_space<vmem>>, %arg3: memref<64x128xbf16, #tpu.memory_space<vmem>>, %arg4: memref<1x128xf32, #tpu.memory_space<vmem>>, %arg5: memref<2x128xf32, #tpu.memory_space<vmem>>) attributes {dimension_semantics = [], scalar_prefetch = 0 : i64, scratch_operands = 0 : i64, tpu.core_type = #tpu.core_type<tc>} {
    %c0 = arith.constant 0 : index
    %c0_0 = arith.constant 0 : index
    %0 = vector.load %arg0[%c0, %c0_0] : memref<2x1024xbf16, #tpu.memory_space<vmem>>, vector<2x1024xbf16>
    %c0_1 = arith.constant 0 : index
    %c0_2 = arith.constant 0 : index
    %1 = vector.load %arg1[%c0_1, %c0_2] : memref<1024x64xbf16, #tpu.memory_space<vmem>>, vector<1024x64xbf16>
    %cst = arith.constant dense<0.000000e+00> : vector<2x64xf32>
    %2 = tpu.matmul %0, %1, %cst {dimension_numbers = #tpu.dot_dimension_numbers<[1], [0], [0], [1], [0, 0, 1, 1], [], []>} : vector<2x1024xbf16>, vector<1024x64xbf16>, vector<2x64xf32> -> vector<2x64xf32>
    %c0_3 = arith.constant 0 : index
    %c0_4 = arith.constant 0 : index
    %3 = vector.load %arg2[%c0_3, %c0_4] : memref<1x64xf32, #tpu.memory_space<vmem>>, vector<1x64xf32>
    %4 = vector.broadcast %3 : vector<1x64xf32> to vector<2x64xf32>
    %5 = arith.addf %2, %4 : vector<2x64xf32>
    %6 = arith.truncf %5 : vector<2x64xf32> to vector<2x64xbf16>
    %c0_5 = arith.constant 0 : index
    %c0_6 = arith.constant 0 : index
    %7 = vector.load %arg3[%c0_5, %c0_6] : memref<64x128xbf16, #tpu.memory_space<vmem>>, vector<64x128xbf16>
    %cst_7 = arith.constant dense<0.000000e+00> : vector<2x128xf32>
    %8 = tpu.matmul %6, %7, %cst_7 {dimension_numbers = #tpu.dot_dimension_numbers<[1], [0], [0], [1], [0, 0, 1, 1], [], []>} : vector<2x64xbf16>, vector<64x128xbf16>, vector<2x128xf32> -> vector<2x128xf32>
    %c0_8 = arith.constant 0 : index
    %c0_9 = arith.constant 0 : index
    %9 = vector.load %arg4[%c0_8, %c0_9] : memref<1x128xf32, #tpu.memory_space<vmem>>, vector<1x128xf32>
    %10 = vector.broadcast %9 : vector<1x128xf32> to vector<2x128xf32>
    %11 = arith.addf %8, %10 : vector<2x128xf32>
    %c0_10 = arith.constant 0 : index
    %c0_11 = arith.constant 0 : index
    %12 = vector.load %arg5[%c0_10, %c0_11] : memref<2x128xf32, #tpu.memory_space<vmem>>, vector<2x128xf32>
    tpu.vector_store %arg5[%c0_10, %c0_11], %11 {strides = array<i32>} : memref<2x128xf32, #tpu.memory_space<vmem>>, vector<2x128xf32>,
    return
  }
}

</mosaic_0001>

<bundles_post_ra>
// kernel: tudui_forward.4
= control target key start
LH: loop header
LB: loop body
LE: loop exit
PB: predicated region body
PF: predicated region fallthrough
CT: control target
= control target key end

     0   :  { %vm1335_vm0 = vcmask 1044480   ;;  %vm1336_vm1 = vcmask 1045504   ;;  %vm950_vm2 = vcmask 613376   ;;  %v3536_v4 = vmov 65535   ;;  %s5177_s1 = inlined_call_operand.vmem [shape: bf16[75,32], index: 1, kind: input, shape index: {}]   ;;  %s5178_s0 = inlined_call_operand.vmem [shape: bf16[2,4,256,75], index: 0, kind: input, shape index: {}]   ;;  %s5179_s2 = inlined_call_operand.vmem [shape: f32[1,32], index: 2, kind: input, shape index: {}]   ;;  %s5180_s3 = inlined_call_operand.vmem [shape: f32[2,256,32], index: 3, kind: output, shape index: {}]  }
   0x1   :  { %v3403_v0 = vld [vmem:[%s5177_s1] sm:$0xff]   ;;  %v3404_v1 = vld [vmem:[%s5177_s1 + $0x8] sm:$0xff]   ;;  %v3405_v2 = vld [vmem:[%s5177_s1 + $0x10] sm:$0xff]   ;;  %v1337_v5 = vsel %vm1335_vm0, 4294967295, %v3536_v4  ;;  %vm2662_vm3 = vcmask 261120  }
   0x2   :  { %3126 = vmatprep.subr.bf16.mxu0 %v3403_v0  ;;  %3392 = vmatprep.subr.bf16.mxu1 %v3403_v0  ;;  %v3408_v3 = vld [vmem:[%s5178_s0] sm:$0xff]   ;;  %v3406_v7 = vld [vmem:[%s5177_s1 + $0x18] sm:$0xff]   ;;  %v1338_v9 = vsel %vm1336_vm1, %v1337_v5, 0  ;;  %v3410_v11 = vld [vmem:[%s5178_s0 + $0x8] sm:$0xff]  }
   0x3   :  { %3127 = vmatpush3.bf16.msra.mxu0 %v3403_v0  ;;  %3397 = vmatpush3.bf16.msra.mxu1 %v3403_v0  ;;  %v3409_v6 = vld [vmem:[%s5178_s0 + $0x200] sm:$0xff]   ;;  %v3411_v12 = vld [vmem:[%s5178_s0 + $0x208] sm:$0xff]   ;;  %v3412_v13 = vld [vmem:[%s5178_s0 + $0x10] sm:$0xff]  }
   0x4   :  { %3128 = vmatprep.subr.bf16.mxu0 %v3404_v1  ;;  %3393 = vmatprep.subr.bf16.mxu1 %v3404_v1  ;;  %v3407_v8 = vld [vmem:[%s5177_s1 + $0x20] sm:$0x3f]   ;;  %v3413_v14 = vld [vmem:[%s5178_s0 + $0x210] sm:$0xff]   ;;  %v3414_v15 = vld [vmem:[%s5178_s0 + $0x18] sm:$0xff]  }
   0x5   :  { %3136 = vmatprep.mubr.msk.bf16.mxu0 %vm950_vm2, %v3408_v3  ;;  %3264 = vmatprep.mubr.msk.bf16.mxu1 %vm950_vm2, %v3409_v6  ;;  %v1340_v10 = vand.u32 %v3407_v8, %v1338_v9  ;;  %v3415_v16 = vld [vmem:[%s5178_s0 + $0x218] sm:$0xff]   ;;  %v3416_v17 = vld [vmem:[%s5178_s0 + $0x20] sm:$0xff]   ;;  %v3418_v19 = vld [vmem:[%s5178_s0 + $0x28] sm:$0xff]  }
   0x6   :  { %v3417_v18 = vld [vmem:[%s5178_s0 + $0x220] sm:$0xff]   ;;  %v3419_v20 = vld [vmem:[%s5178_s0 + $0x228] sm:$0xff]   ;;  %v3420_v21 = vld [vmem:[%s5178_s0 + $0x30] sm:$0xff]  }
   0x7   :  { %3129 = vmatpush3.bf16.msra.mxu0 %v3404_v1  ;;  %3398 = vmatpush3.bf16.msra.mxu1 %v3404_v1  ;;  %v3421_v22 = vld [vmem:[%s5178_s0 + $0x230] sm:$0xff]   ;;  %v3422_v23 = vld [vmem:[%s5178_s0 + $0x38] sm:$0xff]   ;;  %v3424_v25 = vld [vmem:[%s5178_s0 + $0x40] sm:$0xff]  }
   0x8   :  { %3130 = vmatprep.subr.bf16.mxu0 %v3405_v2  ;;  %3394 = vmatprep.subr.bf16.mxu1 %v3405_v2  ;;  %v3423_v24 = vld [vmem:[%s5178_s0 + $0x238] sm:$0xff]   ;;  %v3425_v26 = vld [vmem:[%s5178_s0 + $0x240] sm:$0xff]   ;;  %v3426_v27 = vld [vmem:[%s5178_s0 + $0x48] sm:$0xff]  }
   0x9   :  { %v3427_v28 = vld [vmem:[%s5178_s0 + $0x248] sm:$0xff]   ;;  %v3428_v29 = vld [vmem:[%s5178_s0 + $0x50] sm:$0xff]   ;;  %v3430_v31 = vld [vmem:[%s5178_s0 + $0x58] sm:$0xff]  }
   0xa   :  { %v3429_v30 = vld [vmem:[%s5178_s0 + $0x250] sm:$0xff]   ;;  %v3431_v32 = vld [vmem:[%s5178_s0 + $0x258] sm:$0xff]   ;;  %v3432_v33 = vld [vmem:[%s5178_s0 + $0x60] sm:$0xff]  }
   0xb   :  { %3131 = vmatpush3.bf16.msra.mxu0 %v3405_v2  ;;  %3399 = vmatpush3.bf16.msra.mxu1 %v3405_v2  ;;  %v3433_v34 = vld [vmem:[%s5178_s0 + $0x260] sm:$0xff]   ;;  %v3434_v35 = vld [vmem:[%s5178_s0 + $0x68] sm:$0xff]   ;;  %v3436_v37 = vld [vmem:[%s5178_s0 + $0x70] sm:$0xff]  }
   0xc   :  { %3132 = vmatprep.subr.bf16.mxu0 %v3406_v7  ;;  %3395 = vmatprep.subr.bf16.mxu1 %v3406_v7  ;;  %v3435_v36 = vld [vmem:[%s5178_s0 + $0x268] sm:$0xff]   ;;  %v3437_v38 = vld [vmem:[%s5178_s0 + $0x270] sm:$0xff]   ;;  %v3438_v39 = vld [vmem:[%s5178_s0 + $0x78] sm:$0xff]  }
   0xd   :  { %v3439_v40 = vld [vmem:[%s5178_s0 + $0x278] sm:$0xff]   ;;  %v3440_v41 = vld [vmem:[%s5178_s0 + $0x80] sm:$0xff]   ;;  %v3442_v43 = vld [vmem:[%s5178_s0 + $0x88] sm:$0xff]  }
   0xe   :  { %v3441_v42 = vld [vmem:[%s5178_s0 + $0x280] sm:$0xff]   ;;  %v3443_v44 = vld [vmem:[%s5178_s0 + $0x288] sm:$0xff]   ;;  %v3444_v45 = vld [vmem:[%s5178_s0 + $0x90] sm:$0xff]  }
   0xf   :  { %3133 = vmatpush3.bf16.msra.mxu0 %v3406_v7  ;;  %3400 = vmatpush3.bf16.msra.mxu1 %v3406_v7  ;;  %v3445_v46 = vld [vmem:[%s5178_s0 + $0x290] sm:$0xff]   ;;  %v3446_v47 = vld [vmem:[%s5178_s0 + $0x98] sm:$0xff]   ;;  %v3448_v49 = vld [vmem:[%s5178_s0 + $0xa0] sm:$0xff]  }
  0x10   :  { %3134 = vmatprep.subr.bf16.mxu0 %v1340_v10  ;;  %3396 = vmatprep.subr.bf16.mxu1 %v1340_v10  ;;  %v3447_v48 = vld [vmem:[%s5178_s0 + $0x298] sm:$0xff]   ;;  %v3449_v50 = vld [vmem:[%s5178_s0 + $0x2a0] sm:$0xff]   ;;  %v3450_v51 = vld [vmem:[%s5178_s0 + $0xa8] sm:$0xff]  }
  0x11   :  { %v3451_v52 = vld [vmem:[%s5178_s0 + $0x2a8] sm:$0xff]   ;;  %v3452_v53 = vld [vmem:[%s5178_s0 + $0xb0] sm:$0xff]   ;;  %v3454_v55 = vld [vmem:[%s5178_s0 + $0xb8] sm:$0xff]  }
  0x12   :  { %v3453_v54 = vld [vmem:[%s5178_s0 + $0x2b0] sm:$0xff]   ;;  %v3455_v56 = vld [vmem:[%s5178_s0 + $0x2b8] sm:$0xff]   ;;  %v3456_v57 = vld [vmem:[%s5178_s0 + $0xc0] sm:$0xff]  }
  0x13   :  { %3135 = vmatpush3.bf16.msra.mxu0 %v1340_v10  ;;  %3401 = vmatpush3.bf16.msra.mxu1 %v1340_v10  ;;  %v3457_v58 = vld [vmem:[%s5178_s0 + $0x2c0] sm:$0xff]   ;;  %v3458_v59 = vld [vmem:[%s5178_s0 + $0xc8] sm:$0xff]   ;;  %v3460_v61 = vld [vmem:[%s5178_s0 + $0xd0] sm:$0xff]  }
  0x14   :  { %v3459_v60 = vld [vmem:[%s5178_s0 + $0x2c8] sm:$0xff]   ;;  %v3461_v62 = vld [vmem:[%s5178_s0 + $0x2d0] sm:$0xff]   ;;  %v3462_v63 = vld [vmem:[%s5178_s0 + $0xd8] sm:$0xff]  }
  0x15   :  { %v3463_v0 = vld [vmem:[%s5178_s0 + $0x2d8] sm:$0xff]   ;;  %v3464_v1 = vld [vmem:[%s5178_s0 + $0xe0] sm:$0xff]   ;;  %v3466_v3 = vld [vmem:[%s5178_s0 + $0xe8] sm:$0xff]  }
  0x16   :  { %3137 = vmatmul.mubr.msk.bf16.vlgmr.msra.gmra.mrb[0].mxu0 %vm950_vm2, %v3410_v11  ;;  %3265 = vmatmul.mubr.msk.bf16.vlgmr.msra.gmra.mrb[0].mxu1 %vm950_vm2, %v3411_v12  ;;  %v3465_v2 = vld [vmem:[%s5178_s0 + $0x2e0] sm:$0xff]   ;;  %v3467_v4 = vld [vmem:[%s5178_s0 + $0x2e8] sm:$0xff]   ;;  %v3468_v5 = vld [vmem:[%s5178_s0 + $0xf0] sm:$0xff]  }
  0x17   :  { %3140 = vmatprep.mubr.msk.bf16.mxu0 %vm950_vm2, %v3412_v13  ;;  %3268 = vmatprep.mubr.msk.bf16.mxu1 %vm950_vm2, %v3413_v14  ;;  %v3469_v6 = vld [vmem:[%s5178_s0 + $0x2f0] sm:$0xff]   ;;  %v3470_v7 = vld [vmem:[%s5178_s0 + $0xf8] sm:$0xff]   ;;  %v3472_v9 = vld [vmem:[%s5178_s0 + $0x100] sm:$0xff]  }
  0x18   :  { %v3471_v8 = vld [vmem:[%s5178_s0 + $0x2f8] sm:$0xff]   ;;  %v3473_v10 = vld [vmem:[%s5178_s0 + $0x300] sm:$0xff]   ;;  %v3474_v11 = vld [vmem:[%s5178_s0 + $0x108] sm:$0xff]  }
  0x19   :  { %v3475_v12 = vld [vmem:[%s5178_s0 + $0x308] sm:$0xff]   ;;  %v3476_v13 = vld [vmem:[%s5178_s0 + $0x110] sm:$0xff]  }
  0x1a   :  { %v3477_v14 = vld [vmem:[%s5178_s0 + $0x310] sm:$0xff]  }
  0x1e   :  { %3141 = vmatmul.mubr.msk.bf16.gmra.mrb[4].mxu0 %vm950_vm2, %v3414_v15  ;;  %3269 = vmatmul.mubr.msk.bf16.gmra.mrb[4].mxu1 %vm950_vm2, %v3415_v16  ;;  %v3478_v15 = vld [vmem:[%s5178_s0 + $0x118] sm:$0xff]  }
  0x1f   :  { %3144 = vmatprep.mubr.msk.bf16.mxu0 %vm950_vm2, %v3416_v17  ;;  %3272 = vmatprep.mubr.msk.bf16.mxu1 %vm950_vm2, %v3417_v18  ;;  %v3479_v16 = vld [vmem:[%s5178_s0 + $0x318] sm:$0xff]   ;;  %v3480_v17 = vld [vmem:[%s5178_s0 + $0x120] sm:$0xff]  }
  0x20   :  { %v3481_v18 = vld [vmem:[%s5178_s0 + $0x320] sm:$0xff]  }
  0x26   :  { %3145 = vmatmul.mubr.msk.bf16.gmra.mrb[8].mxu0 %vm950_vm2, %v3418_v19  ;;  %3273 = vmatmul.mubr.msk.bf16.gmra.mrb[8].mxu1 %vm950_vm2, %v3419_v20  ;;  %v3482_v19 = vld [vmem:[%s5178_s0 + $0x128] sm:$0xff]  }
  0x27   :  { %3148 = vmatprep.mubr.msk.bf16.mxu0 %vm950_vm2, %v3420_v21  ;;  %3276 = vmatprep.mubr.msk.bf16.mxu1 %vm950_vm2, %v3421_v22  ;;  %v3483_v20 = vld [vmem:[%s5178_s0 + $0x328] sm:$0xff]   ;;  %v3484_v21 = vld [vmem:[%s5178_s0 + $0x130] sm:$0xff]  }
  0x28   :  { %v3485_v22 = vld [vmem:[%s5178_s0 + $0x330] sm:$0xff]  }
  0x2e   :  { %3149 = vmatmul.mubr.msk.bf16.gmra.mrb[12].mxu0 %vm950_vm2, %v3422_v23  ;;  %3277 = vmatmul.mubr.msk.bf16.gmra.mrb[12].mxu1 %vm950_vm2, %v3423_v24  ;;  %v3486_v23 = vld [vmem:[%s5178_s0 + $0x138] sm:$0xff]  }
  0x2f   :  { %3152 = vmatprep.mubr.msk.bf16.mxu0 %vm950_vm2, %v3424_v25  ;;  %3280 = vmatprep.mubr.msk.bf16.mxu1 %vm950_vm2, %v3425_v26  ;;  %v3487_v24 = vld [vmem:[%s5178_s0 + $0x338] sm:$0xff]   ;;  %v3488_v25 = vld [vmem:[%s5178_s0 + $0x140] sm:$0xff]  }
  0x30   :  { %v3489_v26 = vld [vmem:[%s5178_s0 + $0x340] sm:$0xff]  }
  0x36   :  { %3153 = vmatmul.mubr.msk.bf16.gmra.mrb[16].mxu0 %vm950_vm2, %v3426_v27  ;;  %3281 = vmatmul.mubr.msk.bf16.gmra.mrb[16].mxu1 %vm950_vm2, %v3427_v28  ;;  %v3490_v27 = vld [vmem:[%s5178_s0 + $0x148] sm:$0xff]  }
  0x37   :  { %3156 = vmatprep.mubr.msk.bf16.mxu0 %vm950_vm2, %v3428_v29  ;;  %3284 = vmatprep.mubr.msk.bf16.mxu1 %vm950_vm2, %v3429_v30  ;;  %v3491_v28 = vld [vmem:[%s5178_s0 + $0x348] sm:$0xff]   ;;  %v3492_v29 = vld [vmem:[%s5178_s0 + $0x150] sm:$0xff]  }
  0x38   :  { %v3493_v30 = vld [vmem:[%s5178_s0 + $0x350] sm:$0xff]  }
  0x3e   :  { %3157 = vmatmul.mubr.msk.bf16.gmra.mrb[20].mxu0 %vm950_vm2, %v3430_v31  ;;  %3285 = vmatmul.mubr.msk.bf16.gmra.mrb[20].mxu1 %vm950_vm2, %v3431_v32  ;;  %v3494_v31 = vld [vmem:[%s5178_s0 + $0x158] sm:$0xff]  }
  0x3f   :  { %3160 = vmatprep.mubr.msk.bf16.mxu0 %vm950_vm2, %v3432_v33  ;;  %3288 = vmatprep.mubr.msk.bf16.mxu1 %vm950_vm2, %v3433_v34  ;;  %v3495_v32 = vld [vmem:[%s5178_s0 + $0x358] sm:$0xff]   ;;  %v3496_v33 = vld [vmem:[%s5178_s0 + $0x160] sm:$0xff]  }
  0x40   :  { %v3497_v34 = vld [vmem:[%s5178_s0 + $0x360] sm:$0xff]  }
  0x46   :  { %3161 = vmatmul.mubr.msk.bf16.gmra.mrb[24].mxu0 %vm950_vm2, %v3434_v35  ;;  %3289 = vmatmul.mubr.msk.bf16.gmra.mrb[24].mxu1 %vm950_vm2, %v3435_v36  ;;  %v3498_v35 = vld [vmem:[%s5178_s0 + $0x168] sm:$0xff]  }
  0x47   :  { %3164 = vmatprep.mubr.msk.bf16.mxu0 %vm950_vm2, %v3436_v37  ;;  %3292 = vmatprep.mubr.msk.bf16.mxu1 %vm950_vm2, %v3437_v38  ;;  %v3499_v36 = vld [vmem:[%s5178_s0 + $0x368] sm:$0xff]   ;;  %v3500_v37 = vld [vmem:[%s5178_s0 + $0x170] sm:$0xff]  }
  0x48   :  { %v3501_v38 = vld [vmem:[%s5178_s0 + $0x370] sm:$0xff]  }
  0x4e   :  { %3165 = vmatmul.mubr.msk.bf16.gmra.mrb[28].mxu0 %vm950_vm2, %v3438_v39  ;;  %3293 = vmatmul.mubr.msk.bf16.gmra.mrb[28].mxu1 %vm950_vm2, %v3439_v40  ;;  %v3502_v39 = vld [vmem:[%s5178_s0 + $0x178] sm:$0xff]  }
  0x4f   :  { %3168 = vmatprep.mubr.msk.bf16.mxu0 %vm950_vm2, %v3440_v41  ;;  %3296 = vmatprep.mubr.msk.bf16.mxu1 %vm950_vm2, %v3441_v42  ;;  %v3503_v40 = vld [vmem:[%s5178_s0 + $0x378] sm:$0xff]   ;;  %v3504_v41 = vld [vmem:[%s5178_s0 + $0x180] sm:$0xff]  }
  0x50   :  { %v3505_v42 = vld [vmem:[%s5178_s0 + $0x380] sm:$0xff]  }
  0x56   :  { %3169 = vmatmul.mubr.msk.bf16.gmra.mrb[32].mxu0 %vm950_vm2, %v3442_v43  ;;  %3297 = vmatmul.mubr.msk.bf16.gmra.mrb[32].mxu1 %vm950_vm2, %v3443_v44  ;;  %v3506_v43 = vld [vmem:[%s5178_s0 + $0x188] sm:$0xff]  }
  0x57   :  { %3172 = vmatprep.mubr.msk.bf16.mxu0 %vm950_vm2, %v3444_v45  ;;  %3300 = vmatprep.mubr.msk.bf16.mxu1 %vm950_vm2, %v3445_v46  ;;  %v3507_v44 = vld [vmem:[%s5178_s0 + $0x388] sm:$0xff]   ;;  %v3508_v45 = vld [vmem:[%s5178_s0 + $0x190] sm:$0xff]  }
  0x58   :  { %v3509_v46 = vld [vmem:[%s5178_s0 + $0x390] sm:$0xff]  }
  0x5e   :  { %3173 = vmatmul.mubr.msk.bf16.gmra.mrb[36].mxu0 %vm950_vm2, %v3446_v47  ;;  %3301 = vmatmul.mubr.msk.bf16.gmra.mrb[36].mxu1 %vm950_vm2, %v3447_v48  ;;  %v3510_v47 = vld [vmem:[%s5178_s0 + $0x198] sm:$0xff]  }
  0x5f   :  { %3176 = vmatprep.mubr.msk.bf16.mxu0 %vm950_vm2, %v3448_v49  ;;  %3304 = vmatprep.mubr.msk.bf16.mxu1 %vm950_vm2, %v3449_v50  ;;  %v3511_v48 = vld [vmem:[%s5178_s0 + $0x398] sm:$0xff]   ;;  %v3512_v49 = vld [vmem:[%s5178_s0 + $0x1a0] sm:$0xff]  }
  0x60   :  { %v3513_v50 = vld [vmem:[%s5178_s0 + $0x3a0] sm:$0xff]  }
  0x66   :  { %3177 = vmatmul.mubr.msk.bf16.gmra.mrb[40].mxu0 %vm950_vm2, %v3450_v51  ;;  %3305 = vmatmul.mubr.msk.bf16.gmra.mrb[40].mxu1 %vm950_vm2, %v3451_v52  ;;  %v3514_v51 = vld [vmem:[%s5178_s0 + $0x1a8] sm:$0xff]  }
  0x67   :  { %3180 = vmatprep.mubr.msk.bf16.mxu0 %vm950_vm2, %v3452_v53  ;;  %3308 = vmatprep.mubr.msk.bf16.mxu1 %vm950_vm2, %v3453_v54  ;;  %v3515_v52 = vld [vmem:[%s5178_s0 + $0x3a8] sm:$0xff]   ;;  %v3516_v53 = vld [vmem:[%s5178_s0 + $0x1b0] sm:$0xff]  }
  0x68   :  { %v3517_v54 = vld [vmem:[%s5178_s0 + $0x3b0] sm:$0xff]  }
  0x6e   :  { %3181 = vmatmul.mubr.msk.bf16.gmra.mrb[44].mxu0 %vm950_vm2, %v3454_v55  ;;  %3309 = vmatmul.mubr.msk.bf16.gmra.mrb[44].mxu1 %vm950_vm2, %v3455_v56 }
  0x6f   :  { %3184 = vmatprep.mubr.msk.bf16.mxu0 %vm950_vm2, %v3456_v57  ;;  %3312 = vmatprep.mubr.msk.bf16.mxu1 %vm950_vm2, %v3457_v58 }
  0x76   :  { %3185 = vmatmul.mubr.msk.bf16.gmra.mrb[48].mxu0 %vm950_vm2, %v3458_v59  ;;  %3313 = vmatmul.mubr.msk.bf16.gmra.mrb[48].mxu1 %vm950_vm2, %v3459_v60  ;;  %v3518_v59 = vld [vmem:[%s5178_s0 + $0x1b8] sm:$0xff]  }
  0x77   :  { %3188 = vmatprep.mubr.msk.bf16.mxu0 %vm950_vm2, %v3460_v61  ;;  %3316 = vmatprep.mubr.msk.bf16.mxu1 %vm950_vm2, %v3461_v62  ;;  %v3519_v60 = vld [vmem:[%s5178_s0 + $0x3b8] sm:$0xff]  }
  0x7e   :  { %3189 = vmatmul.mubr.msk.bf16.gmra.mrb[52].mxu0 %vm950_vm2, %v3462_v63  ;;  %3317 = vmatmul.mubr.msk.bf16.gmra.mrb[52].mxu1 %vm950_vm2, %v3463_v0  ;;  %v3520_v63 = vld [vmem:[%s5178_s0 + $0x1c0] sm:$0xff]  }
  0x7f   :  { %3192 = vmatprep.mubr.msk.bf16.mxu0 %vm950_vm2, %v3464_v1  ;;  %3320 = vmatprep.mubr.msk.bf16.mxu1 %vm950_vm2, %v3465_v2  ;;  %v3521_v0 = vld [vmem:[%s5178_s0 + $0x3c0] sm:$0xff]  }
  0x86   :  { %3193 = vmatmul.mubr.msk.bf16.gmra.mrb[56].mxu0 %vm950_vm2, %v3466_v3  ;;  %3321 = vmatmul.mubr.msk.bf16.gmra.mrb[56].mxu1 %vm950_vm2, %v3467_v4 }
  0x87   :  { %3196 = vmatprep.mubr.msk.bf16.mxu0 %vm950_vm2, %v3468_v5  ;;  %3324 = vmatprep.mubr.msk.bf16.mxu1 %vm950_vm2, %v3469_v6 }
  0x8e   :  { %3197 = vmatmul.mubr.msk.bf16.gmra.mrb[60].mxu0 %vm950_vm2, %v3470_v7  ;;  %3325 = vmatmul.mubr.msk.bf16.gmra.mrb[60].mxu1 %vm950_vm2, %v3471_v8  ;;  %v3522_v7 = vld [vmem:[%s5178_s0 + $0x1c8] sm:$0xff]  }
  0x8f   :  { %3200 = vmatprep.mubr.msk.bf16.mxu0 %vm950_vm2, %v3472_v9  ;;  %3328 = vmatprep.mubr.msk.bf16.mxu1 %vm950_vm2, %v3473_v10  ;;  %v3523_v8 = vld [vmem:[%s5178_s0 + $0x3c8] sm:$0xff]  }
  0x96   :  { %3201 = vmatmul.mubr.msk.bf16.gmra.mrb[64].mxu0 %vm950_vm2, %v3474_v11  ;;  %3329 = vmatmul.mubr.msk.bf16.gmra.mrb[64].mxu1 %vm950_vm2, %v3475_v12  ;;  %v3524_v11 = vld [vmem:[%s5178_s0 + $0x1d0] sm:$0xff]  }
  0x97   :  { %3204 = vmatprep.mubr.msk.bf16.mxu0 %vm950_vm2, %v3476_v13  ;;  %3332 = vmatprep.mubr.msk.bf16.mxu1 %vm950_vm2, %v3477_v14  ;;  %v3525_v12 = vld [vmem:[%s5178_s0 + $0x3d0] sm:$0xff]  }
  0x9e   :  { %3205 = vmatmul.mubr.msk.bf16.gmra.mrb[68].mxu0 %vm950_vm2, %v3478_v15  ;;  %3333 = vmatmul.mubr.msk.bf16.gmra.mrb[68].mxu1 %vm950_vm2, %v3479_v16 }
  0x9f   :  { %3208 = vmatprep.mubr.msk.bf16.mxu0 %vm950_vm2, %v3480_v17  ;;  %3336 = vmatprep.mubr.msk.bf16.mxu1 %vm950_vm2, %v3481_v18 }
  0xa6   :  { %3209 = vmatmul.mubr.msk.bf16.gmra.mrb[72].mxu0 %vm950_vm2, %v3482_v19  ;;  %3337 = vmatmul.mubr.msk.bf16.gmra.mrb[72].mxu1 %vm950_vm2, %v3483_v20  ;;  %v3526_v19 = vld [vmem:[%s5178_s0 + $0x1d8] sm:$0xff]  }
  0xa7   :  { %3212 = vmatprep.mubr.msk.bf16.mxu0 %vm950_vm2, %v3484_v21  ;;  %3340 = vmatprep.mubr.msk.bf16.mxu1 %vm950_vm2, %v3485_v22  ;;  %v3527_v20 = vld [vmem:[%s5178_s0 + $0x3d8] sm:$0xff]  }
  0xae   :  { %3213 = vmatmul.mubr.msk.bf16.gmra.mrb[76].mxu0 %vm950_vm2, %v3486_v23  ;;  %3341 = vmatmul.mubr.msk.bf16.gmra.mrb[76].mxu1 %vm950_vm2, %v3487_v24  ;;  %v3528_v23 = vld [vmem:[%s5178_s0 + $0x1e0] sm:$0xff]  }
  0xaf   :  { %3216 = vmatprep.mubr.msk.bf16.mxu0 %vm950_vm2, %v3488_v25  ;;  %3344 = vmatprep.mubr.msk.bf16.mxu1 %vm950_vm2, %v3489_v26  ;;  %v3529_v24 = vld [vmem:[%s5178_s0 + $0x3e0] sm:$0xff]  }
  0xb6   :  { %3217 = vmatmul.mubr.msk.bf16.gmra.mrb[80].mxu0 %vm950_vm2, %v3490_v27  ;;  %3345 = vmatmul.mubr.msk.bf16.gmra.mrb[80].mxu1 %vm950_vm2, %v3491_v28 }
  0xb7   :  { %3220 = vmatprep.mubr.msk.bf16.mxu0 %vm950_vm2, %v3492_v29  ;;  %3348 = vmatprep.mubr.msk.bf16.mxu1 %vm950_vm2, %v3493_v30 }
  0xbe   :  { %3221 = vmatmul.mubr.msk.bf16.gmra.mrb[84].mxu0 %vm950_vm2, %v3494_v31  ;;  %3349 = vmatmul.mubr.msk.bf16.gmra.mrb[84].mxu1 %vm950_vm2, %v3495_v32  ;;  %v3530_v31 = vld [vmem:[%s5178_s0 + $0x1e8] sm:$0xff]  }
  0xbf   :  { %3224 = vmatprep.mubr.msk.bf16.mxu0 %vm950_vm2, %v3496_v33  ;;  %3352 = vmatprep.mubr.msk.bf16.mxu1 %vm950_vm2, %v3497_v34  ;;  %v3531_v32 = vld [vmem:[%s5178_s0 + $0x3e8] sm:$0xff]  }
  0xc6   :  { %3225 = vmatmul.mubr.msk.bf16.gmra.mrb[88].mxu0 %vm950_vm2, %v3498_v35  ;;  %3353 = vmatmul.mubr.msk.bf16.gmra.mrb[88].mxu1 %vm950_vm2, %v3499_v36  ;;  %v3532_v35 = vld [vmem:[%s5178_s0 + $0x1f0] sm:$0xff]  }
  0xc7   :  { %3228 = vmatprep.mubr.msk.bf16.mxu0 %vm950_vm2, %v3500_v37  ;;  %3356 = vmatprep.mubr.msk.bf16.mxu1 %vm950_vm2, %v3501_v38  ;;  %v3533_v36 = vld [vmem:[%s5178_s0 + $0x3f0] sm:$0xff]  }
  0xce   :  { %3229 = vmatmul.mubr.msk.bf16.gmra.mrb[92].mxu0 %vm950_vm2, %v3502_v39  ;;  %3357 = vmatmul.mubr.msk.bf16.gmra.mrb[92].mxu1 %vm950_vm2, %v3503_v40 }
  0xcf   :  { %3232 = vmatprep.mubr.msk.bf16.mxu0 %vm950_vm2, %v3504_v41  ;;  %3360 = vmatprep.mubr.msk.bf16.mxu1 %vm950_vm2, %v3505_v42 }
  0xd6   :  { %3233 = vmatmul.mubr.msk.bf16.gmra.mrb[96].mxu0 %vm950_vm2, %v3506_v43  ;;  %3361 = vmatmul.mubr.msk.bf16.gmra.mrb[96].mxu1 %vm950_vm2, %v3507_v44  ;;  %v3534_v43 = vld [vmem:[%s5178_s0 + $0x1f8] sm:$0xff]  }
  0xd7   :  { %3236 = vmatprep.mubr.msk.bf16.mxu0 %vm950_vm2, %v3508_v45  ;;  %3364 = vmatprep.mubr.msk.bf16.mxu1 %vm950_vm2, %v3509_v46  ;;  %v3535_v44 = vld [vmem:[%s5178_s0 + $0x3f8] sm:$0xff]  }
  0xde   :  { %3237 = vmatmul.mubr.msk.bf16.gmra.mrb[100].mxu0 %vm950_vm2, %v3510_v47  ;;  %3365 = vmatmul.mubr.msk.bf16.gmra.mrb[100].mxu1 %vm950_vm2, %v3511_v48 }
  0xdf   :  { %3240 = vmatprep.mubr.msk.bf16.mxu0 %vm950_vm2, %v3512_v49  ;;  %3368 = vmatprep.mubr.msk.bf16.mxu1 %vm950_vm2, %v3513_v50 }
  0xe6   :  { %3241 = vmatmul.mubr.msk.bf16.gmra.mrb[104].mxu0 %vm950_vm2, %v3514_v51  ;;  %3369 = vmatmul.mubr.msk.bf16.gmra.mrb[104].mxu1 %vm950_vm2, %v3515_v52 }
  0xe7   :  { %3244 = vmatprep.mubr.msk.bf16.mxu0 %vm950_vm2, %v3516_v53  ;;  %3372 = vmatprep.mubr.msk.bf16.mxu1 %vm950_vm2, %v3517_v54 }
  0xe9   :  { %v4012_v55 = vpop.f32.mrb[0].mxu0  ;;  %v4014_v56 = vpop.f32.mrb[0].mxu1 }
  0xea   :  { %5288 = vst [vmem:[#allocation2_spill] sm:$0xff] %v4014_v56  ;;  %v4016_v57 = vpop.f32.mrb[1].mxu0  ;;  %v4018_v58 = vpop.f32.mrb[1].mxu1 }
  0xeb   :  { %5289 = vst [vmem:[#allocation3_spill] sm:$0xff] %v4018_v58  ;;  %v4026_v61 = vpop.f32.mrb[2].mxu0  ;;  %v4028_v62 = vpop.f32.mrb[2].mxu1 }
  0xec   :  { %5290 = vst [vmem:[#allocation4_spill] sm:$0xff] %v4028_v62  ;;  %v4036_v1 = vpop.f32.mrb[3].mxu0  ;;  %v4038_v2 = vpop.f32.mrb[3].mxu1 }
  0xed   :  { %5291 = vst [vmem:[#allocation5_spill] sm:$0xff] %v4038_v2 }
  0xee   :  { %3245 = vmatmul.mubr.msk.bf16.gmra.mrb[108].mxu0 %vm950_vm2, %v3518_v59  ;;  %3373 = vmatmul.mubr.msk.bf16.gmra.mrb[108].mxu1 %vm950_vm2, %v3519_v60 }
  0xef   :  { %3248 = vmatprep.mubr.msk.bf16.mxu0 %vm950_vm2, %v3520_v63  ;;  %3376 = vmatprep.mubr.msk.bf16.mxu1 %vm950_vm2, %v3521_v0 }
  0xf1   :  { %v4044_v3 = vpop.f32.mrb[4].mxu0  ;;  %v4046_v4 = vpop.f32.mrb[4].mxu1 }
  0xf2   :  { %5292 = vst [vmem:[#allocation6_spill] sm:$0xff] %v4046_v4  ;;  %v4048_v5 = vpop.f32.mrb[5].mxu0  ;;  %v4050_v6 = vpop.f32.mrb[5].mxu1 }
  0xf3   :  { %5293 = vst [vmem:[#allocation7_spill] sm:$0xff] %v4050_v6  ;;  %v4058_v9 = vpop.f32.mrb[6].mxu0  ;;  %v4060_v10 = vpop.f32.mrb[6].mxu1 }
  0xf4   :  { %5294 = vst [vmem:[#allocation8_spill] sm:$0xff] %v4060_v10  ;;  %v4068_v13 = vpop.f32.mrb[7].mxu0  ;;  %v4070_v14 = vpop.f32.mrb[7].mxu1 }
  0xf5   :  { %5295 = vst [vmem:[#allocation9_spill] sm:$0xff] %v4070_v14 }
  0xf6   :  { %3249 = vmatmul.mubr.msk.bf16.gmra.mrb[112].mxu0 %vm950_vm2, %v3522_v7  ;;  %3377 = vmatmul.mubr.msk.bf16.gmra.mrb[112].mxu1 %vm950_vm2, %v3523_v8 }
  0xf7   :  { %3252 = vmatprep.mubr.msk.bf16.mxu0 %vm950_vm2, %v3524_v11  ;;  %3380 = vmatprep.mubr.msk.bf16.mxu1 %vm950_vm2, %v3525_v12 }
  0xf9   :  { %v4076_v15 = vpop.f32.mrb[8].mxu0  ;;  %v4078_v16 = vpop.f32.mrb[8].mxu1 }
  0xfa   :  { %5296 = vst [vmem:[#allocation10_spill] sm:$0xff] %v4078_v16  ;;  %v4080_v17 = vpop.f32.mrb[9].mxu0  ;;  %v4082_v18 = vpop.f32.mrb[9].mxu1 }
  0xfb   :  { %5297 = vst [vmem:[#allocation11_spill] sm:$0xff] %v4082_v18  ;;  %v4090_v21 = vpop.f32.mrb[10].mxu0  ;;  %v4092_v22 = vpop.f32.mrb[10].mxu1 }
  0xfc   :  { %5298 = vst [vmem:[#allocation12_spill] sm:$0xff] %v4092_v22  ;;  %v4100_v25 = vpop.f32.mrb[11].mxu0  ;;  %v4102_v26 = vpop.f32.mrb[11].mxu1 }
  0xfd   :  { %5299 = vst [vmem:[#allocation13_spill] sm:$0xff] %v4100_v25  ;;  %5300 = vst [vmem:[#allocation14_spill] sm:$0xff] %v4102_v26 }
  0xfe   :  { %3253 = vmatmul.mubr.msk.bf16.gmra.mrb[116].mxu0 %vm950_vm2, %v3526_v19  ;;  %3381 = vmatmul.mubr.msk.bf16.gmra.mrb[116].mxu1 %vm950_vm2, %v3527_v20 }
  0xff   :  { %3256 = vmatprep.mubr.msk.bf16.mxu0 %vm950_vm2, %v3528_v23  ;;  %3384 = vmatprep.mubr.msk.bf16.mxu1 %vm950_vm2, %v3529_v24 }
 0x101   :  { %v4108_v27 = vpop.f32.mrb[12].mxu0  ;;  %v4110_v28 = vpop.f32.mrb[12].mxu1 }
 0x102   :  { %5301 = vst [vmem:[#allocation15_spill] sm:$0xff] %v4108_v27  ;;  %5302 = vst [vmem:[#allocation16_spill] sm:$0xff] %v4110_v28  ;;  %v4112_v29 = vpop.f32.mrb[13].mxu0  ;;  %v4114_v30 = vpop.f32.mrb[13].mxu1 }
 0x103   :  { %5303 = vst [vmem:[#allocation17_spill] sm:$0xff] %v4112_v29  ;;  %5304 = vst [vmem:[#allocation18_spill] sm:$0xff] %v4114_v30  ;;  %v4122_v33 = vpop.f32.mrb[14].mxu0  ;;  %v4124_v34 = vpop.f32.mrb[14].mxu1 }
 0x104   :  { %5305 = vst [vmem:[#allocation19_spill] sm:$0xff] %v4122_v33  ;;  %5306 = vst [vmem:[#allocation20_spill] sm:$0xff] %v4124_v34  ;;  %v4132_v37 = vpop.f32.mrb[15].mxu0  ;;  %v4134_v38 = vpop.f32.mrb[15].mxu1 }
 0x105   :  { %5307 = vst [vmem:[#allocation21_spill] sm:$0xff] %v4132_v37  ;;  %5308 = vst [vmem:[#allocation22_spill] sm:$0xff] %v4134_v38 }
 0x106   :  { %3257 = vmatmul.mubr.msk.bf16.gmra.mrb[120].mxu0 %vm950_vm2, %v3530_v31  ;;  %3385 = vmatmul.mubr.msk.bf16.gmra.mrb[120].mxu1 %vm950_vm2, %v3531_v32 }
 0x107   :  { %3260 = vmatprep.mubr.msk.bf16.mxu0 %vm950_vm2, %v3532_v35  ;;  %3388 = vmatprep.mubr.msk.bf16.mxu1 %vm950_vm2, %v3533_v36 }
 0x109   :  { %v4140_v39 = vpop.f32.mrb[16].mxu0  ;;  %v4142_v40 = vpop.f32.mrb[16].mxu1 }
 0x10a   :  { %5309 = vst [vmem:[#allocation23_spill] sm:$0xff] %v4140_v39  ;;  %5310 = vst [vmem:[#allocation24_spill] sm:$0xff] %v4142_v40  ;;  %v4144_v41 = vpop.f32.mrb[17].mxu0  ;;  %v4146_v42 = vpop.f32.mrb[17].mxu1 }
 0x10b   :  { %5311 = vst [vmem:[#allocation25_spill] sm:$0xff] %v4144_v41  ;;  %5312 = vst [vmem:[#allocation26_spill] sm:$0xff] %v4146_v42  ;;  %v4154_v45 = vpop.f32.mrb[18].mxu0  ;;  %v4156_v46 = vpop.f32.mrb[18].mxu1 }
 0x10c   :  { %5313 = vst [vmem:[#allocation27_spill] sm:$0xff] %v4154_v45  ;;  %5314 = vst [vmem:[#allocation28_spill] sm:$0xff] %v4156_v46  ;;  %v4158_v47 = vpop.f32.mrb[19].mxu0  ;;  %v4160_v48 = vpop.f32.mrb[19].mxu1 }
 0x10d   :  { %5315 = vst [vmem:[#allocation29_spill] sm:$0xff] %v4158_v47  ;;  %5316 = vst [vmem:[#allocation30_spill] sm:$0xff] %v4160_v48 }
 0x10e   :  { %3261 = vmatmul.mubr.msk.bf16.gmra.mrb[124].mxu0 %vm950_vm2, %v3534_v43  ;;  %3389 = vmatmul.mubr.msk.bf16.gmra.mrb[124].mxu1 %vm950_vm2, %v3535_v44 }
 0x111   :  { %v4164_v49 = vpop.f32.mrb[20].mxu0  ;;  %v4166_v50 = vpop.f32.mrb[20].mxu1 }
 0x112   :  { %5317 = vst [vmem:[#allocation31_spill] sm:$0xff] %v4164_v49  ;;  %5318 = vst [vmem:[#allocation32_spill] sm:$0xff] %v4166_v50  ;;  %v4168_v51 = vpop.f32.mrb[21].mxu0  ;;  %v4170_v52 = vpop.f32.mrb[21].mxu1 }
 0x113   :  { %5319 = vst [vmem:[#allocation33_spill] sm:$0xff] %v4168_v51  ;;  %5320 = vst [vmem:[#allocation34_spill] sm:$0xff] %v4170_v52  ;;  %v4172_v53 = vpop.f32.mrb[22].mxu0  ;;  %v4174_v54 = vpop.f32.mrb[22].mxu1 }
 0x114   :  { %5321 = vst [vmem:[#allocation35_spill] sm:$0xff] %v4172_v53  ;;  %5322 = vst [vmem:[#allocation36_spill] sm:$0xff] %v4174_v54  ;;  %v4176_v59 = vpop.f32.mrb[23].mxu0  ;;  %v4178_v60 = vpop.f32.mrb[23].mxu1 }
 0x115   :  { %5323 = vst [vmem:[#allocation37_spill] sm:$0xff] %v4176_v59  ;;  %5324 = vst [vmem:[#allocation38_spill] sm:$0xff] %v4178_v60 }
 0x119   :  { %v4180_v63 = vpop.f32.mrb[24].mxu0  ;;  %v4182_v0 = vpop.f32.mrb[24].mxu1 }
 0x11a   :  { %5325 = vst [vmem:[#allocation39_spill] sm:$0xff] %v4180_v63  ;;  %5326 = vst [vmem:[#allocation40_spill] sm:$0xff] %v4182_v0  ;;  %v4184_v7 = vpop.f32.mrb[25].mxu0  ;;  %v4186_v8 = vpop.f32.mrb[25].mxu1 }
 0x11b   :  { %5327 = vst [vmem:[#allocation41_spill] sm:$0xff] %v4184_v7  ;;  %5328 = vst [vmem:[#allocation42_spill] sm:$0xff] %v4186_v8  ;;  %v4188_v11 = vpop.f32.mrb[26].mxu0  ;;  %v4190_v12 = vpop.f32.mrb[26].mxu1 }
 0x11c   :  { %5329 = vst [vmem:[#allocation43_spill] sm:$0xff] %v4188_v11  ;;  %5330 = vst [vmem:[#allocation44_spill] sm:$0xff] %v4190_v12  ;;  %v4192_v19 = vpop.f32.mrb[27].mxu0  ;;  %v4194_v20 = vpop.f32.mrb[27].mxu1 }
 0x11d   :  { %5331 = vst [vmem:[#allocation45_spill] sm:$0xff] %v4192_v19  ;;  %5332 = vst [vmem:[#allocation46_spill] sm:$0xff] %v4194_v20 }
 0x121   :  { %v4196_v23 = vpop.f32.mrb[28].mxu0  ;;  %v4198_v24 = vpop.f32.mrb[28].mxu1 }
 0x122   :  { %5333 = vst [vmem:[#allocation47_spill] sm:$0xff] %v4196_v23  ;;  %5334 = vst [vmem:[#allocation48_spill] sm:$0xff] %v4198_v24  ;;  %v4200_v31 = vpop.f32.mrb[29].mxu0  ;;  %v4202_v32 = vpop.f32.mrb[29].mxu1 }
 0x123   :  { %5335 = vst [vmem:[#allocation49_spill] sm:$0xff] %v4200_v31  ;;  %5336 = vst [vmem:[#allocation50_spill] sm:$0xff] %v4202_v32  ;;  %v4204_v35 = vpop.f32.mrb[30].mxu0  ;;  %v4206_v36 = vpop.f32.mrb[30].mxu1 }
 0x124   :  { %5337 = vst [vmem:[#allocation51_spill] sm:$0xff] %v4204_v35  ;;  %5338 = vst [vmem:[#allocation52_spill] sm:$0xff] %v4206_v36  ;;  %v4208_v43 = vpop.f32.mrb[31].mxu0  ;;  %v4210_v44 = vpop.f32.mrb[31].mxu1 }
 0x125   :  { %5339 = vst [vmem:[#allocation53_spill] sm:$0xff] %v4208_v43  ;;  %5340 = vst [vmem:[#allocation54_spill] sm:$0xff] %v4210_v44 }
 0x129   :  { %v4212_v12 = vpop.f32.mrb[32].mxu0  ;;  %v4214_v19 = vpop.f32.mrb[32].mxu1 }
 0x12a   :  { %5341 = vst [vmem:[#allocation55_spill] sm:$0xff] %v4214_v19  ;;  %v4220_v24 = vpop.f32.mrb[33].mxu0  ;;  %v4222_v32 = vpop.f32.mrb[33].mxu1 }
 0x12b   :  { %5342 = vst [vmem:[#allocation56_spill] sm:$0xff] %v4222_v32  ;;  %v4228_v43 = vpop.f32.mrb[34].mxu0  ;;  %v4230_v35 = vpop.f32.mrb[34].mxu1 }
 0x12c   :  { %5343 = vst [vmem:[#allocation57_spill] sm:$0xff] %v4230_v35  ;;  %v4236_v19 = vpop.f32.mrb[35].mxu0  ;;  %v4238_v56 = vpop.f32.mrb[35].mxu1 }
 0x12d   :  { %5344 = vst [vmem:[#allocation58_spill] sm:$0xff] %v4238_v56 }
 0x131   :  { %v4244_v32 = vpop.f32.mrb[36].mxu0  ;;  %v4246_v58 = vpop.f32.mrb[36].mxu1 }
 0x132   :  { %5345 = vst [vmem:[#allocation59_spill] sm:$0xff] %v4246_v58  ;;  %v4252_v35 = vpop.f32.mrb[37].mxu0  ;;  %v4254_v62 = vpop.f32.mrb[37].mxu1 }
 0x133   :  { %5346 = vst [vmem:[#allocation60_spill] sm:$0xff] %v4254_v62  ;;  %v4260_v56 = vpop.f32.mrb[38].mxu0  ;;  %v4262_v2 = vpop.f32.mrb[38].mxu1 }
 0x134   :  { %5347 = vst [vmem:[#allocation61_spill] sm:$0xff] %v4262_v2  ;;  %v4268_v58 = vpop.f32.mrb[39].mxu0  ;;  %v4270_v4 = vpop.f32.mrb[39].mxu1 }
 0x135   :  { %5348 = vst [vmem:[#allocation62_spill] sm:$0xff] %v4270_v4 }
 0x139   :  { %v4276_v62 = vpop.f32.mrb[40].mxu0  ;;  %v4278_v6 = vpop.f32.mrb[40].mxu1 }
 0x13a   :  { %5349 = vst [vmem:[#allocation63_spill] sm:$0xff] %v4278_v6  ;;  %v4284_v2 = vpop.f32.mrb[41].mxu0  ;;  %v4286_v10 = vpop.f32.mrb[41].mxu1 }
 0x13b   :  { %5350 = vst [vmem:[#allocation64_spill] sm:$0xff] %v4286_v10  ;;  %v4292_v4 = vpop.f32.mrb[42].mxu0  ;;  %v4294_v14 = vpop.f32.mrb[42].mxu1 }
 0x13c   :  { %5351 = vst [vmem:[#allocation65_spill] sm:$0xff] %v4292_v4  ;;  %5352 = vst [vmem:[#allocation66_spill] sm:$0xff] %v4294_v14  ;;  %v4300_v6 = vpop.f32.mrb[43].mxu0  ;;  %v4302_v16 = vpop.f32.mrb[43].mxu1 }
 0x13d   :  { %5353 = vst [vmem:[#allocation67_spill] sm:$0xff] %v4300_v6  ;;  %5354 = vst [vmem:[#allocation68_spill] sm:$0xff] %v4302_v16 }
 0x141   :  { %v4308_v10 = vpop.f32.mrb[44].mxu0  ;;  %v4310_v18 = vpop.f32.mrb[44].mxu1 }
 0x142   :  { %5355 = vst [vmem:[#allocation69_spill] sm:$0xff] %v4308_v10  ;;  %5356 = vst [vmem:[#allocation70_spill] sm:$0xff] %v4310_v18  ;;  %v4316_v14 = vpop.f32.mrb[45].mxu0  ;;  %v4318_v22 = vpop.f32.mrb[45].mxu1 }
 0x143   :  { %5357 = vst [vmem:[#allocation71_spill] sm:$0xff] %v4316_v14  ;;  %5358 = vst [vmem:[#allocation72_spill] sm:$0xff] %v4318_v22  ;;  %v4324_v16 = vpop.f32.mrb[46].mxu0  ;;  %v4326_v26 = vpop.f32.mrb[46].mxu1 }
 0x144   :  { %5359 = vst [vmem:[#allocation73_spill] sm:$0xff] %v4324_v16  ;;  %5360 = vst [vmem:[#allocation74_spill] sm:$0xff] %v4326_v26  ;;  %v4332_v18 = vpop.f32.mrb[47].mxu0  ;;  %v4334_v28 = vpop.f32.mrb[47].mxu1 }
 0x145   :  { %5361 = vst [vmem:[#allocation75_spill] sm:$0xff] %v4332_v18  ;;  %5362 = vst [vmem:[#allocation76_spill] sm:$0xff] %v4334_v28 }
 0x149   :  { %v4340_v22 = vpop.f32.mrb[48].mxu0  ;;  %v4342_v30 = vpop.f32.mrb[48].mxu1 }
 0x14a   :  { %5363 = vst [vmem:[#allocation77_spill] sm:$0xff] %v4340_v22  ;;  %5364 = vst [vmem:[#allocation78_spill] sm:$0xff] %v4342_v30  ;;  %v4348_v26 = vpop.f32.mrb[49].mxu0  ;;  %v4350_v34 = vpop.f32.mrb[49].mxu1 }
 0x14b   :  { %5365 = vst [vmem:[#allocation79_spill] sm:$0xff] %v4348_v26  ;;  %5366 = vst [vmem:[#allocation80_spill] sm:$0xff] %v4350_v34  ;;  %v4356_v28 = vpop.f32.mrb[50].mxu0  ;;  %v4358_v38 = vpop.f32.mrb[50].mxu1 }
 0x14c   :  { %5367 = vst [vmem:[#allocation81_spill] sm:$0xff] %v4356_v28  ;;  %5368 = vst [vmem:[#allocation82_spill] sm:$0xff] %v4358_v38  ;;  %v4364_v30 = vpop.f32.mrb[51].mxu0  ;;  %v4366_v40 = vpop.f32.mrb[51].mxu1 }
 0x14d   :  { %5369 = vst [vmem:[#allocation83_spill] sm:$0xff] %v4364_v30  ;;  %5370 = vst [vmem:[#allocation84_spill] sm:$0xff] %v4366_v40 }
 0x151   :  { %v4372_v34 = vpop.f32.mrb[52].mxu0  ;;  %v4374_v42 = vpop.f32.mrb[52].mxu1 }
 0x152   :  { %5371 = vst [vmem:[#allocation85_spill] sm:$0xff] %v4372_v34  ;;  %5372 = vst [vmem:[#allocation86_spill] sm:$0xff] %v4374_v42  ;;  %v4380_v38 = vpop.f32.mrb[53].mxu0  ;;  %v4382_v46 = vpop.f32.mrb[53].mxu1 }
 0x153   :  { %5373 = vst [vmem:[#allocation87_spill] sm:$0xff] %v4380_v38  ;;  %5374 = vst [vmem:[#allocation88_spill] sm:$0xff] %v4382_v46  ;;  %v4388_v40 = vpop.f32.mrb[54].mxu0  ;;  %v4390_v48 = vpop.f32.mrb[54].mxu1 }
 0x154   :  { %5375 = vst [vmem:[#allocation89_spill] sm:$0xff] %v4388_v40  ;;  %5376 = vst [vmem:[#allocation90_spill] sm:$0xff] %v4390_v48  ;;  %v4396_v42 = vpop.f32.mrb[55].mxu0  ;;  %v4398_v50 = vpop.f32.mrb[55].mxu1 }
 0x155   :  { %5377 = vst [vmem:[#allocation91_spill] sm:$0xff] %v4396_v42  ;;  %5378 = vst [vmem:[#allocation92_spill] sm:$0xff] %v4398_v50 }
 0x159   :  { %v4404_v46 = vpop.f32.mrb[56].mxu0  ;;  %v4406_v52 = vpop.f32.mrb[56].mxu1 }
 0x15a   :  { %5379 = vst [vmem:[#allocation93_spill] sm:$0xff] %v4404_v46  ;;  %5380 = vst [vmem:[#allocation94_spill] sm:$0xff] %v4406_v52  ;;  %v4412_v48 = vpop.f32.mrb[57].mxu0  ;;  %v4414_v54 = vpop.f32.mrb[57].mxu1 }
 0x15b   :  { %5381 = vst [vmem:[#allocation95_spill] sm:$0xff] %v4412_v48  ;;  %5382 = vst [vmem:[#allocation96_spill] sm:$0xff] %v4414_v54  ;;  %v4420_v50 = vpop.f32.mrb[58].mxu0  ;;  %v4422_v60 = vpop.f32.mrb[58].mxu1 }
 0x15c   :  { %5383 = vst [vmem:[#allocation97_spill] sm:$0xff] %v4420_v50  ;;  %5384 = vst [vmem:[#allocation98_spill] sm:$0xff] %v4422_v60  ;;  %v4428_v52 = vpop.f32.mrb[59].mxu0  ;;  %v4430_v0 = vpop.f32.mrb[59].mxu1 }
 0x15d   :  { %5386 = vst [vmem:[#allocation99_spill] sm:$0xff] %v4428_v52  ;;  %5387 = vst [vmem:[#allocation100_spill] sm:$0xff] %v4430_v0 }
 0x161   :  { %v4436_v54 = vpop.f32.mrb[60].mxu0  ;;  %v4438_v8 = vpop.f32.mrb[60].mxu1 }
 0x162   :  { %5389 = vst [vmem:[#allocation101_spill] sm:$0xff] %v4436_v54  ;;  %5390 = vst [vmem:[#allocation102_spill] sm:$0xff] %v4438_v8  ;;  %v4444_v60 = vpop.f32.mrb[61].mxu0  ;;  %v4446_v46 = vpop.f32.mrb[61].mxu1 }
 0x163   :  { %5393 = vst [vmem:[#allocation103_spill] sm:$0xff] %v4444_v60  ;;  %5394 = vst [vmem:[#allocation104_spill] sm:$0xff] %v4446_v46  ;;  %v4452_v0 = vpop.f32.mrb[62].mxu0  ;;  %v4454_v20 = vpop.f32.mrb[62].mxu1 }
 0x164   :  { %5397 = vst [vmem:[#allocation105_spill] sm:$0xff] %v4452_v0  ;;  %5398 = vst [vmem:[#allocation106_spill] sm:$0xff] %v4454_v20  ;;  %v4460_v8 = vpop.f32.mrb[63].mxu0  ;;  %v4462_v50 = vpop.f32.mrb[63].mxu1 }
 0x165   :  { %5401 = vst [vmem:[#allocation107_spill] sm:$0xff] %v4460_v8  ;;  %5402 = vst [vmem:[#allocation108_spill] sm:$0xff] %v4462_v50 }
 0x169   :  { %v4468_v46 = vpop.f32.mrb[64].mxu0  ;;  %v4470_v52 = vpop.f32.mrb[64].mxu1 }
 0x16a   :  { %v4472_v11 = vpop.f32.mrb[65].mxu0  ;;  %v4474_v23 = vpop.f32.mrb[65].mxu1 }
 0x16b   :  { %v4476_v0 = vpop.f32.mrb[66].mxu0  ;;  %v4478_v31 = vpop.f32.mrb[66].mxu1 }
 0x16c   :  { %v4480_v20 = vpop.f32.mrb[67].mxu0  ;;  %v4482_v54 = vpop.f32.mrb[67].mxu1 }
 0x171   :  { %v4484_v36 = vpop.f32.mrb[68].mxu0  ;;  %v4486_v8 = vpop.f32.mrb[68].mxu1 }
 0x172   :  { %v4488_v44 = vpop.f32.mrb[69].mxu0  ;;  %v4490_v50 = vpop.f32.mrb[69].mxu1 }
 0x173   :  { %v4492_v60 = vpop.f32.mrb[70].mxu0  ;;  %v4494_v48 = vpop.f32.mrb[70].mxu1 }
 0x174   :  { %v4496_v63 = vpop.f32.mrb[71].mxu0  ;;  %v4498_v7 = vpop.f32.mrb[71].mxu1 }
 0x179   :  { %v4500_v42 = vpop.f32.mrb[72].mxu0  ;;  %v4502_v59 = vpop.f32.mrb[72].mxu1 }
 0x17a   :  { %v4504_v40 = vpop.f32.mrb[73].mxu0  ;;  %v4506_v53 = vpop.f32.mrb[73].mxu1 }
 0x17b   :  { %v4508_v38 = vpop.f32.mrb[74].mxu0  ;;  %v4510_v51 = vpop.f32.mrb[74].mxu1 }
 0x17c   :  { %v4512_v34 = vpop.f32.mrb[75].mxu0  ;;  %v4514_v49 = vpop.f32.mrb[75].mxu1 }
 0x181   :  { %v4516_v30 = vpop.f32.mrb[76].mxu0  ;;  %v4518_v47 = vpop.f32.mrb[76].mxu1 }
 0x182   :  { %5405 = vst [vmem:[#allocation109_spill] sm:$0xff] %v4516_v30  ;;  %5406 = vst [vmem:[#allocation110_spill] sm:$0xff] %v4518_v47  ;;  %v4520_v28 = vpop.f32.mrb[77].mxu0  ;;  %v4522_v45 = vpop.f32.mrb[77].mxu1 }
 0x183   :  { %5407 = vst [vmem:[#allocation111_spill] sm:$0xff] %v4520_v28  ;;  %5408 = vst [vmem:[#allocation112_spill] sm:$0xff] %v4522_v45  ;;  %v4524_v26 = vpop.f32.mrb[78].mxu0  ;;  %v4526_v41 = vpop.f32.mrb[78].mxu1 }
 0x184   :  { %5409 = vst [vmem:[#allocation113_spill] sm:$0xff] %v4524_v26  ;;  %5410 = vst [vmem:[#allocation114_spill] sm:$0xff] %v4526_v41  ;;  %v4528_v22 = vpop.f32.mrb[79].mxu0  ;;  %v4530_v39 = vpop.f32.mrb[79].mxu1 }
 0x185   :  { %5411 = vst [vmem:[#allocation115_spill] sm:$0xff] %v4528_v22  ;;  %5412 = vst [vmem:[#allocation116_spill] sm:$0xff] %v4530_v39 }
 0x189   :  { %v4532_v18 = vpop.f32.mrb[80].mxu0  ;;  %v4534_v37 = vpop.f32.mrb[80].mxu1 }
 0x18a   :  { %5413 = vst [vmem:[#allocation117_spill] sm:$0xff] %v4532_v18  ;;  %5414 = vst [vmem:[#allocation118_spill] sm:$0xff] %v4534_v37  ;;  %v4536_v16 = vpop.f32.mrb[81].mxu0  ;;  %v4538_v33 = vpop.f32.mrb[81].mxu1 }
 0x18b   :  { %5415 = vst [vmem:[#allocation119_spill] sm:$0xff] %v4536_v16  ;;  %5416 = vst [vmem:[#allocation120_spill] sm:$0xff] %v4538_v33  ;;  %v4540_v14 = vpop.f32.mrb[82].mxu0  ;;  %v4542_v29 = vpop.f32.mrb[82].mxu1 }
 0x18c   :  { %5417 = vst [vmem:[#allocation121_spill] sm:$0xff] %v4540_v14  ;;  %5418 = vst [vmem:[#allocation122_spill] sm:$0xff] %v4542_v29  ;;  %v4544_v10 = vpop.f32.mrb[83].mxu0  ;;  %v4546_v26 = vpop.f32.mrb[83].mxu1 }
 0x18d   :  { %5419 = vst [vmem:[#allocation123_spill] sm:$0xff] %v4544_v10  ;;  %5420 = vst [vmem:[#allocation124_spill] sm:$0xff] %v4546_v26 }
 0x191   :  { %v4548_v41 = vpop.f32.mrb[84].mxu0  ;;  %v4550_v22 = vpop.f32.mrb[84].mxu1 }
 0x192   :  { %5421 = vst [vmem:[#allocation125_spill] sm:$0xff] %v4548_v41  ;;  %5422 = vst [vmem:[#allocation126_spill] sm:$0xff] %v4550_v22  ;;  %v4552_v39 = vpop.f32.mrb[85].mxu0  ;;  %v4554_v18 = vpop.f32.mrb[85].mxu1 }
 0x193   :  { %5423 = vst [vmem:[#allocation127_spill] sm:$0xff] %v4552_v39  ;;  %5424 = vst [vmem:[#allocation128_spill] sm:$0xff] %v4554_v18  ;;  %v4556_v37 = vpop.f32.mrb[86].mxu0  ;;  %v4558_v16 = vpop.f32.mrb[86].mxu1 }
 0x194   :  { %5425 = vst [vmem:[#allocation129_spill] sm:$0xff] %v4556_v37  ;;  %5426 = vst [vmem:[#allocation130_spill] sm:$0xff] %v4558_v16  ;;  %v4560_v33 = vpop.f32.mrb[87].mxu0  ;;  %v4562_v14 = vpop.f32.mrb[87].mxu1 }
 0x195   :  { %5427 = vst [vmem:[#allocation131_spill] sm:$0xff] %v4560_v33  ;;  %5428 = vst [vmem:[#allocation132_spill] sm:$0xff] %v4562_v14 }
 0x199   :  { %v4564_v29 = vpop.f32.mrb[88].mxu0  ;;  %v4566_v10 = vpop.f32.mrb[88].mxu1 }
 0x19a   :  { %5429 = vst [vmem:[#allocation133_spill] sm:$0xff] %v4564_v29  ;;  %5430 = vst [vmem:[#allocation134_spill] sm:$0xff] %v4566_v10  ;;  %v4568_v26 = vpop.f32.mrb[89].mxu0  ;;  %v4570_v41 = vpop.f32.mrb[89].mxu1 }
 0x19b   :  { %5431 = vst [vmem:[#allocation135_spill] sm:$0xff] %v4568_v26  ;;  %5432 = vst [vmem:[#allocation136_spill] sm:$0xff] %v4570_v41  ;;  %v4572_v22 = vpop.f32.mrb[90].mxu0  ;;  %v4574_v39 = vpop.f32.mrb[90].mxu1 }
 0x19c   :  { %5433 = vst [vmem:[#allocation137_spill] sm:$0xff] %v4572_v22  ;;  %5434 = vst [vmem:[#allocation138_spill] sm:$0xff] %v4574_v39  ;;  %v4576_v18 = vpop.f32.mrb[91].mxu0  ;;  %v4578_v37 = vpop.f32.mrb[91].mxu1 }
 0x19d   :  { %5435 = vst [vmem:[#allocation139_spill] sm:$0xff] %v4576_v18  ;;  %5436 = vst [vmem:[#allocation140_spill] sm:$0xff] %v4578_v37 }
 0x1a1   :  { %v4580_v16 = vpop.f32.mrb[92].mxu0  ;;  %v4582_v33 = vpop.f32.mrb[92].mxu1 }
 0x1a2   :  { %5437 = vst [vmem:[#allocation141_spill] sm:$0xff] %v4580_v16  ;;  %5438 = vst [vmem:[#allocation142_spill] sm:$0xff] %v4582_v33  ;;  %v4584_v14 = vpop.f32.mrb[93].mxu0  ;;  %v4586_v29 = vpop.f32.mrb[93].mxu1 }
 0x1a3   :  { %5439 = vst [vmem:[#allocation143_spill] sm:$0xff] %v4584_v14  ;;  %5440 = vst [vmem:[#allocation144_spill] sm:$0xff] %v4586_v29  ;;  %v4588_v10 = vpop.f32.mrb[94].mxu0  ;;  %v4590_v26 = vpop.f32.mrb[94].mxu1  ;;  %v4601_v29 = vld [vmem:[%s5179_s2] ss:$0 sm:$0xff]  ;;  %v5445_v14 = vmax.f32 %v4012_v55, %v4212_v12 }
 0x1a4   :  { %5441 = vst [vmem:[#allocation145_spill] sm:$0xff] %v4588_v10  ;;  %5442 = vst [vmem:[#allocation146_spill] sm:$0xff] %v4590_v26  ;;  %v4592_v41 = vpop.f32.mrb[95].mxu0  ;;  %v4594_v22 = vpop.f32.mrb[95].mxu1  ;;  %v5455_v12 = vld [vmem:[#allocation57_spill] sm:$0xff] }
 0x1a5   :  { %5443 = vst [vmem:[#allocation147_spill] sm:$0xff] %v4592_v41  ;;  %5444 = vst [vmem:[#allocation148_spill] sm:$0xff] %v4594_v22 }
 0x1a9   :  { %v3234_v39 = vpop.f32.mrb[96].mxu0  ;;  %v3362_v18 = vpop.f32.mrb[96].mxu1 }
 0x1aa   :  { %v2465_v37 = vmax.f32 %v4468_v46, %v3234_v39  ;;  %v2497_v16 = vmax.f32 %v4470_v52, %v3362_v18  ;;  %v1760_v27 = vpop.f32.mrb[97].mxu0  ;;  %v2272_v33 = vpop.f32.mrb[97].mxu1  ;;  %v5446_v46 = vld [vmem:[#allocation2_spill] sm:$0xff]  ;;  %v5447_v18 = vld [vmem:[#allocation55_spill] sm:$0xff] }
 0x1ab   :  { %v2463_v26 = vmax.f32 %v4472_v11, %v1760_v27  ;;  %v2495_v41 = vmax.f32 %v4474_v23, %v2272_v33  ;;  %v3235_v10 = vpop.f32.mrb[98].mxu0  ;;  %v3363_v22 = vpop.f32.mrb[98].mxu1  ;;  %v5448_v52 = vmax.f32 %v5446_v46, %v5447_v18  ;;  %v5449_v27 = vmax.f32 %v4016_v57, %v4220_v24  ;;  %v5450_v11 = vld [vmem:[#allocation3_spill] sm:$0xff]  ;;  %v5451_v23 = vld [vmem:[#allocation56_spill] sm:$0xff] }
 0x1ac   :  { %v2529_v39 = vmax.f32 %v5445_v14, %v2465_v37  ;;  %v2466_v28 = vmax.f32 %v4476_v0, %v3235_v10  ;;  %v2498_v47 = vmax.f32 %v4478_v31, %v3363_v22  ;;  %v1763_v30 = vpop.f32.mrb[99].mxu0  ;;  %v2275_v6 = vpop.f32.mrb[99].mxu1  ;;  %v5452_v25 = vmax.f32 %v5450_v11, %v5451_v23  ;;  %v5454_v0 = vld [vmem:[#allocation4_spill] sm:$0xff]  ;;  %v5462_v11 = vld [vmem:[#allocation6_spill] sm:$0xff]  ;;  %v5463_v23 = vld [vmem:[#allocation59_spill] sm:$0xff] }
 0x1ad   :  { %v2561_v45 = vmax.f32 %v5448_v52, %v2497_v16  ;;  %v2527_v33 = vmax.f32 %v5449_v27, %v2463_v26  ;;  %v2464_v55 = vmax.f32 %v4480_v20, %v1763_v30  ;;  %v2496_v14 = vmax.f32 %v4482_v54, %v2275_v6  ;;  %v5459_v54 = vld [vmem:[#allocation58_spill] sm:$0xff] }
 0x1ae   :  { %v2559_v4 = vmax.f32 %v5452_v25, %v2495_v41  ;;  %v2600_v16 = vadd.f32 %v4601_v29, %v2529_v39  ;;  %v5453_v22 = vmax.f32 %v4026_v61, %v4228_v43  ;;  %v5456_v57 = vmax.f32 %v5454_v0, %v5455_v12  ;;  %v5458_v41 = vld [vmem:[#allocation5_spill] sm:$0xff]  ;;  %v5466_v0 = vld [vmem:[#allocation7_spill] sm:$0xff]  ;;  %v5467_v12 = vld [vmem:[#allocation60_spill] sm:$0xff] }
 0x1af   :  { %v2632_v10 = vadd.f32 %v4601_v29, %v2561_v45  ;;  %v2598_v24 = vadd.f32 %v4601_v29, %v2527_v33  ;;  %v5457_v30 = vmax.f32 %v4036_v1, %v4236_v19  ;;  %v5460_v20 = vmax.f32 %v5458_v41, %v5459_v54 }
 0x1b0   :  { %v2530_v37 = vmax.f32 %v5453_v22, %v2466_v28  ;;  %v2562_v26 = vmax.f32 %v5456_v57, %v2498_v47  ;;  %v2630_v25 = vadd.f32 %v4601_v29, %v2559_v4  ;;  %2665 = vst.msk [vmem:[%s5180_s3 + $0x10] sm:$0xff] %vm2662_vm3, %v2600_v16  ;;  %v5468_v57 = vmax.f32 %v5466_v0, %v5467_v12  ;;  %v5487_v12 = vld [vmem:[#allocation12_spill] sm:$0xff] }
 0x1b1   :  { %v2528_v6 = vmax.f32 %v5457_v30, %v2464_v55  ;;  %v2560_v45 = vmax.f32 %v5460_v20, %v2496_v14  ;;  %2697 = vst.msk [vmem:[%s5180_s3 + $0x110] sm:$0xff] %vm2662_vm3, %v2632_v10  ;;  %2663 = vst.msk [vmem:[%s5180_s3] sm:$0xff] %vm2662_vm3, %v2598_v24  ;;  %v3238_v47 = vpop.f32.mrb[100].mxu0  ;;  %v3366_v19 = vpop.f32.mrb[100].mxu1  ;;  %v5464_v55 = vmax.f32 %v5462_v11, %v5463_v23  ;;  %v5470_v30 = vld [vmem:[#allocation8_spill] sm:$0xff]  ;;  %v5474_v20 = vld [vmem:[#allocation9_spill] sm:$0xff] }
 0x1b2   :  { %v2601_v61 = vadd.f32 %v4601_v29, %v2530_v37  ;;  %v2633_v4 = vadd.f32 %v4601_v29, %v2562_v26  ;;  %2695 = vst.msk [vmem:[%s5180_s3 + $0x100] sm:$0xff] %vm2662_vm3, %v2630_v25  ;;  %v2469_v31 = vmax.f32 %v4484_v36, %v3238_v47  ;;  %v2501_v43 = vmax.f32 %v4486_v8, %v3366_v19  ;;  %v1776_v39 = vpop.f32.mrb[101].mxu0  ;;  %v2288_v46 = vpop.f32.mrb[101].mxu1 }
 0x1b3   :  { %v2599_v1 = vadd.f32 %v4601_v29, %v2528_v6  ;;  %v2631_v28 = vadd.f32 %v4601_v29, %v2560_v45  ;;  %v2467_v18 = vmax.f32 %v4488_v44, %v1776_v39  ;;  %v2499_v52 = vmax.f32 %v4490_v50, %v2288_v46  ;;  %v3239_v27 = vpop.f32.mrb[102].mxu0  ;;  %v3367_v36 = vpop.f32.mrb[102].mxu1  ;;  %v5471_v6 = vld [vmem:[#allocation61_spill] sm:$0xff]  ;;  %v5475_v45 = vld [vmem:[#allocation62_spill] sm:$0xff] }
 0x1b4   :  { %2666 = vst.msk [vmem:[%s5180_s3 + $0x18] sm:$0xff] %vm2662_vm3, %v2601_v61  ;;  %2698 = vst.msk [vmem:[%s5180_s3 + $0x118] sm:$0xff] %vm2662_vm3, %v2633_v4  ;;  %v5461_v8 = vmax.f32 %v4044_v3, %v4244_v32  ;;  %v2565_v14 = vmax.f32 %v5464_v55, %v2501_v43  ;;  %v2470_v16 = vmax.f32 %v4492_v60, %v3239_v27  ;;  %v1779_v22 = vpop.f32.mrb[103].mxu0  ;;  %v2291_v37 = vpop.f32.mrb[103].mxu1  ;;  %v5478_v27 = vld [vmem:[#allocation10_spill] sm:$0xff] }
 0x1b5   :  { %2664 = vst.msk [vmem:[%s5180_s3 + $0x8] sm:$0xff] %vm2662_vm3, %v2599_v1  ;;  %2696 = vst.msk [vmem:[%s5180_s3 + $0x108] sm:$0xff] %vm2662_vm3, %v2631_v28  ;;  %v2502_v10 = vmax.f32 %v4494_v48, %v3367_v36  ;;  %v5465_v44 = vmax.f32 %v4048_v5, %v4252_v35  ;;  %v2563_v26 = vmax.f32 %v5468_v57, %v2499_v52  ;;  %v5479_v36 = vld [vmem:[#allocation63_spill] sm:$0xff]  ;;  %v5488_v57 = vld [vmem:[#allocation66_spill] sm:$0xff] }
 0x1b6   :  { %v2533_v33 = vmax.f32 %v5461_v8, %v2469_v31  ;;  %v2468_v3 = vmax.f32 %v4496_v63, %v1779_v22  ;;  %v2500_v32 = vmax.f32 %v4498_v7, %v2291_v37  ;;  %v2636_v60 = vadd.f32 %v4601_v29, %v2565_v14 }
 0x1b7   :  { %v2531_v50 = vmax.f32 %v5465_v44, %v2467_v18  ;;  %v5469_v48 = vmax.f32 %v4058_v9, %v4260_v56  ;;  %v5472_v5 = vmax.f32 %v5470_v30, %v5471_v6  ;;  %v2634_v54 = vadd.f32 %v4601_v29, %v2563_v26 }
 0x1b8   :  { %v2604_v24 = vadd.f32 %v4601_v29, %v2533_v33  ;;  %v5473_v63 = vmax.f32 %v4068_v13, %v4268_v58  ;;  %v5476_v61 = vmax.f32 %v5474_v20, %v5475_v45  ;;  %2701 = vst.msk [vmem:[%s5180_s3 + $0x130] sm:$0xff] %vm2662_vm3, %v2636_v60  ;;  %v5480_v8 = vmax.f32 %v5478_v27, %v5479_v36  ;;  %v5493_v60 = vld [vmem:[#allocation14_spill] sm:$0xff] }
 0x1b9   :  { %v2534_v25 = vmax.f32 %v5469_v48, %v2470_v16  ;;  %v2566_v35 = vmax.f32 %v5472_v5, %v2502_v10  ;;  %v2602_v41 = vadd.f32 %v4601_v29, %v2531_v50  ;;  %2699 = vst.msk [vmem:[%s5180_s3 + $0x120] sm:$0xff] %vm2662_vm3, %v2634_v54  ;;  %v3242_v1 = vpop.f32.mrb[104].mxu0  ;;  %v3370_v28 = vpop.f32.mrb[104].mxu1  ;;  %v5482_v16 = vld [vmem:[#allocation11_spill] sm:$0xff]  ;;  %v5483_v10 = vld [vmem:[#allocation64_spill] sm:$0xff]  ;;  %v5497_v20 = vld [vmem:[#allocation110_spill] sm:$0xff] }
 0x1ba   :  { %v2532_v7 = vmax.f32 %v5473_v63, %v2468_v3  ;;  %v2564_v4 = vmax.f32 %v5476_v61, %v2500_v32  ;;  %2669 = vst.msk [vmem:[%s5180_s3 + $0x30] sm:$0xff] %vm2662_vm3, %v2604_v24  ;;  %v2473_v47 = vmax.f32 %v4500_v42, %v3242_v1  ;;  %v2505_v19 = vmax.f32 %v4502_v59, %v3370_v28  ;;  %v1792_v31 = vpop.f32.mrb[105].mxu0  ;;  %v2304_v43 = vpop.f32.mrb[105].mxu1  ;;  %v5490_v32 = vld [vmem:[#allocation13_spill] sm:$0xff]  ;;  %v5494_v48 = vld [vmem:[#allocation68_spill] sm:$0xff]  ;;  %v5507_v27 = vld [vmem:[#allocation114_spill] sm:$0xff] }
 0x1bb   :  { %v2605_v56 = vadd.f32 %v4601_v29, %v2534_v25  ;;  %v2637_v9 = vadd.f32 %v4601_v29, %v2566_v35  ;;  %2667 = vst.msk [vmem:[%s5180_s3 + $0x20] sm:$0xff] %vm2662_vm3, %v2602_v41  ;;  %v2471_v39 = vmax.f32 %v4504_v40, %v1792_v31  ;;  %v2503_v46 = vmax.f32 %v4506_v53, %v2304_v43  ;;  %v3243_v18 = vpop.f32.mrb[106].mxu0  ;;  %v3371_v42 = vpop.f32.mrb[106].mxu1  ;;  %v5496_v63 = vld [vmem:[#allocation109_spill] sm:$0xff] }
 0x1bc   :  { %v2603_v58 = vadd.f32 %v4601_v29, %v2532_v7  ;;  %v2635_v13 = vadd.f32 %v4601_v29, %v2564_v4  ;;  %v5477_v59 = vmax.f32 %v4076_v15, %v4276_v62  ;;  %v2569_v33 = vmax.f32 %v5480_v8, %v2505_v19  ;;  %v1795_v55 = vpop.f32.mrb[107].mxu0  ;;  %v2307_v14 = vpop.f32.mrb[107].mxu1  ;;  %v5501_v19 = vld [vmem:[#allocation69_spill] sm:$0xff] }
 0x1bd   :  { %2670 = vst.msk [vmem:[%s5180_s3 + $0x38] sm:$0xff] %vm2662_vm3, %v2605_v56  ;;  %2702 = vst.msk [vmem:[%s5180_s3 + $0x138] sm:$0xff] %vm2662_vm3, %v2637_v9  ;;  %v2474_v11 = vmax.f32 %v4508_v38, %v3243_v18  ;;  %v2506_v23 = vmax.f32 %v4510_v51, %v3371_v42  ;;  %v5481_v40 = vmax.f32 %v4080_v17, %v4284_v2  ;;  %v5485_v51 = vld [vmem:[#allocation65_spill] sm:$0xff]  ;;  %v5498_v56 = vld [vmem:[#allocation111_spill] sm:$0xff] }
 0x1be   :  { %2668 = vst.msk [vmem:[%s5180_s3 + $0x28] sm:$0xff] %vm2662_vm3, %v2603_v58  ;;  %2700 = vst.msk [vmem:[%s5180_s3 + $0x128] sm:$0xff] %vm2662_vm3, %v2635_v13  ;;  %v2537_v52 = vmax.f32 %v5477_v59, %v2473_v47  ;;  %v5484_v22 = vmax.f32 %v5482_v16, %v5483_v10  ;;  %v2472_v62 = vmax.f32 %v4512_v34, %v1795_v55  ;;  %v5491_v34 = vld [vmem:[#allocation67_spill] sm:$0xff]  ;;  %v5499_v58 = vld [vmem:[#allocation112_spill] sm:$0xff] }
 0x1bf   :  { %v2535_v53 = vmax.f32 %v5481_v40, %v2471_v39  ;;  %v2504_v15 = vmax.f32 %v4514_v49, %v2307_v14  ;;  %v2640_v38 = vadd.f32 %v4601_v29, %v2569_v33  ;;  %v5486_v50 = vmax.f32 %v4090_v21, %v5485_v51  ;;  %v5500_v47 = vld [vmem:[#allocation15_spill] sm:$0xff]  ;;  %v5503_v39 = vld [vmem:[#allocation16_spill] sm:$0xff]  ;;  %v5506_v59 = vld [vmem:[#allocation113_spill] sm:$0xff] }
 0x1c0   :  { %v2567_v37 = vmax.f32 %v5484_v22, %v2503_v46  ;;  %v2608_v44 = vadd.f32 %v4601_v29, %v2537_v52  ;;  %v5489_v2 = vmax.f32 %v5487_v12, %v5488_v57  ;;  %v5492_v24 = vmax.f32 %v5490_v32, %v5491_v34  ;;  %v5504_v46 = vld [vmem:[#allocation70_spill] sm:$0xff]  ;;  %v5514_v22 = vld [vmem:[#allocation115_spill] sm:$0xff]  ;;  %v5519_v57 = vld [vmem:[#allocation20_spill] sm:$0xff] }
 0x1c1   :  { %v2538_v0 = vmax.f32 %v5486_v50, %v2474_v11  ;;  %v2606_v26 = vadd.f32 %v4601_v29, %v2535_v53  ;;  %v5495_v25 = vmax.f32 %v5493_v60, %v5494_v48  ;;  %2705 = vst.msk [vmem:[%s5180_s3 + $0x150] sm:$0xff] %vm2662_vm3, %v2640_v38  ;;  %v3246_v41 = vpop.f32.mrb[108].mxu0  ;;  %v3374_v54 = vpop.f32.mrb[108].mxu1  ;;  %v5502_v31 = vmax.f32 %v5500_v47, %v5501_v19  ;;  %v5508_v11 = vld [vmem:[#allocation17_spill] sm:$0xff]  ;;  %v5511_v40 = vld [vmem:[#allocation18_spill] sm:$0xff]  ;;  %v5512_v53 = vld [vmem:[#allocation72_spill] sm:$0xff] }
 0x1c2   :  { %v2570_v17 = vmax.f32 %v5489_v2, %v2506_v23  ;;  %v2638_v3 = vadd.f32 %v4601_v29, %v2567_v37  ;;  %v2536_v49 = vmax.f32 %v5492_v24, %v2472_v62  ;;  %2673 = vst.msk [vmem:[%s5180_s3 + $0x50] sm:$0xff] %vm2662_vm3, %v2608_v44  ;;  %v2477_v7 = vmax.f32 %v5496_v63, %v3246_v41  ;;  %v1808_v61 = vpop.f32.mrb[109].mxu0  ;;  %v2320_v4 = vpop.f32.mrb[109].mxu1  ;;  %v5509_v23 = vld [vmem:[#allocation71_spill] sm:$0xff]  ;;  %v5515_v62 = vld [vmem:[#allocation116_spill] sm:$0xff]  ;;  %v5517_v50 = vld [vmem:[#allocation73_spill] sm:$0xff] }
 0x1c3   :  { %v2568_v30 = vmax.f32 %v5495_v25, %v2504_v15  ;;  %v2609_v21 = vadd.f32 %v4601_v29, %v2538_v0  ;;  %2671 = vst.msk [vmem:[%s5180_s3 + $0x40] sm:$0xff] %vm2662_vm3, %v2606_v26  ;;  %v2509_v45 = vmax.f32 %v5497_v20, %v3374_v54  ;;  %v2475_v9 = vmax.f32 %v5498_v56, %v1808_v61  ;;  %v3247_v1 = vpop.f32.mrb[110].mxu0  ;;  %v3375_v28 = vpop.f32.mrb[110].mxu1  ;;  %v5516_v51 = vld [vmem:[#allocation19_spill] sm:$0xff]  ;;  %v5520_v2 = vld [vmem:[#allocation74_spill] sm:$0xff]  ;;  %v5522_v34 = vld [vmem:[#allocation21_spill] sm:$0xff] }
 0x1c4   :  { %v2641_v6 = vadd.f32 %v4601_v29, %v2570_v17  ;;  %2703 = vst.msk [vmem:[%s5180_s3 + $0x140] sm:$0xff] %vm2662_vm3, %v2638_v3  ;;  %v2607_v5 = vadd.f32 %v4601_v29, %v2536_v49  ;;  %v2507_v13 = vmax.f32 %v5499_v58, %v2320_v4  ;;  %v2541_v43 = vmax.f32 %v5502_v31, %v2477_v7  ;;  %v1811_v8 = vpop.f32.mrb[111].mxu0  ;;  %v2323_v33 = vpop.f32.mrb[111].mxu1  ;;  %v5523_v24 = vld [vmem:[#allocation75_spill] sm:$0xff]  ;;  %v5525_v48 = vld [vmem:[#allocation22_spill] sm:$0xff]  ;;  %v5526_v25 = vld [vmem:[#allocation76_spill] sm:$0xff] }
 0x1c5   :  { %v2639_v35 = vadd.f32 %v4601_v29, %v2568_v30  ;;  %2674 = vst.msk [vmem:[%s5180_s3 + $0x58] sm:$0xff] %vm2662_vm3, %v2609_v21  ;;  %v5505_v18 = vmax.f32 %v5503_v39, %v5504_v46  ;;  %v2478_v52 = vmax.f32 %v5506_v59, %v3247_v1  ;;  %v2510_v36 = vmax.f32 %v5507_v27, %v3375_v28  ;;  %v5528_v7 = vld [vmem:[#allocation117_spill] sm:$0xff]  ;;  %v5532_v19 = vld [vmem:[#allocation23_spill] sm:$0xff]  ;;  %v5535_v46 = vld [vmem:[#allocation24_spill] sm:$0xff] }
 0x1c6   :  { %2706 = vst.msk [vmem:[%s5180_s3 + $0x158] sm:$0xff] %vm2662_vm3, %v2641_v6  ;;  %2672 = vst.msk [vmem:[%s5180_s3 + $0x48] sm:$0xff] %vm2662_vm3, %v2607_v5  ;;  %v5510_v55 = vmax.f32 %v5508_v11, %v5509_v23  ;;  %v5513_v16 = vmax.f32 %v5511_v40, %v5512_v53  ;;  %v2476_v37 = vmax.f32 %v5514_v22, %v1811_v8  ;;  %v5533_v31 = vld [vmem:[#allocation77_spill] sm:$0xff]  ;;  %v5543_v53 = vld [vmem:[#allocation26_spill] sm:$0xff] }
 0x1c7   :  { %2704 = vst.msk [vmem:[%s5180_s3 + $0x148] sm:$0xff] %vm2662_vm3, %v2639_v35  ;;  %v2573_v42 = vmax.f32 %v5505_v18, %v2509_v45  ;;  %v2508_v15 = vmax.f32 %v5515_v62, %v2323_v33  ;;  %v2612_v44 = vadd.f32 %v4601_v29, %v2541_v43  ;;  %v5518_v0 = vmax.f32 %v5516_v51, %v5517_v50  ;;  %v5529_v45 = vld [vmem:[#allocation118_spill] sm:$0xff]  ;;  %v5540_v23 = vld [vmem:[#allocation25_spill] sm:$0xff]  ;;  %v5548_v50 = vld [vmem:[#allocation27_spill] sm:$0xff] }
 0x1c8   :  { %v2539_v14 = vmax.f32 %v5510_v55, %v2475_v9  ;;  %v2571_v10 = vmax.f32 %v5513_v16, %v2507_v13  ;;  %v5521_v17 = vmax.f32 %v5519_v57, %v5520_v2  ;;  %v5524_v49 = vmax.f32 %v5522_v34, %v5523_v24  ;;  %v5530_v9 = vld [vmem:[#allocation119_spill] sm:$0xff]  ;;  %v5531_v13 = vld [vmem:[#allocation120_spill] sm:$0xff]  ;;  %v5536_v18 = vld [vmem:[#allocation78_spill] sm:$0xff] }
 0x1c9   :  { %v2644_v38 = vadd.f32 %v4601_v29, %v2573_v42  ;;  %v2542_v12 = vmax.f32 %v5518_v0, %v2478_v52  ;;  %v5527_v30 = vmax.f32 %v5525_v48, %v5526_v25  ;;  %2677 = vst.msk [vmem:[%s5180_s3 + $0x70] sm:$0xff] %vm2662_vm3, %v2612_v44  ;;  %v3250_v54 = vpop.f32.mrb[112].mxu0  ;;  %v3378_v63 = vpop.f32.mrb[112].mxu1  ;;  %v5534_v43 = vmax.f32 %v5532_v19, %v5533_v31  ;;  %v5538_v52 = vld [vmem:[#allocation121_spill] sm:$0xff]  ;;  %v5541_v55 = vld [vmem:[#allocation79_spill] sm:$0xff]  ;;  %v5544_v16 = vld [vmem:[#allocation80_spill] sm:$0xff] }
 0x1ca   :  { %v2574_v26 = vmax.f32 %v5521_v17, %v2510_v36  ;;  %v2610_v3 = vadd.f32 %v4601_v29, %v2539_v14  ;;  %v2642_v32 = vadd.f32 %v4601_v29, %v2571_v10  ;;  %v2540_v60 = vmax.f32 %v5524_v49, %v2476_v37  ;;  %v1824_v4 = vpop.f32.mrb[113].mxu0  ;;  %v2336_v56 = vpop.f32.mrb[113].mxu1  ;;  %v5539_v36 = vld [vmem:[#allocation122_spill] sm:$0xff]  ;;  %v5546_v37 = vld [vmem:[#allocation123_spill] sm:$0xff]  ;;  %v5549_v0 = vld [vmem:[#allocation81_spill] sm:$0xff] }
 0x1cb   :  { %v2572_v21 = vmax.f32 %v5527_v30, %v2508_v15  ;;  %2709 = vst.msk [vmem:[%s5180_s3 + $0x170] sm:$0xff] %vm2662_vm3, %v2644_v38  ;;  %v2613_v6 = vadd.f32 %v4601_v29, %v2542_v12  ;;  %v2481_v20 = vmax.f32 %v5528_v7, %v3250_v54  ;;  %v2513_v61 = vmax.f32 %v5529_v45, %v3378_v63  ;;  %v3251_v28 = vpop.f32.mrb[114].mxu0  ;;  %v3379_v47 = vpop.f32.mrb[114].mxu1  ;;  %v5547_v15 = vld [vmem:[#allocation124_spill] sm:$0xff]  ;;  %v5552_v17 = vld [vmem:[#allocation82_spill] sm:$0xff]  ;;  %v5554_v24 = vld [vmem:[#allocation29_spill] sm:$0xff] }
 0x1cc   :  { %v2645_v5 = vadd.f32 %v4601_v29, %v2574_v26  ;;  %2675 = vst.msk [vmem:[%s5180_s3 + $0x60] sm:$0xff] %vm2662_vm3, %v2610_v3  ;;  %2707 = vst.msk [vmem:[%s5180_s3 + $0x160] sm:$0xff] %vm2662_vm3, %v2642_v32  ;;  %v2611_v35 = vadd.f32 %v4601_v29, %v2540_v60  ;;  %v2479_v58 = vmax.f32 %v5530_v9, %v1824_v4  ;;  %v1827_v33 = vpop.f32.mrb[115].mxu0  ;;  %v2339_v11 = vpop.f32.mrb[115].mxu1  ;;  %v5551_v2 = vld [vmem:[#allocation28_spill] sm:$0xff]  ;;  %v5555_v49 = vld [vmem:[#allocation83_spill] sm:$0xff] }
 0x1cd   :  { %v2643_v41 = vadd.f32 %v4601_v29, %v2572_v21  ;;  %2678 = vst.msk [vmem:[%s5180_s3 + $0x78] sm:$0xff] %vm2662_vm3, %v2613_v6  ;;  %v2511_v1 = vmax.f32 %v5531_v13, %v2336_v56  ;;  %v2545_v39 = vmax.f32 %v5534_v43, %v2481_v20  ;;  %v5537_v42 = vmax.f32 %v5535_v46, %v5536_v18  ;;  %v5557_v25 = vld [vmem:[#allocation30_spill] sm:$0xff]  ;;  %v5558_v30 = vld [vmem:[#allocation84_spill] sm:$0xff]  ;;  %v5560_v20 = vld [vmem:[#allocation125_spill] sm:$0xff] }
 0x1ce   :  { %2710 = vst.msk [vmem:[%s5180_s3 + $0x178] sm:$0xff] %vm2662_vm3, %v2645_v5  ;;  %2676 = vst.msk [vmem:[%s5180_s3 + $0x68] sm:$0xff] %vm2662_vm3, %v2611_v35  ;;  %v2482_v27 = vmax.f32 %v5538_v52, %v3251_v28  ;;  %v2514_v8 = vmax.f32 %v5539_v36, %v3379_v47  ;;  %v5542_v14 = vmax.f32 %v5540_v23, %v5541_v55  ;;  %v5564_v31 = vld [vmem:[#allocation31_spill] sm:$0xff]  ;;  %v5565_v43 = vld [vmem:[#allocation85_spill] sm:$0xff] }
 0x1cf   :  { %2708 = vst.msk [vmem:[%s5180_s3 + $0x168] sm:$0xff] %vm2662_vm3, %v2643_v41  ;;  %v2577_v59 = vmax.f32 %v5537_v42, %v2513_v61  ;;  %v5545_v10 = vmax.f32 %v5543_v53, %v5544_v16  ;;  %v2480_v62 = vmax.f32 %v5546_v37, %v1827_v33  ;;  %v2512_v44 = vmax.f32 %v5547_v15, %v2339_v11  ;;  %v5561_v61 = vld [vmem:[#allocation126_spill] sm:$0xff]  ;;  %v5567_v18 = vld [vmem:[#allocation32_spill] sm:$0xff]  ;;  %v5572_v55 = vld [vmem:[#allocation33_spill] sm:$0xff] }
 0x1d0   :  { %v2543_v40 = vmax.f32 %v5542_v14, %v2479_v58  ;;  %v2616_v38 = vadd.f32 %v4601_v29, %v2545_v39  ;;  %v5550_v12 = vmax.f32 %v5548_v50, %v5549_v0  ;;  %v5553_v26 = vmax.f32 %v5551_v2, %v5552_v17  ;;  %v5562_v58 = vld [vmem:[#allocation127_spill] sm:$0xff]  ;;  %v5568_v42 = vld [vmem:[#allocation86_spill] sm:$0xff]  ;;  %v5583_v17 = vld [vmem:[#allocation36_spill] sm:$0xff] }
 0x1d1   :  { %v2575_v22 = vmax.f32 %v5545_v10, %v2511_v1  ;;  %v2648_v51 = vadd.f32 %v4601_v29, %v2577_v59  ;;  %v5556_v60 = vmax.f32 %v5554_v24, %v5555_v49  ;;  %v5559_v21 = vmax.f32 %v5557_v25, %v5558_v30  ;;  %v3254_v63 = vpop.f32.mrb[116].mxu0  ;;  %v3382_v7 = vpop.f32.mrb[116].mxu1  ;;  %v5563_v1 = vld [vmem:[#allocation128_spill] sm:$0xff]  ;;  %v5573_v14 = vld [vmem:[#allocation87_spill] sm:$0xff]  ;;  %v5575_v16 = vld [vmem:[#allocation34_spill] sm:$0xff] }
 0x1d2   :  { %v2546_v57 = vmax.f32 %v5550_v12, %v2482_v27  ;;  %v2578_v3 = vmax.f32 %v5553_v26, %v2514_v8  ;;  %v2614_v32 = vadd.f32 %v4601_v29, %v2543_v40  ;;  %2681 = vst.msk [vmem:[%s5180_s3 + $0x90] sm:$0xff] %vm2662_vm3, %v2616_v38  ;;  %v2485_v45 = vmax.f32 %v5560_v20, %v3254_v63  ;;  %v1840_v56 = vpop.f32.mrb[117].mxu0  ;;  %v2352_v9 = vpop.f32.mrb[117].mxu1  ;;  %v5570_v27 = vld [vmem:[#allocation129_spill] sm:$0xff]  ;;  %v5571_v8 = vld [vmem:[#allocation130_spill] sm:$0xff]  ;;  %v5576_v10 = vld [vmem:[#allocation88_spill] sm:$0xff] }
 0x1d3   :  { %v2646_v34 = vadd.f32 %v4601_v29, %v2575_v22  ;;  %v2544_v48 = vmax.f32 %v5556_v60, %v2480_v62  ;;  %v2576_v6 = vmax.f32 %v5559_v21, %v2512_v44  ;;  %2713 = vst.msk [vmem:[%s5180_s3 + $0x190] sm:$0xff] %vm2662_vm3, %v2648_v51  ;;  %v2517_v4 = vmax.f32 %v5561_v61, %v3382_v7  ;;  %v3255_v47 = vpop.f32.mrb[118].mxu0  ;;  %v3383_v19 = vpop.f32.mrb[118].mxu1  ;;  %v5578_v62 = vld [vmem:[#allocation131_spill] sm:$0xff]  ;;  %v5579_v44 = vld [vmem:[#allocation132_spill] sm:$0xff]  ;;  %v5581_v12 = vld [vmem:[#allocation89_spill] sm:$0xff] }
 0x1d4   :  { %v2617_v5 = vadd.f32 %v4601_v29, %v2546_v57  ;;  %v2649_v35 = vadd.f32 %v4601_v29, %v2578_v3  ;;  %2679 = vst.msk [vmem:[%s5180_s3 + $0x80] sm:$0xff] %vm2662_vm3, %v2614_v32  ;;  %v2483_v13 = vmax.f32 %v5562_v58, %v1840_v56  ;;  %v2515_v28 = vmax.f32 %v5563_v1, %v2352_v9  ;;  %v1843_v11 = vpop.f32.mrb[119].mxu0  ;;  %v2355_v23 = vpop.f32.mrb[119].mxu1  ;;  %v5580_v0 = vld [vmem:[#allocation35_spill] sm:$0xff]  ;;  %v5584_v26 = vld [vmem:[#allocation90_spill] sm:$0xff]  ;;  %v5586_v49 = vld [vmem:[#allocation37_spill] sm:$0xff] }
 0x1d5   :  { %2711 = vst.msk [vmem:[%s5180_s3 + $0x180] sm:$0xff] %vm2662_vm3, %v2646_v34  ;;  %v2615_v41 = vadd.f32 %v4601_v29, %v2544_v48  ;;  %v2647_v54 = vadd.f32 %v4601_v29, %v2576_v6  ;;  %v5566_v39 = vmax.f32 %v5564_v31, %v5565_v43  ;;  %v5569_v59 = vmax.f32 %v5567_v18, %v5568_v42  ;;  %v5587_v60 = vld [vmem:[#allocation91_spill] sm:$0xff]  ;;  %v5589_v30 = vld [vmem:[#allocation38_spill] sm:$0xff]  ;;  %v5590_v21 = vld [vmem:[#allocation92_spill] sm:$0xff] }
 0x1d6   :  { %2682 = vst.msk [vmem:[%s5180_s3 + $0x98] sm:$0xff] %vm2662_vm3, %v2617_v5  ;;  %2714 = vst.msk [vmem:[%s5180_s3 + $0x198] sm:$0xff] %vm2662_vm3, %v2649_v35  ;;  %v2486_v36 = vmax.f32 %v5570_v27, %v3255_v47  ;;  %v2518_v33 = vmax.f32 %v5571_v8, %v3383_v19  ;;  %v5574_v40 = vmax.f32 %v5572_v55, %v5573_v14  ;;  %v5596_v43 = vld [vmem:[#allocation39_spill] sm:$0xff]  ;;  %v5599_v42 = vld [vmem:[#allocation40_spill] sm:$0xff] }
 0x1d7   :  { %2680 = vst.msk [vmem:[%s5180_s3 + $0x88] sm:$0xff] %vm2662_vm3, %v2615_v41  ;;  %2712 = vst.msk [vmem:[%s5180_s3 + $0x188] sm:$0xff] %vm2662_vm3, %v2647_v54  ;;  %v2549_v46 = vmax.f32 %v5566_v39, %v2485_v45  ;;  %v2581_v52 = vmax.f32 %v5569_v59, %v2517_v4  ;;  %v5577_v22 = vmax.f32 %v5575_v16, %v5576_v10  ;;  %v5592_v45 = vld [vmem:[#allocation133_spill] sm:$0xff]  ;;  %v5593_v4 = vld [vmem:[#allocation134_spill] sm:$0xff] }
 0x1d8   :  { %v2547_v53 = vmax.f32 %v5574_v40, %v2483_v13  ;;  %v2484_v15 = vmax.f32 %v5578_v62, %v1843_v11  ;;  %v2516_v38 = vmax.f32 %v5579_v44, %v2355_v23  ;;  %v5582_v57 = vmax.f32 %v5580_v0, %v5581_v12  ;;  %v5594_v13 = vld [vmem:[#allocation135_spill] sm:$0xff]  ;;  %v5597_v39 = vld [vmem:[#allocation93_spill] sm:$0xff]  ;;  %v5600_v59 = vld [vmem:[#allocation94_spill] sm:$0xff] }
 0x1d9   :  { %v2579_v37 = vmax.f32 %v5577_v22, %v2515_v28  ;;  %v2620_v51 = vadd.f32 %v4601_v29, %v2549_v46  ;;  %v2652_v50 = vadd.f32 %v4601_v29, %v2581_v52  ;;  %v5585_v3 = vmax.f32 %v5583_v17, %v5584_v26  ;;  %v3258_v7 = vpop.f32.mrb[120].mxu0  ;;  %v3386_v20 = vpop.f32.mrb[120].mxu1  ;;  %v5595_v28 = vld [vmem:[#allocation136_spill] sm:$0xff]  ;;  %v5604_v14 = vld [vmem:[#allocation41_spill] sm:$0xff]  ;;  %v5605_v40 = vld [vmem:[#allocation95_spill] sm:$0xff] }
 0x1da   :  { %v2550_v2 = vmax.f32 %v5582_v57, %v2486_v36  ;;  %v2618_v34 = vadd.f32 %v4601_v29, %v2547_v53  ;;  %v5588_v48 = vmax.f32 %v5586_v49, %v5587_v60  ;;  %v5591_v6 = vmax.f32 %v5589_v30, %v5590_v21  ;;  %v1856_v9 = vpop.f32.mrb[121].mxu0  ;;  %v2368_v58 = vpop.f32.mrb[121].mxu1  ;;  %v5602_v36 = vld [vmem:[#allocation137_spill] sm:$0xff]  ;;  %v5607_v10 = vld [vmem:[#allocation42_spill] sm:$0xff]  ;;  %v5608_v22 = vld [vmem:[#allocation96_spill] sm:$0xff] }
 0x1db   :  { %v2582_v32 = vmax.f32 %v5585_v3, %v2518_v33  ;;  %v2650_v24 = vadd.f32 %v4601_v29, %v2579_v37  ;;  %2685 = vst.msk [vmem:[%s5180_s3 + $0xb0] sm:$0xff] %vm2662_vm3, %v2620_v51  ;;  %2717 = vst.msk [vmem:[%s5180_s3 + $0x1b0] sm:$0xff] %vm2662_vm3, %v2652_v50  ;;  %v2489_v61 = vmax.f32 %v5592_v45, %v3258_v7  ;;  %v3259_v19 = vpop.f32.mrb[122].mxu0  ;;  %v3387_v31 = vpop.f32.mrb[122].mxu1  ;;  %v5603_v33 = vld [vmem:[#allocation138_spill] sm:$0xff]  ;;  %v5612_v12 = vld [vmem:[#allocation43_spill] sm:$0xff] }
 0x1dc   :  { %v2548_v25 = vmax.f32 %v5588_v48, %v2484_v15  ;;  %v2580_v5 = vmax.f32 %v5591_v6, %v2516_v38  ;;  %v2621_v35 = vadd.f32 %v4601_v29, %v2550_v2  ;;  %2683 = vst.msk [vmem:[%s5180_s3 + $0xa0] sm:$0xff] %vm2662_vm3, %v2618_v34  ;;  %v2521_v56 = vmax.f32 %v5593_v4, %v3386_v20  ;;  %v1859_v23 = vpop.f32.mrb[123].mxu0  ;;  %v2371_v55 = vpop.f32.mrb[123].mxu1  ;;  %v5610_v15 = vld [vmem:[#allocation139_spill] sm:$0xff]  ;;  %v5611_v38 = vld [vmem:[#allocation140_spill] sm:$0xff]  ;;  %v5613_v57 = vld [vmem:[#allocation97_spill] sm:$0xff] }
 0x1dd   :  { %v2653_v41 = vadd.f32 %v4601_v29, %v2582_v32  ;;  %2715 = vst.msk [vmem:[%s5180_s3 + $0x1a0] sm:$0xff] %vm2662_vm3, %v2650_v24  ;;  %v2487_v1 = vmax.f32 %v5594_v13, %v1856_v9  ;;  %v2519_v47 = vmax.f32 %v5595_v28, %v2368_v58  ;;  %v5598_v46 = vmax.f32 %v5596_v43, %v5597_v39  ;;  %v5615_v26 = vld [vmem:[#allocation44_spill] sm:$0xff]  ;;  %v5616_v3 = vld [vmem:[#allocation98_spill] sm:$0xff]  ;;  %v5618_v60 = vld [vmem:[#allocation45_spill] sm:$0xff] }
 0x1de   :  { %v2619_v54 = vadd.f32 %v4601_v29, %v2548_v25  ;;  %v2651_v63 = vadd.f32 %v4601_v29, %v2580_v5  ;;  %2686 = vst.msk [vmem:[%s5180_s3 + $0xb8] sm:$0xff] %vm2662_vm3, %v2621_v35  ;;  %v5601_v52 = vmax.f32 %v5599_v42, %v5600_v59  ;;  %v2490_v8 = vmax.f32 %v5602_v36, %v3259_v19  ;;  %v5619_v48 = vld [vmem:[#allocation99_spill] sm:$0xff]  ;;  %v5621_v21 = vld [vmem:[#allocation46_spill] sm:$0xff]  ;;  %v5622_v6 = vld [vmem:[#allocation100_spill] sm:$0xff] }
 0x1df   :  { %2718 = vst.msk [vmem:[%s5180_s3 + $0x1b8] sm:$0xff] %vm2662_vm3, %v2653_v41  ;;  %v2553_v18 = vmax.f32 %v5598_v46, %v2489_v61  ;;  %v2522_v11 = vmax.f32 %v5603_v33, %v3387_v31  ;;  %v5606_v53 = vmax.f32 %v5604_v14, %v5605_v40  ;;  %v5609_v37 = vmax.f32 %v5607_v10, %v5608_v22  ;;  %v5624_v61 = vld [vmem:[#allocation141_spill] sm:$0xff]  ;;  %v5628_v39 = vld [vmem:[#allocation47_spill] sm:$0xff]  ;;  %v5631_v59 = vld [vmem:[#allocation48_spill] sm:$0xff] }
 0x1e0   :  { %2684 = vst.msk [vmem:[%s5180_s3 + $0xa8] sm:$0xff] %vm2662_vm3, %v2619_v54  ;;  %2716 = vst.msk [vmem:[%s5180_s3 + $0x1a8] sm:$0xff] %vm2662_vm3, %v2651_v63  ;;  %v2585_v27 = vmax.f32 %v5601_v52, %v2521_v56  ;;  %v2488_v44 = vmax.f32 %v5610_v15, %v1859_v23  ;;  %v2520_v51 = vmax.f32 %v5611_v38, %v2371_v55  ;;  %v5625_v56 = vld [vmem:[#allocation142_spill] sm:$0xff]  ;;  %v5629_v46 = vld [vmem:[#allocation101_spill] sm:$0xff] }
 0x1e1   :  { %v2551_v16 = vmax.f32 %v5606_v53, %v2487_v1  ;;  %v2583_v62 = vmax.f32 %v5609_v37, %v2519_v47  ;;  %v2624_v50 = vadd.f32 %v4601_v29, %v2553_v18  ;;  %v5614_v2 = vmax.f32 %v5612_v12, %v5613_v57  ;;  %v3262_v20 = vpop.f32.mrb[124].mxu0  ;;  %v3390_v45 = vpop.f32.mrb[124].mxu1  ;;  %v5626_v1 = vld [vmem:[#allocation143_spill] sm:$0xff]  ;;  %v5627_v47 = vld [vmem:[#allocation144_spill] sm:$0xff]  ;;  %v5632_v52 = vld [vmem:[#allocation102_spill] sm:$0xff] }
 0x1e2   :  { %v2656_v0 = vadd.f32 %v4601_v29, %v2585_v27  ;;  %v5617_v32 = vmax.f32 %v5615_v26, %v5616_v3  ;;  %v5620_v25 = vmax.f32 %v5618_v60, %v5619_v48  ;;  %v5623_v5 = vmax.f32 %v5621_v21, %v5622_v6  ;;  %v1872_v58 = vpop.f32.mrb[125].mxu0  ;;  %v2384_v13 = vpop.f32.mrb[125].mxu1  ;;  %v5636_v40 = vld [vmem:[#allocation49_spill] sm:$0xff]  ;;  %v5637_v53 = vld [vmem:[#allocation103_spill] sm:$0xff]  ;;  %v5639_v22 = vld [vmem:[#allocation50_spill] sm:$0xff] }
 0x1e3   :  { %v2554_v17 = vmax.f32 %v5614_v2, %v2490_v8  ;;  %v2622_v24 = vadd.f32 %v4601_v29, %v2551_v16  ;;  %v2654_v49 = vadd.f32 %v4601_v29, %v2583_v62  ;;  %2689 = vst.msk [vmem:[%s5180_s3 + $0xd0] sm:$0xff] %vm2662_vm3, %v2624_v50  ;;  %v2493_v4 = vmax.f32 %v5624_v61, %v3262_v20  ;;  %v3263_v31 = vpop.f32.mrb[126].mxu0  ;;  %v3391_v43 = vpop.f32.mrb[126].mxu1  ;;  %v5634_v8 = vld [vmem:[#allocation145_spill] sm:$0xff]  ;;  %v5640_v37 = vld [vmem:[#allocation104_spill] sm:$0xff]  ;;  %v5644_v57 = vld [vmem:[#allocation51_spill] sm:$0xff] }
 0x1e4   :  { %v2586_v34 = vmax.f32 %v5617_v32, %v2522_v11  ;;  %v2552_v30 = vmax.f32 %v5620_v25, %v2488_v44  ;;  %v2584_v35 = vmax.f32 %v5623_v5, %v2520_v51  ;;  %2721 = vst.msk [vmem:[%s5180_s3 + $0x1d0] sm:$0xff] %vm2662_vm3, %v2656_v0  ;;  %v2525_v9 = vmax.f32 %v5625_v56, %v3390_v45  ;;  %v5635_v11 = vld [vmem:[#allocation146_spill] sm:$0xff]  ;;  %v1875_v55 = vpop.f32.mrb[127].mxu0  ;;  %v2387_v14 = vpop.f32.mrb[127].mxu1  ;;  %v5642_v44 = vld [vmem:[#allocation147_spill] sm:$0xff]  ;;  %v5643_v51 = vld [vmem:[#allocation148_spill] sm:$0xff] }
 0x1e5   :  { %v2625_v41 = vadd.f32 %v4601_v29, %v2554_v17  ;;  %2687 = vst.msk [vmem:[%s5180_s3 + $0xc0] sm:$0xff] %vm2662_vm3, %v2622_v24  ;;  %2719 = vst.msk [vmem:[%s5180_s3 + $0x1c0] sm:$0xff] %vm2662_vm3, %v2654_v49  ;;  %v2491_v28 = vmax.f32 %v5626_v1, %v1872_v58  ;;  %v2523_v19 = vmax.f32 %v5627_v47, %v2384_v13  ;;  %v5645_v2 = vld [vmem:[#allocation105_spill] sm:$0xff]  ;;  %v5647_v3 = vld [vmem:[#allocation52_spill] sm:$0xff] }
 0x1e6   :  { %v2657_v54 = vadd.f32 %v4601_v29, %v2586_v34  ;;  %v2623_v63 = vadd.f32 %v4601_v29, %v2552_v30  ;;  %v2655_v7 = vadd.f32 %v4601_v29, %v2584_v35  ;;  %v5630_v18 = vmax.f32 %v5628_v39, %v5629_v46  ;;  %v5648_v32 = vld [vmem:[#allocation106_spill] sm:$0xff]  ;;  %v5650_v48 = vld [vmem:[#allocation53_spill] sm:$0xff]  ;;  %v5651_v25 = vld [vmem:[#allocation107_spill] sm:$0xff] }
 0x1e7   :  { %2690 = vst.msk [vmem:[%s5180_s3 + $0xd8] sm:$0xff] %vm2662_vm3, %v2625_v41  ;;  %v5633_v27 = vmax.f32 %v5631_v59, %v5632_v52  ;;  %v2494_v33 = vmax.f32 %v5634_v8, %v3263_v31  ;;  %v2526_v23 = vmax.f32 %v5635_v11, %v3391_v43  ;;  %v5638_v16 = vmax.f32 %v5636_v40, %v5637_v53  ;;  %v5653_v6 = vld [vmem:[#allocation54_spill] sm:$0xff]  ;;  %v5654_v5 = vld [vmem:[#allocation108_spill] sm:$0xff] }
 0x1e8   :  { %2722 = vst.msk [vmem:[%s5180_s3 + $0x1d8] sm:$0xff] %vm2662_vm3, %v2657_v54  ;;  %2688 = vst.msk [vmem:[%s5180_s3 + $0xc8] sm:$0xff] %vm2662_vm3, %v2623_v63  ;;  %v2557_v42 = vmax.f32 %v5630_v18, %v2493_v4  ;;  %v5641_v62 = vmax.f32 %v5639_v22, %v5640_v37  ;;  %v2492_v38 = vmax.f32 %v5642_v44, %v1875_v55 }
 0x1e9   :  { %2720 = vst.msk [vmem:[%s5180_s3 + $0x1c8] sm:$0xff] %vm2662_vm3, %v2655_v7  ;;  %v2589_v36 = vmax.f32 %v5633_v27, %v2525_v9  ;;  %v2555_v10 = vmax.f32 %v5638_v16, %v2491_v28  ;;  %v2524_v50 = vmax.f32 %v5643_v51, %v2387_v14  ;;  %v5646_v17 = vmax.f32 %v5644_v57, %v5645_v2 }
 0x1ea   :  { %v2587_v15 = vmax.f32 %v5641_v62, %v2523_v19  ;;  %v2628_v0 = vadd.f32 %v4601_v29, %v2557_v42  ;;  %v5649_v34 = vmax.f32 %v5647_v3, %v5648_v32  ;;  %v5652_v30 = vmax.f32 %v5650_v48, %v5651_v25 }
 0x1eb   :  { %v2660_v12 = vadd.f32 %v4601_v29, %v2589_v36  ;;  %v2558_v26 = vmax.f32 %v5646_v17, %v2494_v33  ;;  %v2626_v49 = vadd.f32 %v4601_v29, %v2555_v10  ;;  %v5655_v35 = vmax.f32 %v5653_v6, %v5654_v5 }
 0x1ec   :  { %v2590_v24 = vmax.f32 %v5649_v34, %v2526_v23  ;;  %v2658_v60 = vadd.f32 %v4601_v29, %v2587_v15  ;;  %v2556_v21 = vmax.f32 %v5652_v30, %v2492_v38  ;;  %2693 = vst.msk [vmem:[%s5180_s3 + $0xf0] sm:$0xff] %vm2662_vm3, %v2628_v0 }
 0x1ed   :  { %v2588_v41 = vmax.f32 %v5655_v35, %v2524_v50  ;;  %2725 = vst.msk [vmem:[%s5180_s3 + $0x1f0] sm:$0xff] %vm2662_vm3, %v2660_v12  ;;  %v2629_v54 = vadd.f32 %v4601_v29, %v2558_v26  ;;  %2691 = vst.msk [vmem:[%s5180_s3 + $0xe0] sm:$0xff] %vm2662_vm3, %v2626_v49 }
 0x1ee   :  { %v2661_v63 = vadd.f32 %v4601_v29, %v2590_v24  ;;  %2723 = vst.msk [vmem:[%s5180_s3 + $0x1e0] sm:$0xff] %vm2662_vm3, %v2658_v60  ;;  %v2627_v7 = vadd.f32 %v4601_v29, %v2556_v21 }
 0x1ef   :  { %v2659_v20 = vadd.f32 %v4601_v29, %v2588_v41  ;;  %2694 = vst.msk [vmem:[%s5180_s3 + $0xf8] sm:$0xff] %vm2662_vm3, %v2629_v54 }
 0x1f0   :  { %2726 = vst.msk [vmem:[%s5180_s3 + $0x1f8] sm:$0xff] %vm2662_vm3, %v2661_v63  ;;  %2692 = vst.msk [vmem:[%s5180_s3 + $0xe8] sm:$0xff] %vm2662_vm3, %v2627_v7 }
 0x1f1   :  { %2724 = vst.msk [vmem:[%s5180_s3 + $0x1e8] sm:$0xff] %vm2662_vm3, %v2659_v20 }

// kernel: tudui_forward.5
= control target key start
LH: loop header
LB: loop body
LE: loop exit
PB: predicated region body
PF: predicated region fallthrough
CT: control target
= control target key end

     0   :  { %v4139_v0 = vmov 0   ;;  %vm1791_vm0 = vcmask 261120   ;;  %s5717_s1 = inlined_call_operand.vmem [shape: bf16[800,32], index: 1, kind: input, shape index: {}]   ;;  %s5718_s0 = inlined_call_operand.vmem [shape: bf16[2,4,64,800], index: 0, kind: input, shape index: {}]   ;;  %s5719_s2 = inlined_call_operand.vmem [shape: f32[1,32], index: 2, kind: input, shape index: {}]   ;;  %s5720_s3 = inlined_call_operand.vmem [shape: f32[2,64,32], index: 3, kind: output, shape index: {}]  }
   0x1   :  { %1888 = vmatprep.subr.bf16.mxu1 %v4139_v0  ;;  %2177 = vmatprep.subr.bf16.mxu0 %v4139_v0  ;;  %v3769_v1 = vld [vmem:[%s5717_s1] sm:$0xff]   ;;  %v3771_v3 = vld [vmem:[%s5717_s1 + $0x8] sm:$0xff]   ;;  %v3773_v5 = vld [vmem:[%s5717_s1 + $0x10] sm:$0xff]  }
   0x2   :  { %v4168_v2 = vld [vmem:[%s5717_s1 + $0x80] sm:$0xff]   ;;  %1889 = vmatpush1.bf16.msra.mxu1 %v3769_v1  ;;  %v4178_v4 = vld [vmem:[%s5717_s1 + $0x88] sm:$0xff]   ;;  %v4189_v6 = vld [vmem:[%s5717_s1 + $0x90] sm:$0xff]  }
   0x3   :  { %2178 = vmatpush1.bf16.msra.mxu0 %v4168_v2  ;;  %1890 = vmatprep.subr.bf16.mxu1 %v4139_v0  ;;  %v3775_v7 = vld [vmem:[%s5717_s1 + $0x18] sm:$0xff]   ;;  %v3777_v9 = vld [vmem:[%s5717_s1 + $0x20] sm:$0xff]   ;;  %v3779_v11 = vld [vmem:[%s5717_s1 + $0x28] sm:$0xff]  }
   0x4   :  { %2179 = vmatprep.subr.bf16.mxu0 %v4139_v0  ;;  %v4200_v8 = vld [vmem:[%s5717_s1 + $0x98] sm:$0xff]   ;;  %v4211_v10 = vld [vmem:[%s5717_s1 + $0xa0] sm:$0xff]   ;;  %v4222_v12 = vld [vmem:[%s5717_s1 + $0xa8] sm:$0xff]  }
   0x5   :  { %v3781_v13 = vld [vmem:[%s5717_s1 + $0x30] sm:$0xff]   ;;  %v3783_v15 = vld [vmem:[%s5717_s1 + $0x38] sm:$0xff]   ;;  %v3785_v17 = vld [vmem:[%s5717_s1 + $0x40] sm:$0xff]  }
   0x6   :  { %1891 = vmatpush1.bf16.msra.mxu1 %v3771_v3  ;;  %v4233_v14 = vld [vmem:[%s5717_s1 + $0xb0] sm:$0xff]   ;;  %v4244_v16 = vld [vmem:[%s5717_s1 + $0xb8] sm:$0xff]   ;;  %v4255_v18 = vld [vmem:[%s5717_s1 + $0xc0] sm:$0xff]  }
   0x7   :  { %2180 = vmatpush1.bf16.msra.mxu0 %v4178_v4  ;;  %1892 = vmatprep.subr.bf16.mxu1 %v4139_v0  ;;  %v3803_v19 = vld [vmem:[%s5718_s0 + $0x4] ss:$28 sps:$4 sm:$0xff]   ;;  %v3787_v20 = vld [vmem:[%s5717_s1 + $0x48] sm:$0xff]   ;;  %v3789_v23 = vld [vmem:[%s5717_s1 + $0x50] sm:$0xff]  }
   0x8   :  { %2181 = vmatprep.subr.bf16.mxu0 %v4139_v0  ;;  %v3806_v21 = vld [vmem:[%s5718_s0 + $0xc] ss:$28 sps:$4 sm:$0xff]   ;;  %1920 = vmatprep.mubr.bf16.mxu1 %v3803_v19  ;;  %v4283_v24 = vld [vmem:[%s5717_s1 + $0xd0] sm:$0xff]   ;;  %v3791_v25 = vld [vmem:[%s5717_s1 + $0x58] sm:$0xff]  }
   0x9   :  { %v4272_v22 = vld [vmem:[%s5717_s1 + $0xc8] sm:$0xff]   ;;  %2209 = vmatprep.mubr.bf16.mxu0 %v3806_v21  ;;  %v4294_v26 = vld [vmem:[%s5717_s1 + $0xd8] sm:$0xff]   ;;  %v3793_v27 = vld [vmem:[%s5717_s1 + $0x60] sm:$0xff]  }
   0xa   :  { %1893 = vmatpush1.bf16.msra.mxu1 %v3773_v5  ;;  %v4305_v28 = vld [vmem:[%s5717_s1 + $0xe0] sm:$0xff]   ;;  %v3795_v29 = vld [vmem:[%s5717_s1 + $0x68] sm:$0xff]   ;;  %v3797_v31 = vld [vmem:[%s5717_s1 + $0x70] sm:$0xff]  }
   0xb   :  { %2182 = vmatpush1.bf16.msra.mxu0 %v4189_v6  ;;  %1894 = vmatprep.subr.bf16.mxu1 %v4139_v0  ;;  %v4316_v30 = vld [vmem:[%s5717_s1 + $0xe8] sm:$0xff]   ;;  %v4327_v32 = vld [vmem:[%s5717_s1 + $0xf0] sm:$0xff]   ;;  %v3799_v33 = vld [vmem:[%s5717_s1 + $0x78] sm:$0xff]  }
   0xc   :  { %2183 = vmatprep.subr.bf16.mxu0 %v4139_v0  ;;  %v4338_v34 = vld [vmem:[%s5717_s1 + $0xf8] sm:$0xff]   ;;  %v3804_v36 = vld [vmem:[%s5718_s0 + $0x8] ss:$28 sps:$4 sm:$0xff]   ;;  %v3815_v43 = vld [vmem:[%s5718_s0 + $0x74] ss:$28 sps:$4 sm:$0xff]  }
   0xd   :  { %v3801_v35 = vld [vmem:[%s5718_s0] ss:$28 sps:$4 sm:$0xff]   ;;  %v3814_v40 = vld [vmem:[%s5717_s1 + $0x108] sm:$0xff]   ;;  %v3812_v41 = vld [vmem:[%s5718_s0 + $0x38] ss:$28 sps:$4 sm:$0xff]  }
   0xe   :  { %1895 = vmatpush1.bf16.msra.mxu1 %v3775_v7  ;;  %v3807_v37 = vld [vmem:[%s5717_s1 + $0x100] sm:$0xff]   ;;  %v3808_v38 = vld [vmem:[%s5718_s0 + $0x3c] ss:$28 sps:$4 sm:$0xff]   ;;  %v3827_v45 = vld [vmem:[%s5717_s1 + $0x110] sm:$0xff]  }
   0xf   :  { %2184 = vmatpush1.bf16.msra.mxu0 %v4200_v8  ;;  %1896 = vmatprep.subr.bf16.mxu1 %v4139_v0  ;;  %v3810_v39 = vld [vmem:[%s5718_s0 + $0x44] ss:$28 sps:$4 sm:$0xff]   ;;  %v3817_v44 = vld [vmem:[%s5718_s0 + $0x7c] ss:$28 sps:$4 sm:$0xff]   ;;  %v3819_v47 = vld [vmem:[%s5718_s0 + $0x70] ss:$28 sps:$4 sm:$0xff]  }
  0x10   :  { %2185 = vmatprep.subr.bf16.mxu0 %v4139_v0  ;;  %v3813_v42 = vld [vmem:[%s5718_s0 + $0x40] ss:$28 sps:$4 sm:$0xff]   ;;  %v3820_v48 = vld [vmem:[%s5718_s0 + $0x78] ss:$28 sps:$4 sm:$0xff]   ;;  %v3821_v49 = vld [vmem:[%s5718_s0 + $0xac] ss:$28 sps:$4 sm:$0xff]  }
  0x11   :  { %v3834_v46 = vld [vmem:[%s5717_s1 + $0x118] sm:$0xff]   ;;  %v3823_v50 = vld [vmem:[%s5718_s0 + $0xb4] ss:$28 sps:$4 sm:$0xff]   ;;  %v3847_v51 = vld [vmem:[%s5717_s1 + $0x120] sm:$0xff]  }
  0x12   :  { %1897 = vmatpush1.bf16.msra.mxu1 %v3777_v9  ;;  %v3854_v52 = vld [vmem:[%s5717_s1 + $0x128] sm:$0xff]   ;;  %v3828_v55 = vld [vmem:[%s5718_s0 + $0xe4] ss:$28 sps:$4 sm:$0xff]   ;;  %v3867_v57 = vld [vmem:[%s5717_s1 + $0x130] sm:$0xff]  }
  0x13   :  { %2186 = vmatpush1.bf16.msra.mxu0 %v4211_v10  ;;  %1898 = vmatprep.subr.bf16.mxu1 %v4139_v0  ;;  %v3825_v53 = vld [vmem:[%s5718_s0 + $0xa8] ss:$28 sps:$4 sm:$0xff]   ;;  %v3826_v54 = vld [vmem:[%s5718_s0 + $0xb0] ss:$28 sps:$4 sm:$0xff]   ;;  %v3874_v58 = vld [vmem:[%s5717_s1 + $0x138] sm:$0xff]  }
  0x14   :  { %2187 = vmatprep.subr.bf16.mxu0 %v4139_v0  ;;  %v3830_v56 = vld [vmem:[%s5718_s0 + $0xec] ss:$28 sps:$4 sm:$0xff]   ;;  %v3832_v59 = vld [vmem:[%s5718_s0 + $0xe0] ss:$28 sps:$4 sm:$0xff]   ;;  %v3846_v9 = vld [vmem:[%s5718_s0 + $0x158] ss:$28 sps:$4 sm:$0xff]  }
  0x15   :  { %v3833_v60 = vld [vmem:[%s5718_s0 + $0xe8] ss:$28 sps:$4 sm:$0xff]   ;;  %v3835_v61 = vld [vmem:[%s5718_s0 + $0x11c] ss:$28 sps:$4 sm:$0xff]   ;;  %v3845_v7 = vld [vmem:[%s5718_s0 + $0x150] ss:$28 sps:$4 sm:$0xff]  }
  0x16   :  { %1899 = vmatpush1.bf16.msra.mxu1 %v3779_v11  ;;  %v3837_v62 = vld [vmem:[%s5718_s0 + $0x124] ss:$28 sps:$4 sm:$0xff]   ;;  %v3894_v1 = vld [vmem:[%s5717_s1 + $0x148] sm:$0xff]   ;;  %v3843_v5 = vld [vmem:[%s5718_s0 + $0x15c] ss:$28 sps:$4 sm:$0xff]  }
  0x17   :  { %2188 = vmatpush1.bf16.msra.mxu0 %v4222_v12  ;;  %1900 = vmatprep.subr.bf16.mxu1 %v4139_v0  ;;  %v3887_v63 = vld [vmem:[%s5717_s1 + $0x140] sm:$0xff]   ;;  %v3850_v11 = vld [vmem:[%s5718_s0 + $0x194] ss:$28 sps:$4 sm:$0xff]  }
  0x18   :  { %2189 = vmatprep.subr.bf16.mxu0 %v4139_v0  ;;  %v3840_v3 = vld [vmem:[%s5718_s0 + $0x120] ss:$28 sps:$4 sm:$0xff]   ;;  %v3860_v21 = vld [vmem:[%s5718_s0 + $0x1c8] ss:$28 sps:$4 sm:$0xff]  }
  0x19   :  { %v3859_v19 = vld [vmem:[%s5718_s0 + $0x1c0] ss:$28 sps:$4 sm:$0xff]  }
  0x1a   :  { %1901 = vmatpush1.bf16.msra.mxu1 %v3781_v13  ;;  %v3852_v13 = vld [vmem:[%s5718_s0 + $0x188] ss:$28 sps:$4 sm:$0xff]  }
  0x1b   :  { %2190 = vmatpush1.bf16.msra.mxu0 %v4233_v14  ;;  %1902 = vmatprep.subr.bf16.mxu1 %v4139_v0 }
  0x1c   :  { %2191 = vmatprep.subr.bf16.mxu0 %v4139_v0 }
  0x1e   :  { %1903 = vmatpush1.bf16.msra.mxu1 %v3783_v15  ;;  %v3853_v15 = vld [vmem:[%s5718_s0 + $0x190] ss:$28 sps:$4 sm:$0xff]  }
  0x1f   :  { %2192 = vmatpush1.bf16.msra.mxu0 %v4244_v16  ;;  %1904 = vmatprep.subr.bf16.mxu1 %v4139_v0 }
  0x20   :  { %2193 = vmatprep.subr.bf16.mxu0 %v4139_v0 }
  0x22   :  { %1905 = vmatpush1.bf16.msra.mxu1 %v3785_v17  ;;  %v3857_v17 = vld [vmem:[%s5718_s0 + $0x1cc] ss:$28 sps:$4 sm:$0xff]  }
  0x23   :  { %2194 = vmatpush1.bf16.msra.mxu0 %v4255_v18  ;;  %1906 = vmatprep.subr.bf16.mxu1 %v4139_v0 }
  0x24   :  { %2195 = vmatprep.subr.bf16.mxu0 %v4139_v0 }
  0x26   :  { %1907 = vmatpush1.bf16.msra.mxu1 %v3787_v20  ;;  %v3954_v20 = vld [vmem:[%s5717_s1 + $0x178] sm:$0xff]  }
  0x27   :  { %2196 = vmatpush1.bf16.msra.mxu0 %v4272_v22  ;;  %1908 = vmatprep.subr.bf16.mxu1 %v4139_v0 }
  0x28   :  { %2197 = vmatprep.subr.bf16.mxu0 %v4139_v0 }
  0x2a   :  { %1909 = vmatpush1.bf16.msra.mxu1 %v3789_v23  ;;  %v3863_v23 = vld [vmem:[%s5718_s0 + $0x204] ss:$28 sps:$4 sm:$0xff]  }
  0x2b   :  { %2198 = vmatpush1.bf16.msra.mxu0 %v4283_v24  ;;  %1910 = vmatprep.subr.bf16.mxu1 %v4139_v0 }
  0x2c   :  { %2199 = vmatprep.subr.bf16.mxu0 %v4139_v0 }
  0x2e   :  { %1911 = vmatpush1.bf16.msra.mxu1 %v3791_v25  ;;  %v3866_v25 = vld [vmem:[%s5718_s0 + $0x200] ss:$28 sps:$4 sm:$0xff]  }
  0x2f   :  { %2200 = vmatpush1.bf16.msra.mxu0 %v4294_v26  ;;  %1912 = vmatprep.subr.bf16.mxu1 %v4139_v0 }
  0x30   :  { %2201 = vmatprep.subr.bf16.mxu0 %v4139_v0 }
  0x32   :  { %1913 = vmatpush1.bf16.msra.mxu1 %v3793_v27  ;;  %v3872_v27 = vld [vmem:[%s5718_s0 + $0x230] ss:$28 sps:$4 sm:$0xff]  }
  0x33   :  { %2202 = vmatpush1.bf16.msra.mxu0 %v4305_v28  ;;  %1914 = vmatprep.subr.bf16.mxu1 %v4139_v0 }
  0x34   :  { %2203 = vmatprep.subr.bf16.mxu0 %v4139_v0 }
  0x36   :  { %1915 = vmatpush1.bf16.msra.mxu1 %v3795_v29  ;;  %v3875_v29 = vld [vmem:[%s5718_s0 + $0x26c] ss:$28 sps:$4 sm:$0xff]  }
  0x37   :  { %2204 = vmatpush1.bf16.msra.mxu0 %v4316_v30  ;;  %1916 = vmatprep.subr.bf16.mxu1 %v4139_v0 }
  0x38   :  { %2205 = vmatprep.subr.bf16.mxu0 %v4139_v0 }
  0x3a   :  { %1917 = vmatpush1.bf16.msra.mxu1 %v3797_v31  ;;  %v3879_v31 = vld [vmem:[%s5718_s0 + $0x268] ss:$28 sps:$4 sm:$0xff]  }
  0x3b   :  { %2206 = vmatpush1.bf16.msra.mxu0 %v4327_v32  ;;  %1918 = vmatprep.subr.bf16.mxu1 %v4139_v0 }
  0x3c   :  { %2207 = vmatprep.subr.bf16.mxu0 %v4139_v0 }
  0x3e   :  { %1919 = vmatpush1.bf16.msra.mxu1 %v3799_v33  ;;  %v3881_v33 = vld [vmem:[%s5718_s0 + $0x2a4] ss:$28 sps:$4 sm:$0xff]  }
  0x3f   :  { %2208 = vmatpush1.bf16.msra.mxu0 %v4338_v34  ;;  %3544 = vmatprep.subr.bf16.mxu1 %v4139_v0 }
  0x40   :  { %2466 = vmatprep.subr.bf16.mxu0 %v4139_v0 }
  0x41   :  { %1921 = vmatmul.mubr.bf16.vlgmr.msra.gmra.mrb[0].mxu1 %v3801_v35  ;;  %v3885_v35 = vld [vmem:[%s5718_s0 + $0x2a0] ss:$28 sps:$4 sm:$0xff]  }
  0x42   :  { %2210 = vmatmul.mubr.bf16.vlgmr.msra.gmra.mrb[0].mxu0 %v3804_v36  ;;  %3560 = vmatpush1.bf16.msra.mxu1 %v4168_v2  ;;  %v3839_v2 = vld [vmem:[%s5718_s0 + $0x118] ss:$28 sps:$4 sm:$0xff]   ;;  %v3886_v36 = vld [vmem:[%s5718_s0 + $0x2a8] ss:$28 sps:$4 sm:$0xff]  }
  0x43   :  { %2467 = vmatpush1.bf16.msra.mxu0 %v3807_v37  ;;  %1928 = vmatprep.mubr.bf16.mxu1 %v3808_v38  ;;  %v3888_v37 = vld [vmem:[%s5718_s0 + $0x2dc] ss:$28 sps:$4 sm:$0xff]   ;;  %v3890_v38 = vld [vmem:[%s5718_s0 + $0x2e4] ss:$28 sps:$4 sm:$0xff]  }
  0x44   :  { %2217 = vmatprep.mubr.bf16.mxu0 %v3810_v39  ;;  %2468 = vmatprep.subr.bf16.mxu0 %v4139_v0  ;;  %v3892_v39 = vld [vmem:[%s5718_s0 + $0x2d8] ss:$28 sps:$4 sm:$0xff]  }
  0x45   :  { %3545 = vmatprep.subr.bf16.mxu1 %v4139_v0 }
  0x46   :  { %3561 = vmatpush1.bf16.msra.mxu1 %v4178_v4  ;;  %v3841_v4 = vld [vmem:[%s5718_s0 + $0x154] ss:$28 sps:$4 sm:$0xff]  }
  0x47   :  { %2469 = vmatpush1.bf16.msra.mxu0 %v3814_v40  ;;  %3546 = vmatprep.subr.bf16.mxu1 %v4139_v0  ;;  %v3893_v40 = vld [vmem:[%s5718_s0 + $0x2e0] ss:$28 sps:$4 sm:$0xff]  }
  0x48   :  { %2470 = vmatprep.subr.bf16.mxu0 %v4139_v0 }
  0x49   :  { %1929 = vmatmul.mubr.bf16.gmra.mrb[4].mxu1 %v3812_v41  ;;  %v3895_v41 = vld [vmem:[%s5718_s0 + $0x314] ss:$28 sps:$4 sm:$0xff]  }
  0x4a   :  { %2218 = vmatmul.mubr.bf16.gmra.mrb[4].mxu0 %v3813_v42  ;;  %1936 = vmatprep.mubr.bf16.mxu1 %v3815_v43  ;;  %v3897_v42 = vld [vmem:[%s5718_s0 + $0x31c] ss:$28 sps:$4 sm:$0xff]   ;;  %v3899_v43 = vld [vmem:[%s5718_s0 + $0x310] ss:$28 sps:$4 sm:$0xff]  }
  0x4b   :  { %2225 = vmatprep.mubr.bf16.mxu0 %v3817_v44  ;;  %2471 = vmatpush1.bf16.msra.mxu0 %v3827_v45  ;;  %v3900_v44 = vld [vmem:[%s5718_s0 + $0x318] ss:$28 sps:$4 sm:$0xff]   ;;  %v3901_v45 = vld [vmem:[%s5718_s0 + $0x34c] ss:$28 sps:$4 sm:$0xff]  }
  0x4c   :  { %3562 = vmatpush1.bf16.msra.mxu1 %v4189_v6  ;;  %2472 = vmatprep.subr.bf16.mxu0 %v4139_v0  ;;  %v3907_v6 = vld [vmem:[%s5717_s1 + $0x150] sm:$0xff]  }
  0x4d   :  { %3547 = vmatprep.subr.bf16.mxu1 %v4139_v0 }
  0x4f   :  { %2473 = vmatpush1.bf16.msra.mxu0 %v3834_v46  ;;  %v3903_v46 = vld [vmem:[%s5718_s0 + $0x354] ss:$28 sps:$4 sm:$0xff]  }
  0x50   :  { %2474 = vmatprep.subr.bf16.mxu0 %v4139_v0  ;;  %3563 = vmatpush1.bf16.msra.mxu1 %v4200_v8  ;;  %v3914_v8 = vld [vmem:[%s5717_s1 + $0x158] sm:$0xff]  }
  0x51   :  { %1937 = vmatmul.mubr.bf16.gmra.mrb[8].mxu1 %v3819_v47  ;;  %3548 = vmatprep.subr.bf16.mxu1 %v4139_v0  ;;  %v3905_v47 = vld [vmem:[%s5718_s0 + $0x348] ss:$28 sps:$4 sm:$0xff]  }
  0x52   :  { %2226 = vmatmul.mubr.bf16.gmra.mrb[8].mxu0 %v3820_v48  ;;  %1944 = vmatprep.mubr.bf16.mxu1 %v3821_v49  ;;  %v3906_v48 = vld [vmem:[%s5718_s0 + $0x350] ss:$28 sps:$4 sm:$0xff]   ;;  %v3908_v49 = vld [vmem:[%s5718_s0 + $0x384] ss:$28 sps:$4 sm:$0xff]  }
  0x53   :  { %2233 = vmatprep.mubr.bf16.mxu0 %v3823_v50  ;;  %2475 = vmatpush1.bf16.msra.mxu0 %v3847_v51  ;;  %v3910_v50 = vld [vmem:[%s5718_s0 + $0x38c] ss:$28 sps:$4 sm:$0xff]   ;;  %v3912_v51 = vld [vmem:[%s5718_s0 + $0x380] ss:$28 sps:$4 sm:$0xff]  }
  0x54   :  { %2476 = vmatprep.subr.bf16.mxu0 %v4139_v0  ;;  %3564 = vmatpush1.bf16.msra.mxu1 %v4211_v10  ;;  %v3848_v10 = vld [vmem:[%s5718_s0 + $0x18c] ss:$28 sps:$4 sm:$0xff]  }
  0x55   :  { %3549 = vmatprep.subr.bf16.mxu1 %v4139_v0 }
  0x57   :  { %2477 = vmatpush1.bf16.msra.mxu0 %v3854_v52  ;;  %v3913_v52 = vld [vmem:[%s5718_s0 + $0x388] ss:$28 sps:$4 sm:$0xff]  }
  0x58   :  { %2478 = vmatprep.subr.bf16.mxu0 %v4139_v0  ;;  %3565 = vmatpush1.bf16.msra.mxu1 %v4222_v12  ;;  %v3927_v12 = vld [vmem:[%s5717_s1 + $0x160] sm:$0xff]  }
  0x59   :  { %1945 = vmatmul.mubr.bf16.gmra.mrb[12].mxu1 %v3825_v53  ;;  %3550 = vmatprep.subr.bf16.mxu1 %v4139_v0  ;;  %v3915_v53 = vld [vmem:[%s5718_s0 + $0x3bc] ss:$28 sps:$4 sm:$0xff]  }
  0x5a   :  { %2234 = vmatmul.mubr.bf16.gmra.mrb[12].mxu0 %v3826_v54  ;;  %1952 = vmatprep.mubr.bf16.mxu1 %v3828_v55  ;;  %v3917_v54 = vld [vmem:[%s5718_s0 + $0x3c4] ss:$28 sps:$4 sm:$0xff]  }
  0x5b   :  { %2241 = vmatprep.mubr.bf16.mxu0 %v3830_v56  ;;  %2479 = vmatpush1.bf16.msra.mxu0 %v3867_v57  ;;  %v4645_v55 = vld [vmem:[%s5717_s1 + $0x180] sm:$0xff]   ;;  %v3919_v56 = vld [vmem:[%s5718_s0 + $0x3b8] ss:$28 sps:$4 sm:$0xff]  }
  0x5c   :  { %2480 = vmatprep.subr.bf16.mxu0 %v4139_v0  ;;  %3566 = vmatpush1.bf16.msra.mxu1 %v4233_v14  ;;  %v3934_v14 = vld [vmem:[%s5717_s1 + $0x168] sm:$0xff]   ;;  %v3920_v57 = vld [vmem:[%s5718_s0 + $0x3c0] ss:$28 sps:$4 sm:$0xff]  }
  0x5d   :  { %3551 = vmatprep.subr.bf16.mxu1 %v4139_v0 }
  0x5f   :  { %2481 = vmatpush1.bf16.msra.mxu0 %v3874_v58  ;;  %v3921_v58 = vld [vmem:[%s5718_s0 + $0x3f4] ss:$28 sps:$4 sm:$0xff]  }
  0x60   :  { %2482 = vmatprep.subr.bf16.mxu0 %v4139_v0  ;;  %3567 = vmatpush1.bf16.msra.mxu1 %v4244_v16  ;;  %v3855_v16 = vld [vmem:[%s5718_s0 + $0x1c4] ss:$28 sps:$4 sm:$0xff]  }
  0x61   :  { %1953 = vmatmul.mubr.bf16.gmra.mrb[16].mxu1 %v3832_v59  ;;  %3552 = vmatprep.subr.bf16.mxu1 %v4139_v0  ;;  %v3923_v59 = vld [vmem:[%s5718_s0 + $0x3fc] ss:$28 sps:$4 sm:$0xff]  }
  0x62   :  { %2242 = vmatmul.mubr.bf16.gmra.mrb[16].mxu0 %v3833_v60  ;;  %1960 = vmatprep.mubr.bf16.mxu1 %v3835_v61  ;;  %v3925_v60 = vld [vmem:[%s5718_s0 + $0x3f0] ss:$28 sps:$4 sm:$0xff]   ;;  %v3926_v61 = vld [vmem:[%s5718_s0 + $0x3f8] ss:$28 sps:$4 sm:$0xff]  }
  0x63   :  { %2249 = vmatprep.mubr.bf16.mxu0 %v3837_v62  ;;  %2483 = vmatpush1.bf16.msra.mxu0 %v3887_v63  ;;  %v3928_v62 = vld [vmem:[%s5718_s0 + $0x42c] ss:$28 sps:$4 sm:$0xff]   ;;  %v3930_v63 = vld [vmem:[%s5718_s0 + $0x434] ss:$28 sps:$4 sm:$0xff]  }
  0x64   :  { %2484 = vmatprep.subr.bf16.mxu0 %v4139_v0  ;;  %3568 = vmatpush1.bf16.msra.mxu1 %v4255_v18  ;;  %v3947_v18 = vld [vmem:[%s5717_s1 + $0x170] sm:$0xff]  }
  0x65   :  { %3553 = vmatprep.subr.bf16.mxu1 %v4139_v0 }
  0x67   :  { %2485 = vmatpush1.bf16.msra.mxu0 %v3894_v1  ;;  %v3932_v1 = vld [vmem:[%s5718_s0 + $0x428] ss:$28 sps:$4 sm:$0xff]  }
  0x68   :  { %2486 = vmatprep.subr.bf16.mxu0 %v4139_v0  ;;  %3569 = vmatpush1.bf16.msra.mxu1 %v4272_v22  ;;  %v3861_v22 = vld [vmem:[%s5718_s0 + $0x1fc] ss:$28 sps:$4 sm:$0xff]  }
  0x69   :  { %1961 = vmatmul.mubr.bf16.gmra.mrb[20].mxu1 %v3839_v2  ;;  %3554 = vmatprep.subr.bf16.mxu1 %v4139_v0  ;;  %v3933_v2 = vld [vmem:[%s5718_s0 + $0x430] ss:$28 sps:$4 sm:$0xff]  }
  0x6a   :  { %2250 = vmatmul.mubr.bf16.gmra.mrb[20].mxu0 %v3840_v3  ;;  %1968 = vmatprep.mubr.bf16.mxu1 %v3841_v4  ;;  %v3935_v3 = vld [vmem:[%s5718_s0 + $0x464] ss:$28 sps:$4 sm:$0xff]   ;;  %v3937_v4 = vld [vmem:[%s5718_s0 + $0x46c] ss:$28 sps:$4 sm:$0xff]  }
  0x6b   :  { %2257 = vmatprep.mubr.bf16.mxu0 %v3843_v5  ;;  %2487 = vmatpush1.bf16.msra.mxu0 %v3907_v6  ;;  %v3939_v5 = vld [vmem:[%s5718_s0 + $0x460] ss:$28 sps:$4 sm:$0xff]   ;;  %v3940_v6 = vld [vmem:[%s5718_s0 + $0x468] ss:$28 sps:$4 sm:$0xff]  }
  0x6c   :  { %2488 = vmatprep.subr.bf16.mxu0 %v4139_v0  ;;  %3570 = vmatpush1.bf16.msra.mxu1 %v4283_v24  ;;  %v3865_v24 = vld [vmem:[%s5718_s0 + $0x1f8] ss:$28 sps:$4 sm:$0xff]  }
  0x6d   :  { %3555 = vmatprep.subr.bf16.mxu1 %v4139_v0 }
  0x6f   :  { %2489 = vmatpush1.bf16.msra.mxu0 %v3914_v8  ;;  %v3943_v8 = vld [vmem:[%s5718_s0 + $0x4a4] ss:$28 sps:$4 sm:$0xff]  }
  0x70   :  { %2490 = vmatprep.subr.bf16.mxu0 %v4139_v0  ;;  %3571 = vmatpush1.bf16.msra.mxu1 %v4294_v26  ;;  %v3868_v26 = vld [vmem:[%s5718_s0 + $0x234] ss:$28 sps:$4 sm:$0xff]  }
  0x71   :  { %1969 = vmatmul.mubr.bf16.gmra.mrb[24].mxu1 %v3845_v7  ;;  %3556 = vmatprep.subr.bf16.mxu1 %v4139_v0  ;;  %v3941_v7 = vld [vmem:[%s5718_s0 + $0x49c] ss:$28 sps:$4 sm:$0xff]  }
  0x72   :  { %2258 = vmatmul.mubr.bf16.gmra.mrb[24].mxu0 %v3846_v9  ;;  %1976 = vmatprep.mubr.bf16.mxu1 %v3848_v10  ;;  %v3945_v9 = vld [vmem:[%s5718_s0 + $0x498] ss:$28 sps:$4 sm:$0xff]   ;;  %v3946_v10 = vld [vmem:[%s5718_s0 + $0x4a0] ss:$28 sps:$4 sm:$0xff]  }
  0x73   :  { %2265 = vmatprep.mubr.bf16.mxu0 %v3850_v11  ;;  %2491 = vmatpush1.bf16.msra.mxu0 %v3927_v12  ;;  %v3948_v11 = vld [vmem:[%s5718_s0 + $0x4d4] ss:$28 sps:$4 sm:$0xff]   ;;  %v3950_v12 = vld [vmem:[%s5718_s0 + $0x4dc] ss:$28 sps:$4 sm:$0xff]  }
  0x74   :  { %2492 = vmatprep.subr.bf16.mxu0 %v4139_v0  ;;  %3572 = vmatpush1.bf16.msra.mxu1 %v4305_v28  ;;  %v3873_v28 = vld [vmem:[%s5718_s0 + $0x238] ss:$28 sps:$4 sm:$0xff]  }
  0x75   :  { %3557 = vmatprep.subr.bf16.mxu1 %v4139_v0 }
  0x77   :  { %2493 = vmatpush1.bf16.msra.mxu0 %v3934_v14  ;;  %v3953_v14 = vld [vmem:[%s5718_s0 + $0x4d8] ss:$28 sps:$4 sm:$0xff]  }
  0x78   :  { %2494 = vmatprep.subr.bf16.mxu0 %v4139_v0  ;;  %3573 = vmatpush1.bf16.msra.mxu1 %v4316_v30  ;;  %v3877_v30 = vld [vmem:[%s5718_s0 + $0x274] ss:$28 sps:$4 sm:$0xff]  }
  0x79   :  { %1977 = vmatmul.mubr.bf16.gmra.mrb[28].mxu1 %v3852_v13  ;;  %3558 = vmatprep.subr.bf16.mxu1 %v4139_v0  ;;  %v3952_v13 = vld [vmem:[%s5718_s0 + $0x4d0] ss:$28 sps:$4 sm:$0xff]  }
  0x7a   :  { %2266 = vmatmul.mubr.bf16.gmra.mrb[28].mxu0 %v3853_v15  ;;  %1984 = vmatprep.mubr.bf16.mxu1 %v3855_v16  ;;  %v3955_v15 = vld [vmem:[%s5718_s0 + $0x50c] ss:$28 sps:$4 sm:$0xff]   ;;  %v3957_v16 = vld [vmem:[%s5718_s0 + $0x514] ss:$28 sps:$4 sm:$0xff]  }
  0x7b   :  { %2273 = vmatprep.mubr.bf16.mxu0 %v3857_v17  ;;  %2495 = vmatpush1.bf16.msra.mxu0 %v3947_v18  ;;  %v3959_v17 = vld [vmem:[%s5718_s0 + $0x508] ss:$28 sps:$4 sm:$0xff]   ;;  %v3960_v18 = vld [vmem:[%s5718_s0 + $0x510] ss:$28 sps:$4 sm:$0xff]  }
  0x7c   :  { %2496 = vmatprep.subr.bf16.mxu0 %v4139_v0  ;;  %3574 = vmatpush1.bf16.msra.mxu1 %v4327_v32  ;;  %v3880_v32 = vld [vmem:[%s5718_s0 + $0x270] ss:$28 sps:$4 sm:$0xff]  }
  0x7d   :  { %3559 = vmatprep.subr.bf16.mxu1 %v4139_v0  ;;  %v3870_v0 = vld [vmem:[%s5718_s0 + $0x23c] ss:$28 sps:$4 sm:$0xff]  }
  0x7f   :  { %2497 = vmatpush1.bf16.msra.mxu0 %v3954_v20  ;;  %v3965_v20 = vld [vmem:[%s5718_s0 + $0x14] ss:$28 sps:$4 sm:$0xff]  }
  0x80   :  { %3575 = vmatpush1.bf16.msra.mxu1 %v4338_v34  ;;  %v3883_v34 = vld [vmem:[%s5718_s0 + $0x2ac] ss:$28 sps:$4 sm:$0xff]  }
  0x81   :  { %1985 = vmatmul.mubr.bf16.gmra.mrb[32].mxu1 %v3859_v19  ;;  %3476 = vmatprep.subr.bf16.mxu1 %v4645_v55  ;;  %v3961_v19 = vld [vmem:[%s5718_s0 + $0x544] ss:$28 sps:$4 sm:$0xff]  }
  0x82   :  { %2274 = vmatmul.mubr.bf16.gmra.mrb[32].mxu0 %v3860_v21  ;;  %1992 = vmatprep.mubr.bf16.mxu1 %v3861_v22  ;;  %v3966_v21 = vld [vmem:[%s5718_s0 + $0x540] ss:$28 sps:$4 sm:$0xff]   ;;  %v3963_v22 = vld [vmem:[%s5718_s0 + $0x10] ss:$28 sps:$4 sm:$0xff]  }
  0x83   :  { %2281 = vmatprep.mubr.bf16.mxu0 %v3863_v23  ;;  %v3967_v23 = vld [vmem:[%s5718_s0 + $0x57c] ss:$28 sps:$4 sm:$0xff]  }
  0x89   :  { %1993 = vmatmul.mubr.bf16.gmra.mrb[36].mxu1 %v3865_v24  ;;  %v3969_v24 = vld [vmem:[%s5718_s0 + $0x4c] ss:$28 sps:$4 sm:$0xff]  }
  0x8a   :  { %2282 = vmatmul.mubr.bf16.gmra.mrb[36].mxu0 %v3866_v25  ;;  %2000 = vmatprep.mubr.bf16.mxu1 %v3868_v26  ;;  %v3971_v25 = vld [vmem:[%s5718_s0 + $0x578] ss:$28 sps:$4 sm:$0xff]   ;;  %v3972_v26 = vld [vmem:[%s5718_s0 + $0x48] ss:$28 sps:$4 sm:$0xff]  }
  0x8b   :  { %2289 = vmatprep.mubr.bf16.mxu0 %v3870_v0  ;;  %v3973_v0 = vld [vmem:[%s5718_s0 + $0x5b4] ss:$28 sps:$4 sm:$0xff]  }
  0x91   :  { %2001 = vmatmul.mubr.bf16.gmra.mrb[40].mxu1 %v3872_v27  ;;  %v3975_v27 = vld [vmem:[%s5718_s0 + $0x84] ss:$28 sps:$4 sm:$0xff]  }
  0x92   :  { %2290 = vmatmul.mubr.bf16.gmra.mrb[40].mxu0 %v3873_v28  ;;  %2008 = vmatprep.mubr.bf16.mxu1 %v3875_v29  ;;  %v3977_v28 = vld [vmem:[%s5718_s0 + $0x5b0] ss:$28 sps:$4 sm:$0xff]   ;;  %v3978_v29 = vld [vmem:[%s5718_s0 + $0x80] ss:$28 sps:$4 sm:$0xff]  }
  0x93   :  { %2297 = vmatprep.mubr.bf16.mxu0 %v3877_v30  ;;  %v3979_v30 = vld [vmem:[%s5718_s0 + $0x5ec] ss:$28 sps:$4 sm:$0xff]  }
  0x99   :  { %2009 = vmatmul.mubr.bf16.gmra.mrb[44].mxu1 %v3879_v31  ;;  %v3981_v31 = vld [vmem:[%s5718_s0 + $0xbc] ss:$28 sps:$4 sm:$0xff]  }
  0x9a   :  { %2298 = vmatmul.mubr.bf16.gmra.mrb[44].mxu0 %v3880_v32  ;;  %2016 = vmatprep.mubr.bf16.mxu1 %v3881_v33 }
  0x9b   :  { %2305 = vmatprep.mubr.bf16.mxu0 %v3883_v34  ;;  %v3983_v34 = vld [vmem:[%s5718_s0 + $0x5e8] ss:$28 sps:$4 sm:$0xff]  }
  0xa1   :  { %2017 = vmatmul.mubr.bf16.gmra.mrb[48].mxu1 %v3885_v35 }
  0xa2   :  { %2306 = vmatmul.mubr.bf16.gmra.mrb[48].mxu0 %v3886_v36  ;;  %2024 = vmatprep.mubr.bf16.mxu1 %v3888_v37  ;;  %v3984_v36 = vld [vmem:[%s5718_s0 + $0xb8] ss:$28 sps:$4 sm:$0xff]   ;;  %v3985_v37 = vld [vmem:[%s5718_s0 + $0x624] ss:$28 sps:$4 sm:$0xff]  }
  0xa3   :  { %2313 = vmatprep.mubr.bf16.mxu0 %v3890_v38 }
  0xa9   :  { %2025 = vmatmul.mubr.bf16.gmra.mrb[52].mxu1 %v3892_v39  ;;  %v3987_v39 = vld [vmem:[%s5718_s0 + $0xf4] ss:$28 sps:$4 sm:$0xff]  }
  0xaa   :  { %2314 = vmatmul.mubr.bf16.gmra.mrb[52].mxu0 %v3893_v40  ;;  %2032 = vmatprep.mubr.bf16.mxu1 %v3895_v41 }
  0xab   :  { %2321 = vmatprep.mubr.bf16.mxu0 %v3897_v42  ;;  %v3989_v42 = vld [vmem:[%s5718_s0 + $0x620] ss:$28 sps:$4 sm:$0xff]  }
  0xb1   :  { %2033 = vmatmul.mubr.bf16.gmra.mrb[56].mxu1 %v3899_v43 }
  0xb2   :  { %2322 = vmatmul.mubr.bf16.gmra.mrb[56].mxu0 %v3900_v44  ;;  %2040 = vmatprep.mubr.bf16.mxu1 %v3901_v45  ;;  %v3990_v44 = vld [vmem:[%s5718_s0 + $0xf0] ss:$28 sps:$4 sm:$0xff]   ;;  %v3991_v45 = vld [vmem:[%s5718_s0 + $0x65c] ss:$28 sps:$4 sm:$0xff]  }
  0xb3   :  { %2329 = vmatprep.mubr.bf16.mxu0 %v3903_v46 }
  0xb9   :  { %2041 = vmatmul.mubr.bf16.gmra.mrb[60].mxu1 %v3905_v47  ;;  %v3993_v47 = vld [vmem:[%s5718_s0 + $0x12c] ss:$28 sps:$4 sm:$0xff]  }
  0xba   :  { %2330 = vmatmul.mubr.bf16.gmra.mrb[60].mxu0 %v3906_v48  ;;  %2048 = vmatprep.mubr.bf16.mxu1 %v3908_v49 }
  0xbb   :  { %2337 = vmatprep.mubr.bf16.mxu0 %v3910_v50  ;;  %v3995_v50 = vld [vmem:[%s5718_s0 + $0x658] ss:$28 sps:$4 sm:$0xff]  }
  0xc1   :  { %2049 = vmatmul.mubr.bf16.gmra.mrb[64].mxu1 %v3912_v51 }
  0xc2   :  { %2338 = vmatmul.mubr.bf16.gmra.mrb[64].mxu0 %v3913_v52  ;;  %2056 = vmatprep.mubr.bf16.mxu1 %v3915_v53  ;;  %v3996_v52 = vld [vmem:[%s5718_s0 + $0x128] ss:$28 sps:$4 sm:$0xff]   ;;  %v3997_v53 = vld [vmem:[%s5718_s0 + $0x694] ss:$28 sps:$4 sm:$0xff]  }
  0xc3   :  { %2345 = vmatprep.mubr.bf16.mxu0 %v3917_v54 }
  0xc9   :  { %2057 = vmatmul.mubr.bf16.gmra.mrb[68].mxu1 %v3919_v56  ;;  %v3999_v56 = vld [vmem:[%s5718_s0 + $0x164] ss:$28 sps:$4 sm:$0xff]  }
  0xca   :  { %2346 = vmatmul.mubr.bf16.gmra.mrb[68].mxu0 %v3920_v57  ;;  %2064 = vmatprep.mubr.bf16.mxu1 %v3921_v58 }
  0xcb   :  { %2353 = vmatprep.mubr.bf16.mxu0 %v3923_v59  ;;  %v4001_v59 = vld [vmem:[%s5718_s0 + $0x690] ss:$28 sps:$4 sm:$0xff]  }
  0xd1   :  { %2065 = vmatmul.mubr.bf16.gmra.mrb[72].mxu1 %v3925_v60 }
  0xd2   :  { %2354 = vmatmul.mubr.bf16.gmra.mrb[72].mxu0 %v3926_v61  ;;  %2072 = vmatprep.mubr.bf16.mxu1 %v3928_v62  ;;  %v4002_v61 = vld [vmem:[%s5718_s0 + $0x160] ss:$28 sps:$4 sm:$0xff]   ;;  %v4003_v62 = vld [vmem:[%s5718_s0 + $0x6cc] ss:$28 sps:$4 sm:$0xff]  }
  0xd3   :  { %2361 = vmatprep.mubr.bf16.mxu0 %v3930_v63 }
  0xd9   :  { %2073 = vmatmul.mubr.bf16.gmra.mrb[76].mxu1 %v3932_v1  ;;  %v4005_v1 = vld [vmem:[%s5718_s0 + $0x19c] ss:$28 sps:$4 sm:$0xff]  }
  0xda   :  { %2362 = vmatmul.mubr.bf16.gmra.mrb[76].mxu0 %v3933_v2  ;;  %2080 = vmatprep.mubr.bf16.mxu1 %v3935_v3 }
  0xdb   :  { %2369 = vmatprep.mubr.bf16.mxu0 %v3937_v4  ;;  %v4007_v4 = vld [vmem:[%s5718_s0 + $0x6c8] ss:$28 sps:$4 sm:$0xff]  }
  0xe1   :  { %2081 = vmatmul.mubr.bf16.gmra.mrb[80].mxu1 %v3939_v5 }
  0xe2   :  { %2370 = vmatmul.mubr.bf16.gmra.mrb[80].mxu0 %v3940_v6  ;;  %2088 = vmatprep.mubr.bf16.mxu1 %v3941_v7  ;;  %v4008_v6 = vld [vmem:[%s5718_s0 + $0x198] ss:$28 sps:$4 sm:$0xff]   ;;  %v4011_v7 = vld [vmem:[%s5718_s0 + $0x54c] ss:$28 sps:$4 sm:$0xff]  }
  0xe3   :  { %2377 = vmatprep.mubr.bf16.mxu0 %v3943_v8 }
  0xe9   :  { %2089 = vmatmul.mubr.bf16.gmra.mrb[84].mxu1 %v3945_v9  ;;  %v4012_v9 = vld [vmem:[%s5718_s0 + $0x1d4] ss:$28 sps:$4 sm:$0xff]  }
  0xea   :  { %2378 = vmatmul.mubr.bf16.gmra.mrb[84].mxu0 %v3946_v10  ;;  %2096 = vmatprep.mubr.bf16.mxu1 %v3948_v11 }
  0xeb   :  { %2385 = vmatprep.mubr.bf16.mxu0 %v3950_v12  ;;  %v4009_v12 = vld [vmem:[%s5718_s0 + $0x548] ss:$28 sps:$4 sm:$0xff]  }
  0xf1   :  { %2097 = vmatmul.mubr.bf16.gmra.mrb[88].mxu1 %v3952_v13 }
  0xf2   :  { %2386 = vmatmul.mubr.bf16.gmra.mrb[88].mxu0 %v3953_v14  ;;  %2104 = vmatprep.mubr.bf16.mxu1 %v3955_v15  ;;  %v4014_v14 = vld [vmem:[%s5718_s0 + $0x1d0] ss:$28 sps:$4 sm:$0xff]  }
  0xf3   :  { %2393 = vmatprep.mubr.bf16.mxu0 %v3957_v16  ;;  %v4016_v16 = vld [vmem:[%s5718_s0 + $0x584] ss:$28 sps:$4 sm:$0xff]  }
  0xf9   :  { %2105 = vmatmul.mubr.bf16.gmra.mrb[92].mxu1 %v3959_v17  ;;  %v4018_v17 = vld [vmem:[%s5718_s0 + $0x20c] ss:$28 sps:$4 sm:$0xff]  }
  0xfa   :  { %2394 = vmatmul.mubr.bf16.gmra.mrb[92].mxu0 %v3960_v18  ;;  %2112 = vmatprep.mubr.bf16.mxu1 %v3961_v19  ;;  %v4040_v18 = vld [vmem:[%s5717_s1 + $0x188] sm:$0xff]  }
  0xfb   :  { %2498 = vmatprep.mubr.bf16.mxu0 %v3965_v20 }
 0x101   :  { %2113 = vmatmul.mubr.bf16.gmra.mrb[96].mxu1 %v3966_v21  ;;  %v4020_v21 = vld [vmem:[%s5718_s0 + $0x580] ss:$28 sps:$4 sm:$0xff]  }
 0x102   :  { %2499 = vmatmul.mubr.bf16.vlgmr.msra.gmra.mrb[0].mxu0 %v3963_v22  ;;  %2120 = vmatprep.mubr.bf16.mxu1 %v3967_v23  ;;  %v4021_v23 = vld [vmem:[%s5718_s0 + $0x208] ss:$28 sps:$4 sm:$0xff]  }
 0x103   :  { %2506 = vmatprep.mubr.bf16.mxu0 %v3969_v24 }
 0x109   :  { %2121 = vmatmul.mubr.bf16.gmra.mrb[100].mxu1 %v3971_v25  ;;  %v4024_v25 = vld [vmem:[%s5718_s0 + $0x244] ss:$28 sps:$4 sm:$0xff]  }
 0x10a   :  { %2507 = vmatmul.mubr.bf16.gmra.mrb[4].mxu0 %v3972_v26  ;;  %2128 = vmatprep.mubr.bf16.mxu1 %v3973_v0 }
 0x10b   :  { %2514 = vmatprep.mubr.bf16.mxu0 %v3975_v27  ;;  %v4026_v27 = vld [vmem:[%s5718_s0 + $0x5b8] ss:$28 sps:$4 sm:$0xff]  }
 0x111   :  { %2129 = vmatmul.mubr.bf16.gmra.mrb[104].mxu1 %v3977_v28 }
 0x112   :  { %2515 = vmatmul.mubr.bf16.gmra.mrb[8].mxu0 %v3978_v29  ;;  %2136 = vmatprep.mubr.bf16.mxu1 %v3979_v30  ;;  %v4027_v29 = vld [vmem:[%s5718_s0 + $0x240] ss:$28 sps:$4 sm:$0xff]   ;;  %v4028_v30 = vld [vmem:[%s5718_s0 + $0x5f4] ss:$28 sps:$4 sm:$0xff]  }
 0x113   :  { %2522 = vmatprep.mubr.bf16.mxu0 %v3981_v31 }
 0x114   :  { %v4768_v32 = vpop.f32.mrb[0].mxu1 }
 0x115   :  { %v1924_v33 = vpop.f32.mrb[1].mxu1 }
 0x116   :  { %v4773_v35 = vpop.f32.mrb[2].mxu1  ;;  %v4030_v33 = vld [vmem:[%s5718_s0 + $0x27c] ss:$28 sps:$4 sm:$0xff]  }
 0x117   :  { %v1927_v38 = vpop.f32.mrb[3].mxu1 }
 0x119   :  { %2137 = vmatmul.mubr.bf16.gmra.mrb[108].mxu1 %v3983_v34 }
 0x11a   :  { %2523 = vmatmul.mubr.bf16.gmra.mrb[12].mxu0 %v3984_v36  ;;  %2144 = vmatprep.mubr.bf16.mxu1 %v3985_v37  ;;  %v4032_v37 = vld [vmem:[%s5718_s0 + $0x5f0] ss:$28 sps:$4 sm:$0xff]  }
 0x11b   :  { %2530 = vmatprep.mubr.bf16.mxu0 %v3987_v39  ;;  %v4033_v39 = vld [vmem:[%s5718_s0 + $0x278] ss:$28 sps:$4 sm:$0xff]  }
 0x11c   :  { %v4784_v40 = vpop.f32.mrb[4].mxu1 }
 0x11d   :  { %v1932_v41 = vpop.f32.mrb[5].mxu1 }
 0x11e   :  { %v4789_v43 = vpop.f32.mrb[6].mxu1  ;;  %v4034_v41 = vld [vmem:[%s5718_s0 + $0x62c] ss:$28 sps:$4 sm:$0xff]  }
 0x11f   :  { %v1935_v46 = vpop.f32.mrb[7].mxu1 }
 0x121   :  { %2145 = vmatmul.mubr.bf16.gmra.mrb[112].mxu1 %v3989_v42 }
 0x122   :  { %2531 = vmatmul.mubr.bf16.gmra.mrb[16].mxu0 %v3990_v44  ;;  %2152 = vmatprep.mubr.bf16.mxu1 %v3991_v45  ;;  %v4036_v44 = vld [vmem:[%s5718_s0 + $0x2b4] ss:$28 sps:$4 sm:$0xff]  }
 0x123   :  { %2538 = vmatprep.mubr.bf16.mxu0 %v3993_v47  ;;  %v4038_v47 = vld [vmem:[%s5718_s0 + $0x628] ss:$28 sps:$4 sm:$0xff]  }
 0x124   :  { %v4800_v48 = vpop.f32.mrb[8].mxu1 }
 0x125   :  { %v1940_v49 = vpop.f32.mrb[9].mxu1 }
 0x126   :  { %v4805_v51 = vpop.f32.mrb[10].mxu1 }
 0x127   :  { %v1943_v54 = vpop.f32.mrb[11].mxu1 }
 0x128   :  { %v4043_v54 = vld [vmem:[%s5718_s0 + $0x2ec] ss:$28 sps:$4 sm:$0xff]  }
 0x129   :  { %2153 = vmatmul.mubr.bf16.gmra.mrb[116].mxu1 %v3995_v50  ;;  %v4039_v50 = vld [vmem:[%s5718_s0 + $0x2b0] ss:$28 sps:$4 sm:$0xff]  }
 0x12a   :  { %2539 = vmatmul.mubr.bf16.gmra.mrb[20].mxu0 %v3996_v52  ;;  %2160 = vmatprep.mubr.bf16.mxu1 %v3997_v53  ;;  %v4041_v52 = vld [vmem:[%s5718_s0 + $0x664] ss:$28 sps:$4 sm:$0xff]  }
 0x12b   :  { %2546 = vmatprep.mubr.bf16.mxu0 %v3999_v56 }
 0x12c   :  { %v4816_v57 = vpop.f32.mrb[12].mxu1 }
 0x12d   :  { %v1948_v58 = vpop.f32.mrb[13].mxu1 }
 0x12e   :  { %v4821_v60 = vpop.f32.mrb[14].mxu1 }
 0x12f   :  { %v1951_v63 = vpop.f32.mrb[15].mxu1 }
 0x130   :  { %v4047_v63 = vld [vmem:[%s5718_s0 + $0x69c] ss:$28 sps:$4 sm:$0xff]  }
 0x131   :  { %2161 = vmatmul.mubr.bf16.gmra.mrb[120].mxu1 %v4001_v59  ;;  %v4045_v59 = vld [vmem:[%s5718_s0 + $0x660] ss:$28 sps:$4 sm:$0xff]  }
 0x132   :  { %2547 = vmatmul.mubr.bf16.gmra.mrb[24].mxu0 %v4002_v61  ;;  %2168 = vmatprep.mubr.bf16.mxu1 %v4003_v62  ;;  %v4046_v62 = vld [vmem:[%s5718_s0 + $0x2e8] ss:$28 sps:$4 sm:$0xff]  }
 0x133   :  { %2554 = vmatprep.mubr.bf16.mxu0 %v4005_v1 }
 0x134   :  { %v4832_v2 = vpop.f32.mrb[16].mxu1 }
 0x135   :  { %v1956_v3 = vpop.f32.mrb[17].mxu1 }
 0x136   :  { %v4837_v5 = vpop.f32.mrb[18].mxu1  ;;  %v4049_v3 = vld [vmem:[%s5718_s0 + $0x324] ss:$28 sps:$4 sm:$0xff]  }
 0x137   :  { %v1959_v8 = vpop.f32.mrb[19].mxu1 }
 0x139   :  { %2169 = vmatmul.mubr.bf16.gmra.mrb[124].mxu1 %v4007_v4 }
 0x13a   :  { %2555 = vmatmul.mubr.bf16.gmra.mrb[28].mxu0 %v4008_v6  ;;  %2401 = vmatprep.mubr.bf16.mxu1 %v4011_v7  ;;  %v4051_v7 = vld [vmem:[%s5718_s0 + $0x698] ss:$28 sps:$4 sm:$0xff]  }
 0x13b   :  { %2562 = vmatprep.mubr.bf16.mxu0 %v4012_v9  ;;  %v4052_v9 = vld [vmem:[%s5718_s0 + $0x320] ss:$28 sps:$4 sm:$0xff]  }
 0x13c   :  { %v4848_v10 = vpop.f32.mrb[20].mxu1 }
 0x13d   :  { %v1964_v11 = vpop.f32.mrb[21].mxu1 }
 0x13e   :  { %v4853_v13 = vpop.f32.mrb[22].mxu1  ;;  %v4053_v11 = vld [vmem:[%s5718_s0 + $0x6d4] ss:$28 sps:$4 sm:$0xff]  }
 0x13f   :  { %v1967_v15 = vpop.f32.mrb[23].mxu1 }
 0x141   :  { %2402 = vmatmul.mubr.bf16.vlgmr.msra.gmra.mrb[96].mxu1 %v4009_v12 }
 0x142   :  { %2563 = vmatmul.mubr.bf16.gmra.mrb[32].mxu0 %v4014_v14  ;;  %3477 = vmatpush3.bf16.msra.mxu1 %v4645_v55  ;;  %v4022_v55 = vld [vmem:[%s5718_s0 + $0x5bc] ss:$28 sps:$4 sm:$0xff]  }
 0x143   :  { %2409 = vmatprep.mubr.bf16.mxu1 %v4016_v16  ;;  %2570 = vmatprep.mubr.bf16.mxu0 %v4018_v17  ;;  %v4055_v14 = vld [vmem:[%s5718_s0 + $0x35c] ss:$28 sps:$4 sm:$0xff]   ;;  %v4057_v17 = vld [vmem:[%s5718_s0 + $0x6d0] ss:$28 sps:$4 sm:$0xff]  }
 0x144   :  { %v4868_v19 = vpop.f32.mrb[24].mxu1  ;;  %3478 = vmatprep.subr.bf16.mxu1 %v4040_v18 }
 0x145   :  { %v1972_v20 = vpop.f32.mrb[25].mxu1 }
 0x146   :  { %v4873_v22 = vpop.f32.mrb[26].mxu1  ;;  %3479 = vmatpush3.bf16.msra.mxu1 %v4040_v18  ;;  %v4058_v20 = vld [vmem:[%s5718_s0 + $0x358] ss:$28 sps:$4 sm:$0xff]  }
 0x147   :  { %v1975_v24 = vpop.f32.mrb[27].mxu1 }
 0x149   :  { %2410 = vmatmul.mubr.bf16.gmra.mrb[100].mxu1 %v4020_v21  ;;  %v4061_v21 = vld [vmem:[%s5718_s0 + $0x18] ss:$28 sps:$4 sm:$0xff]  }
 0x14a   :  { %2571 = vmatmul.mubr.bf16.gmra.mrb[36].mxu0 %v4021_v23  ;;  %2417 = vmatprep.mubr.bf16.mxu1 %v4022_v55  ;;  %v4059_v55 = vld [vmem:[%s5718_s0 + $0x394] ss:$28 sps:$4 sm:$0xff]  }
 0x14b   :  { %2578 = vmatprep.mubr.bf16.mxu0 %v4024_v25 }
 0x14c   :  { %v4884_v26 = vpop.f32.mrb[28].mxu1 }
 0x14d   :  { %v1980_v0 = vpop.f32.mrb[29].mxu1 }
 0x14e   :  { %v4889_v28 = vpop.f32.mrb[30].mxu1  ;;  %v4063_v0 = vld [vmem:[%s5718_s0 + $0x50] ss:$28 sps:$4 sm:$0xff]  }
 0x14f   :  { %v1983_v31 = vpop.f32.mrb[31].mxu1 }
 0x151   :  { %2418 = vmatmul.mubr.bf16.gmra.mrb[104].mxu1 %v4026_v27 }
 0x152   :  { %2579 = vmatmul.mubr.bf16.gmra.mrb[40].mxu0 %v4027_v29  ;;  %2425 = vmatprep.mubr.bf16.mxu1 %v4028_v30  ;;  %v4062_v29 = vld [vmem:[%s5718_s0 + $0x390] ss:$28 sps:$4 sm:$0xff]   ;;  %v4066_v30 = vld [vmem:[%s5718_s0 + $0x88] ss:$28 sps:$4 sm:$0xff]  }
 0x153   :  { %2586 = vmatprep.mubr.bf16.mxu0 %v4030_v33  ;;  %v4064_v33 = vld [vmem:[%s5718_s0 + $0x3cc] ss:$28 sps:$4 sm:$0xff]  }
 0x154   :  { %v4900_v34 = vpop.f32.mrb[32].mxu1 }
 0x155   :  { %v1988_v36 = vpop.f32.mrb[33].mxu1 }
 0x156   :  { %v4905_v38 = vpop.f32.mrb[34].mxu1 }
 0x157   :  { %v1991_v42 = vpop.f32.mrb[35].mxu1 }
 0x158   :  { %v4067_v42 = vld [vmem:[%s5718_s0 + $0x3c8] ss:$28 sps:$4 sm:$0xff]  }
 0x159   :  { %2426 = vmatmul.mubr.bf16.gmra.mrb[108].mxu1 %v4032_v37 }
 0x15a   :  { %2587 = vmatmul.mubr.bf16.gmra.mrb[44].mxu0 %v4033_v39  ;;  %2433 = vmatprep.mubr.bf16.mxu1 %v4034_v41  ;;  %v4068_v39 = vld [vmem:[%s5718_s0 + $0xc0] ss:$28 sps:$4 sm:$0xff]  }
 0x15b   :  { %2594 = vmatprep.mubr.bf16.mxu0 %v4036_v44  ;;  %v4071_v44 = vld [vmem:[%s5718_s0 + $0xf8] ss:$28 sps:$4 sm:$0xff]  }
 0x15c   :  { %v4916_v45 = vpop.f32.mrb[36].mxu1 }
 0x15d   :  { %v1996_v46 = vpop.f32.mrb[37].mxu1 }
 0x15e   :  { %v4921_v49 = vpop.f32.mrb[38].mxu1 }
 0x15f   :  { %v1999_v53 = vpop.f32.mrb[39].mxu1 }
 0x160   :  { %v4073_v53 = vld [vmem:[%s5718_s0 + $0x130] ss:$28 sps:$4 sm:$0xff]  }
 0x161   :  { %2434 = vmatmul.mubr.bf16.gmra.mrb[112].mxu1 %v4038_v47  ;;  %v4069_v47 = vld [vmem:[%s5718_s0 + $0x404] ss:$28 sps:$4 sm:$0xff]  }
 0x162   :  { %2595 = vmatmul.mubr.bf16.gmra.mrb[48].mxu0 %v4039_v50  ;;  %2441 = vmatprep.mubr.bf16.mxu1 %v4041_v52 }
 0x163   :  { %2602 = vmatprep.mubr.bf16.mxu0 %v4043_v54 }
 0x164   :  { %v4932_v56 = vpop.f32.mrb[40].mxu1 }
 0x165   :  { %v2004_v58 = vpop.f32.mrb[41].mxu1 }
 0x166   :  { %v4937_v61 = vpop.f32.mrb[42].mxu1  ;;  %v4072_v58 = vld [vmem:[%s5718_s0 + $0x400] ss:$28 sps:$4 sm:$0xff]  }
 0x167   :  { %v2007_v1 = vpop.f32.mrb[43].mxu1 }
 0x169   :  { %2442 = vmatmul.mubr.bf16.gmra.mrb[116].mxu1 %v4045_v59  ;;  %v4076_v59 = vld [vmem:[%s5718_s0 + $0x168] ss:$28 sps:$4 sm:$0xff]  }
 0x16a   :  { %2603 = vmatmul.mubr.bf16.gmra.mrb[52].mxu0 %v4046_v62  ;;  %2449 = vmatprep.mubr.bf16.mxu1 %v4047_v63  ;;  %v4074_v63 = vld [vmem:[%s5718_s0 + $0x43c] ss:$28 sps:$4 sm:$0xff]  }
 0x16b   :  { %2610 = vmatprep.mubr.bf16.mxu0 %v4049_v3 }
 0x16c   :  { %v4948_v4 = vpop.f32.mrb[44].mxu1 }
 0x16d   :  { %v2012_v6 = vpop.f32.mrb[45].mxu1 }
 0x16e   :  { %v4953_v8 = vpop.f32.mrb[46].mxu1  ;;  %v4078_v6 = vld [vmem:[%s5718_s0 + $0x1a0] ss:$28 sps:$4 sm:$0xff]  }
 0x16f   :  { %v2015_v12 = vpop.f32.mrb[47].mxu1 }
 0x171   :  { %2450 = vmatmul.mubr.bf16.gmra.mrb[120].mxu1 %v4051_v7 }
 0x172   :  { %2611 = vmatmul.mubr.bf16.gmra.mrb[56].mxu0 %v4052_v9  ;;  %2457 = vmatprep.mubr.bf16.mxu1 %v4053_v11  ;;  %v4077_v9 = vld [vmem:[%s5718_s0 + $0x438] ss:$28 sps:$4 sm:$0xff]  }
 0x173   :  { %2618 = vmatprep.mubr.bf16.mxu0 %v4055_v14  ;;  %v4081_v11 = vld [vmem:[%s5718_s0 + $0x1d8] ss:$28 sps:$4 sm:$0xff]  }
 0x174   :  { %v4964_v15 = vpop.f32.mrb[48].mxu1  ;;  %v4079_v14 = vld [vmem:[%s5718_s0 + $0x474] ss:$28 sps:$4 sm:$0xff]  }
 0x175   :  { %v2020_v16 = vpop.f32.mrb[49].mxu1 }
 0x176   :  { %v4969_v18 = vpop.f32.mrb[50].mxu1 }
 0x177   :  { %v2023_v23 = vpop.f32.mrb[51].mxu1 }
 0x178   :  { %v4082_v23 = vld [vmem:[%s5718_s0 + $0x470] ss:$28 sps:$4 sm:$0xff]  }
 0x179   :  { %2458 = vmatmul.mubr.bf16.gmra.mrb[124].mxu1 %v4057_v17 }
 0x17a   :  { %2619 = vmatmul.mubr.bf16.gmra.mrb[60].mxu0 %v4058_v20  ;;  %3480 = vmatprep.mubr.msk.bf16.mxu1 %vm1791_vm0, %v4061_v21  ;;  %v4083_v20 = vld [vmem:[%s5718_s0 + $0x210] ss:$28 sps:$4 sm:$0xff]  }
 0x17b   :  { %2626 = vmatprep.mubr.bf16.mxu0 %v4059_v55  ;;  %v4086_v55 = vld [vmem:[%s5718_s0 + $0x248] ss:$28 sps:$4 sm:$0xff]  }
 0x17c   :  { %v4981_v24 = vpop.f32.mrb[52].mxu1 }
 0x17d   :  { %v2028_v25 = vpop.f32.mrb[53].mxu1 }
 0x17e   :  { %v4986_v27 = vpop.f32.mrb[54].mxu1 }
 0x17f   :  { %v2031_v31 = vpop.f32.mrb[55].mxu1 }
 0x180   :  { %v4088_v31 = vld [vmem:[%s5718_s0 + $0x280] ss:$28 sps:$4 sm:$0xff]  }
 0x181   :  { %3481 = vmatmul.mubr.msk.bf16.vlgmr.msra.gmra.mrb[128].mxu1 %vm1791_vm0, %v4063_v0  ;;  %v4084_v0 = vld [vmem:[%s5718_s0 + $0x4ac] ss:$28 sps:$4 sm:$0xff]  }
 0x182   :  { %2627 = vmatmul.mubr.bf16.gmra.mrb[64].mxu0 %v4062_v29  ;;  %3484 = vmatprep.mubr.msk.bf16.mxu1 %vm1791_vm0, %v4066_v30 }
 0x183   :  { %2634 = vmatprep.mubr.bf16.mxu0 %v4064_v33 }
 0x184   :  { %v4999_v36 = vpop.f32.mrb[56].mxu1 }
 0x185   :  { %v2036_v37 = vpop.f32.mrb[57].mxu1 }
 0x186   :  { %v5004_v41 = vpop.f32.mrb[58].mxu1  ;;  %v4087_v37 = vld [vmem:[%s5718_s0 + $0x4a8] ss:$28 sps:$4 sm:$0xff]  }
 0x187   :  { %v2039_v46 = vpop.f32.mrb[59].mxu1 }
 0x189   :  { %3485 = vmatmul.mubr.msk.bf16.gmra.mrb[132].mxu1 %vm1791_vm0, %v4068_v39  ;;  %v4091_v39 = vld [vmem:[%s5718_s0 + $0x2b8] ss:$28 sps:$4 sm:$0xff]  }
 0x18a   :  { %2635 = vmatmul.mubr.bf16.gmra.mrb[68].mxu0 %v4067_v42  ;;  %3488 = vmatprep.mubr.msk.bf16.mxu1 %vm1791_vm0, %v4071_v44  ;;  %v4089_v44 = vld [vmem:[%s5718_s0 + $0x4e4] ss:$28 sps:$4 sm:$0xff]  }
 0x18b   :  { %2642 = vmatprep.mubr.bf16.mxu0 %v4069_v47 }
 0x18c   :  { %v5017_v50 = vpop.f32.mrb[60].mxu1 }
 0x18d   :  { %v2044_v52 = vpop.f32.mrb[61].mxu1 }
 0x18e   :  { %v5022_v54 = vpop.f32.mrb[62].mxu1  ;;  %v4093_v52 = vld [vmem:[%s5718_s0 + $0x2f0] ss:$28 sps:$4 sm:$0xff]  }
 0x18f   :  { %v2047_v62 = vpop.f32.mrb[63].mxu1 }
 0x191   :  { %3489 = vmatmul.mubr.msk.bf16.gmra.mrb[136].mxu1 %vm1791_vm0, %v4073_v53 }
 0x192   :  { %2643 = vmatmul.mubr.bf16.gmra.mrb[72].mxu0 %v4072_v58  ;;  %3492 = vmatprep.mubr.msk.bf16.mxu1 %vm1791_vm0, %v4076_v59  ;;  %v4092_v58 = vld [vmem:[%s5718_s0 + $0x4e0] ss:$28 sps:$4 sm:$0xff]   ;;  %v4096_v59 = vld [vmem:[%s5718_s0 + $0x328] ss:$28 sps:$4 sm:$0xff]  }
 0x193   :  { %2650 = vmatprep.mubr.bf16.mxu0 %v4074_v63  ;;  %v4094_v63 = vld [vmem:[%s5718_s0 + $0x51c] ss:$28 sps:$4 sm:$0xff]  }
 0x194   :  { %v5035_v1 = vpop.f32.mrb[64].mxu1 }
 0x195   :  { %v2052_v3 = vpop.f32.mrb[65].mxu1 }
 0x196   :  { %v5040_v7 = vpop.f32.mrb[66].mxu1 }
 0x197   :  { %v2055_v12 = vpop.f32.mrb[67].mxu1 }
 0x198   :  { %v4097_v12 = vld [vmem:[%s5718_s0 + $0x518] ss:$28 sps:$4 sm:$0xff]  }
 0x199   :  { %3493 = vmatmul.mubr.msk.bf16.gmra.mrb[140].mxu1 %vm1791_vm0, %v4078_v6 }
 0x19a   :  { %2651 = vmatmul.mubr.bf16.gmra.mrb[76].mxu0 %v4077_v9  ;;  %3496 = vmatprep.mubr.msk.bf16.mxu1 %vm1791_vm0, %v4081_v11  ;;  %v4098_v9 = vld [vmem:[%s5718_s0 + $0x360] ss:$28 sps:$4 sm:$0xff]  }
 0x19b   :  { %2658 = vmatprep.mubr.bf16.mxu0 %v4079_v14  ;;  %v4101_v14 = vld [vmem:[%s5718_s0 + $0x398] ss:$28 sps:$4 sm:$0xff]  }
 0x19c   :  { %v5053_v16 = vpop.f32.mrb[68].mxu1 }
 0x19d   :  { %v2060_v17 = vpop.f32.mrb[69].mxu1 }
 0x19e   :  { %v5058_v21 = vpop.f32.mrb[70].mxu1 }
 0x19f   :  { %v2063_v25 = vpop.f32.mrb[71].mxu1 }
 0x1a0   :  { %v4103_v25 = vld [vmem:[%s5718_s0 + $0x3d0] ss:$28 sps:$4 sm:$0xff]  }
 0x1a1   :  { %3497 = vmatmul.mubr.msk.bf16.gmra.mrb[144].mxu1 %vm1791_vm0, %v4083_v20  ;;  %v4099_v20 = vld [vmem:[%s5718_s0 + $0x554] ss:$28 sps:$4 sm:$0xff]  }
 0x1a2   :  { %2659 = vmatmul.mubr.bf16.gmra.mrb[80].mxu0 %v4082_v23  ;;  %3500 = vmatprep.mubr.msk.bf16.mxu1 %vm1791_vm0, %v4086_v55 }
 0x1a3   :  { %2666 = vmatprep.mubr.bf16.mxu0 %v4084_v0 }
 0x1a4   :  { %v5071_v29 = vpop.f32.mrb[72].mxu1 }
 0x1a5   :  { %v2068_v30 = vpop.f32.mrb[73].mxu1 }
 0x1a6   :  { %v5076_v33 = vpop.f32.mrb[74].mxu1  ;;  %v4102_v30 = vld [vmem:[%s5718_s0 + $0x550] ss:$28 sps:$4 sm:$0xff]  }
 0x1a7   :  { %v2071_v42 = vpop.f32.mrb[75].mxu1 }
 0x1a9   :  { %3501 = vmatmul.mubr.msk.bf16.gmra.mrb[148].mxu1 %vm1791_vm0, %v4088_v31  ;;  %v4106_v31 = vld [vmem:[%s5718_s0 + $0x408] ss:$28 sps:$4 sm:$0xff]  }
 0x1aa   :  { %2667 = vmatmul.mubr.bf16.gmra.mrb[84].mxu0 %v4087_v37  ;;  %3504 = vmatprep.mubr.msk.bf16.mxu1 %vm1791_vm0, %v4091_v39  ;;  %v4104_v39 = vld [vmem:[%s5718_s0 + $0x58c] ss:$28 sps:$4 sm:$0xff]  }
 0x1ab   :  { %2674 = vmatprep.mubr.bf16.mxu0 %v4089_v44 }
 0x1ac   :  { %v5089_v46 = vpop.f32.mrb[76].mxu1 }
 0x1ad   :  { %v2076_v47 = vpop.f32.mrb[77].mxu1 }
 0x1ae   :  { %v5094_v53 = vpop.f32.mrb[78].mxu1  ;;  %v4108_v47 = vld [vmem:[%s5718_s0 + $0x440] ss:$28 sps:$4 sm:$0xff]  }
 0x1af   :  { %v2079_v62 = vpop.f32.mrb[79].mxu1 }
 0x1b1   :  { %3505 = vmatmul.mubr.msk.bf16.gmra.mrb[152].mxu1 %vm1791_vm0, %v4093_v52 }
 0x1b2   :  { %2675 = vmatmul.mubr.bf16.gmra.mrb[88].mxu0 %v4092_v58  ;;  %3508 = vmatprep.mubr.msk.bf16.mxu1 %vm1791_vm0, %v4096_v59  ;;  %v4107_v58 = vld [vmem:[%s5718_s0 + $0x588] ss:$28 sps:$4 sm:$0xff]   ;;  %v4111_v59 = vld [vmem:[%s5718_s0 + $0x478] ss:$28 sps:$4 sm:$0xff]  }
 0x1b3   :  { %2682 = vmatprep.mubr.bf16.mxu0 %v4094_v63  ;;  %v4109_v63 = vld [vmem:[%s5718_s0 + $0x5c4] ss:$28 sps:$4 sm:$0xff]  }
 0x1b4   :  { %v5107_v3 = vpop.f32.mrb[80].mxu1 }
 0x1b5   :  { %v2084_v6 = vpop.f32.mrb[81].mxu1 }
 0x1b6   :  { %v5112_v11 = vpop.f32.mrb[82].mxu1 }
 0x1b7   :  { %v2087_v17 = vpop.f32.mrb[83].mxu1 }
 0x1b8   :  { %v4112_v17 = vld [vmem:[%s5718_s0 + $0x5c0] ss:$28 sps:$4 sm:$0xff]  }
 0x1b9   :  { %3509 = vmatmul.mubr.msk.bf16.gmra.mrb[156].mxu1 %vm1791_vm0, %v4098_v9 }
 0x1ba   :  { %2683 = vmatmul.mubr.bf16.gmra.mrb[92].mxu0 %v4097_v12  ;;  %3512 = vmatprep.mubr.msk.bf16.mxu1 %vm1791_vm0, %v4101_v14  ;;  %v4113_v12 = vld [vmem:[%s5718_s0 + $0x4b0] ss:$28 sps:$4 sm:$0xff]  }
 0x1bb   :  { %2690 = vmatprep.mubr.bf16.mxu0 %v4099_v20  ;;  %v4116_v20 = vld [vmem:[%s5718_s0 + $0x4e8] ss:$28 sps:$4 sm:$0xff]  }
 0x1bc   :  { %v5125_v23 = vpop.f32.mrb[84].mxu1 }
 0x1bd   :  { %v2092_v55 = vpop.f32.mrb[85].mxu1 }
 0x1be   :  { %v5130_v0 = vpop.f32.mrb[86].mxu1 }
 0x1bf   :  { %v2095_v37 = vpop.f32.mrb[87].mxu1 }
 0x1c1   :  { %3513 = vmatmul.mubr.msk.bf16.gmra.mrb[160].mxu1 %vm1791_vm0, %v4103_v25  ;;  %v4114_v25 = vld [vmem:[%s5718_s0 + $0x5fc] ss:$28 sps:$4 sm:$0xff]  }
 0x1c2   :  { %2691 = vmatmul.mubr.bf16.gmra.mrb[96].mxu0 %v4102_v30  ;;  %3516 = vmatprep.mubr.msk.bf16.mxu1 %vm1791_vm0, %v4106_v31  ;;  %v4118_v31 = vld [vmem:[%s5718_s0 + $0x520] ss:$28 sps:$4 sm:$0xff]  }
 0x1c3   :  { %2698 = vmatprep.mubr.bf16.mxu0 %v4104_v39 }
 0x1c4   :  { %v5143_v42 = vpop.f32.mrb[88].mxu1 }
 0x1c5   :  { %v2100_v44 = vpop.f32.mrb[89].mxu1 }
 0x1c6   :  { %v5148_v52 = vpop.f32.mrb[90].mxu1  ;;  %v4117_v44 = vld [vmem:[%s5718_s0 + $0x5f8] ss:$28 sps:$4 sm:$0xff]  }
 0x1c7   :  { %v2103_v62 = vpop.f32.mrb[91].mxu1 }
 0x1c9   :  { %3517 = vmatmul.mubr.msk.bf16.gmra.mrb[164].mxu1 %vm1791_vm0, %v4108_v47  ;;  %v4121_v47 = vld [vmem:[%s5718_s0 + $0x558] ss:$28 sps:$4 sm:$0xff]  }
 0x1ca   :  { %2699 = vmatmul.mubr.bf16.gmra.mrb[100].mxu0 %v4107_v58  ;;  %3520 = vmatprep.mubr.msk.bf16.mxu1 %vm1791_vm0, %v4111_v59  ;;  %v4119_v59 = vld [vmem:[%s5718_s0 + $0x634] ss:$28 sps:$4 sm:$0xff]  }
 0x1cb   :  { %2706 = vmatprep.mubr.bf16.mxu0 %v4109_v63 }
 0x1cc   :  { %v5161_v6 = vpop.f32.mrb[92].mxu1 }
 0x1cd   :  { %v2108_v9 = vpop.f32.mrb[93].mxu1 }
 0x1ce   :  { %v5166_v14 = vpop.f32.mrb[94].mxu1  ;;  %v4123_v9 = vld [vmem:[%s5718_s0 + $0x590] ss:$28 sps:$4 sm:$0xff]  }
 0x1cf   :  { %v2111_v55 = vpop.f32.mrb[95].mxu1 }
 0x1d1   :  { %3521 = vmatmul.mubr.msk.bf16.gmra.mrb[168].mxu1 %vm1791_vm0, %v4113_v12 }
 0x1d2   :  { %2707 = vmatmul.mubr.bf16.gmra.mrb[104].mxu0 %v4112_v17  ;;  %3524 = vmatprep.mubr.msk.bf16.mxu1 %vm1791_vm0, %v4116_v20  ;;  %v4126_v20 = vld [vmem:[%s5718_s0 + $0x5c8] ss:$28 sps:$4 sm:$0xff]  }
 0x1d3   :  { %2714 = vmatprep.mubr.bf16.mxu0 %v4114_v25  ;;  %v4124_v25 = vld [vmem:[%s5718_s0 + $0x66c] ss:$28 sps:$4 sm:$0xff]  }
 0x1d5   :  { %v2500_v30 = vpop.f32.mrb[0].mxu0 }
 0x1d6   :  { %v5183_v37 = vadd.f32 %v2500_v30, %v4768_v32  ;;  %v2502_v39 = vpop.f32.mrb[1].mxu0 }
 0x1d7   :  { %v2503_v58 = vpop.f32.mrb[2].mxu0  ;;  %v4128_v39 = vld [vmem:[%s5718_s0 + $0x600] ss:$28 sps:$4 sm:$0xff]  }
 0x1d8   :  { %v5195_v62 = vadd.f32 %v2503_v58, %v4773_v35  ;;  %v2505_v63 = vpop.f32.mrb[3].mxu0  ;;  %v4122_v35 = vld [vmem:[%s5718_s0 + $0x630] ss:$28 sps:$4 sm:$0xff]   ;;  %v4131_v58 = vld [vmem:[%s5718_s0 + $0x638] ss:$28 sps:$4 sm:$0xff]  }
 0x1d9   :  { %3525 = vmatmul.mubr.msk.bf16.gmra.mrb[172].mxu1 %vm1791_vm0, %v4118_v31  ;;  %v4129_v63 = vld [vmem:[%s5718_s0 + $0x6a4] ss:$28 sps:$4 sm:$0xff]  }
 0x1da   :  { %2715 = vmatmul.mubr.bf16.gmra.mrb[108].mxu0 %v4117_v44  ;;  %3528 = vmatprep.mubr.msk.bf16.mxu1 %vm1791_vm0, %v4121_v47 }
 0x1db   :  { %2722 = vmatprep.mubr.bf16.mxu0 %v4119_v59 }
 0x1dd   :  { %v2508_v32 = vpop.f32.mrb[4].mxu0 }
 0x1de   :  { %v5203_v12 = vadd.f32 %v2508_v32, %v4784_v40  ;;  %v2510_v17 = vpop.f32.mrb[5].mxu0 }
 0x1df   :  { %v2511_v55 = vpop.f32.mrb[6].mxu0  ;;  %v4133_v17 = vld [vmem:[%s5718_s0 + $0x670] ss:$28 sps:$4 sm:$0xff]  }
 0x1e0   :  { %v5215_v30 = vadd.f32 %v2511_v55, %v4789_v43  ;;  %v2513_v31 = vpop.f32.mrb[7].mxu0  ;;  %v4127_v43 = vld [vmem:[%s5718_s0 + $0x668] ss:$28 sps:$4 sm:$0xff]  }
 0x1e1   :  { %3529 = vmatmul.mubr.msk.bf16.gmra.mrb[176].mxu1 %vm1791_vm0, %v4123_v9  ;;  %v4136_v55 = vld [vmem:[%s5718_s0 + $0x6a8] ss:$28 sps:$4 sm:$0xff]   ;;  %v4134_v31 = vld [vmem:[%s5718_s0 + $0x6dc] ss:$28 sps:$4 sm:$0xff]  }
 0x1e2   :  { %2723 = vmatmul.mubr.bf16.gmra.mrb[112].mxu0 %v4122_v35  ;;  %3532 = vmatprep.mubr.msk.bf16.mxu1 %vm1791_vm0, %v4126_v20 }
 0x1e3   :  { %2730 = vmatprep.mubr.bf16.mxu0 %v4124_v25 }
 0x1e5   :  { %v2516_v40 = vpop.f32.mrb[8].mxu0 }
 0x1e6   :  { %v5223_v44 = vadd.f32 %v2516_v40, %v4800_v48  ;;  %v2518_v47 = vpop.f32.mrb[9].mxu0 }
 0x1e7   :  { %v2519_v59 = vpop.f32.mrb[10].mxu0  ;;  %v4138_v47 = vld [vmem:[%s5718_s0 + $0x6e0] ss:$28 sps:$4 sm:$0xff]  }
 0x1e8   :  { %v5235_v32 = vadd.f32 %v2519_v59, %v4805_v51  ;;  %v2521_v9 = vpop.f32.mrb[11].mxu0  ;;  %v4132_v51 = vld [vmem:[%s5718_s0 + $0x6a0] ss:$28 sps:$4 sm:$0xff]  }
 0x1e9   :  { %3533 = vmatmul.mubr.msk.bf16.gmra.mrb[180].mxu1 %vm1791_vm0, %v4128_v39 }
 0x1ea   :  { %2731 = vmatmul.mubr.bf16.gmra.mrb[116].mxu0 %v4127_v43  ;;  %3536 = vmatprep.mubr.msk.bf16.mxu1 %vm1791_vm0, %v4131_v58 }
 0x1eb   :  { %2738 = vmatprep.mubr.bf16.mxu0 %v4129_v63 }
 0x1ed   :  { %v2524_v48 = vpop.f32.mrb[12].mxu0 }
 0x1ee   :  { %v5243_v35 = vadd.f32 %v2524_v48, %v4816_v57  ;;  %v2526_v20 = vpop.f32.mrb[13].mxu0 }
 0x1ef   :  { %v2527_v25 = vpop.f32.mrb[14].mxu0 }
 0x1f0   :  { %v5255_v40 = vadd.f32 %v2527_v25, %v4821_v60  ;;  %v2529_v39 = vpop.f32.mrb[15].mxu0  ;;  %v4137_v60 = vld [vmem:[%s5718_s0 + $0x6d8] ss:$28 sps:$4 sm:$0xff]  }
 0x1f1   :  { %3537 = vmatmul.mubr.msk.bf16.gmra.mrb[184].mxu1 %vm1791_vm0, %v4133_v17 }
 0x1f2   :  { %2739 = vmatmul.mubr.bf16.gmra.mrb[120].mxu0 %v4132_v51  ;;  %3540 = vmatprep.mubr.msk.bf16.mxu1 %vm1791_vm0, %v4136_v55 }
 0x1f3   :  { %2746 = vmatprep.mubr.bf16.mxu0 %v4134_v31 }
 0x1f5   :  { %v2532_v57 = vpop.f32.mrb[16].mxu0 }
 0x1f6   :  { %v5263_v43 = vadd.f32 %v2532_v57, %v4832_v2  ;;  %v2534_v58 = vpop.f32.mrb[17].mxu0 }
 0x1f7   :  { %v2535_v59 = vpop.f32.mrb[18].mxu0 }
 0x1f8   :  { %v5269_v63 = vadd.f32 %v2535_v59, %v4837_v5  ;;  %v2537_v9 = vpop.f32.mrb[19].mxu0 }
 0x1f9   :  { %3541 = vmatmul.mubr.msk.bf16.gmra.mrb[188].mxu1 %vm1791_vm0, %v4138_v47 }
 0x1fa   :  { %2747 = vmatmul.mubr.bf16.gmra.mrb[124].mxu0 %v4137_v60 }
 0x1fd   :  { %v2540_v48 = vpop.f32.mrb[20].mxu0 }
 0x1fe   :  { %v5273_v17 = vadd.f32 %v2540_v48, %v4848_v10  ;;  %v2542_v20 = vpop.f32.mrb[21].mxu0 }
 0x1ff   :  { %v2543_v2 = vpop.f32.mrb[22].mxu0 }
 0x200   :  { %v5276_v51 = vadd.f32 %v2543_v2, %v4853_v13  ;;  %v2545_v55 = vpop.f32.mrb[23].mxu0 }
 0x205   :  { %v2548_v25 = vpop.f32.mrb[24].mxu0 }
 0x206   :  { %v5279_v31 = vadd.f32 %v2548_v25, %v4868_v19  ;;  %v2550_v5 = vpop.f32.mrb[25].mxu0 }
 0x207   :  { %v2551_v39 = vpop.f32.mrb[26].mxu0 }
 0x208   :  { %v5282_v57 = vadd.f32 %v2551_v39, %v4873_v22  ;;  %v2553_v47 = vpop.f32.mrb[27].mxu0 }
 0x20d   :  { %v2556_v58 = vpop.f32.mrb[28].mxu0 }
 0x20e   :  { %v5285_v10 = vadd.f32 %v2556_v58, %v4884_v26  ;;  %v2558_v60 = vpop.f32.mrb[29].mxu0 }
 0x20f   :  { %v2559_v59 = vpop.f32.mrb[30].mxu0 }
 0x210   :  { %v5288_v13 = vadd.f32 %v2559_v59, %v4889_v28  ;;  %v2561_v9 = vpop.f32.mrb[31].mxu0 }
 0x214   :  { %v5290_v48 = vpop.f32.mrb[96].mxu1 }
 0x215   :  { %v2564_v19 = vpop.f32.mrb[32].mxu0  ;;  %v2405_v20 = vpop.f32.mrb[97].mxu1 }
 0x216   :  { %v5293_v2 = vadd.f32 %v2564_v19, %v4900_v34  ;;  %v2566_v22 = vpop.f32.mrb[33].mxu0  ;;  %v5295_v55 = vpop.f32.mrb[98].mxu1 }
 0x217   :  { %v2567_v25 = vpop.f32.mrb[34].mxu0  ;;  %v2408_v5 = vpop.f32.mrb[99].mxu1 }
 0x218   :  { %v5298_v26 = vadd.f32 %v2567_v25, %v4905_v38  ;;  %v2569_v39 = vpop.f32.mrb[35].mxu0 }
 0x21c   :  { %v5300_v47 = vpop.f32.mrb[100].mxu1 }
 0x21d   :  { %5721 = vst [vmem:[#allocation2_spill] sm:$0xff] %v5300_v47  ;;  %v2572_v28 = vpop.f32.mrb[36].mxu0  ;;  %v2413_v58 = vpop.f32.mrb[101].mxu1 }
 0x21e   :  { %v5303_v60 = vadd.f32 %v2572_v28, %v4916_v45  ;;  %v2574_v59 = vpop.f32.mrb[37].mxu0  ;;  %v5305_v9 = vpop.f32.mrb[102].mxu1 }
 0x21f   :  { %5722 = vst [vmem:[#allocation3_spill] sm:$0xff] %v5305_v9  ;;  %v2575_v34 = vpop.f32.mrb[38].mxu0  ;;  %v2416_v19 = vpop.f32.mrb[103].mxu1 }
 0x220   :  { %v5308_v20 = vadd.f32 %v2575_v34, %v4921_v49  ;;  %v2577_v22 = vpop.f32.mrb[39].mxu0 }
 0x224   :  { %v5310_v5 = vpop.f32.mrb[104].mxu1 }
 0x225   :  { %5723 = vst [vmem:[#allocation4_spill] sm:$0xff] %v5310_v5  ;;  %v2580_v38 = vpop.f32.mrb[40].mxu0  ;;  %v2421_v25 = vpop.f32.mrb[105].mxu1 }
 0x226   :  { %v5313_v39 = vadd.f32 %v2580_v38, %v4932_v56  ;;  %v2582_v58 = vpop.f32.mrb[41].mxu0  ;;  %v5315_v47 = vpop.f32.mrb[106].mxu1 }
 0x227   :  { %5724 = vst [vmem:[#allocation5_spill] sm:$0xff] %v5315_v47  ;;  %v2583_v45 = vpop.f32.mrb[42].mxu0  ;;  %v2424_v28 = vpop.f32.mrb[107].mxu1 }
 0x228   :  { %v5318_v59 = vadd.f32 %v2583_v45, %v4937_v61  ;;  %v2585_v19 = vpop.f32.mrb[43].mxu0 }
 0x22c   :  { %v5320_v9 = vpop.f32.mrb[108].mxu1 }
 0x22d   :  { %5725 = vst [vmem:[#allocation6_spill] sm:$0xff] %v5320_v9  ;;  %v2588_v49 = vpop.f32.mrb[44].mxu0  ;;  %v2429_v34 = vpop.f32.mrb[109].mxu1 }
 0x22e   :  { %v5323_v22 = vadd.f32 %v2588_v49, %v4948_v4  ;;  %v2590_v25 = vpop.f32.mrb[45].mxu0  ;;  %v5325_v5 = vpop.f32.mrb[110].mxu1 }
 0x22f   :  { %5726 = vst [vmem:[#allocation7_spill] sm:$0xff] %v5325_v5  ;;  %v2591_v56 = vpop.f32.mrb[46].mxu0  ;;  %v2432_v38 = vpop.f32.mrb[111].mxu1 }
 0x230   :  { %v5328_v58 = vadd.f32 %v2591_v56, %v4953_v8  ;;  %v2593_v28 = vpop.f32.mrb[47].mxu0 }
 0x234   :  { %v5330_v47 = vpop.f32.mrb[112].mxu1 }
 0x235   :  { %5727 = vst [vmem:[#allocation8_spill] sm:$0xff] %v5330_v47  ;;  %v2596_v61 = vpop.f32.mrb[48].mxu0  ;;  %v2437_v45 = vpop.f32.mrb[113].mxu1 }
 0x236   :  { %v5333_v19 = vadd.f32 %v2596_v61, %v4964_v15  ;;  %v2598_v34 = vpop.f32.mrb[49].mxu0  ;;  %v5335_v9 = vpop.f32.mrb[114].mxu1 }
 0x237   :  { %5728 = vst [vmem:[#allocation9_spill] sm:$0xff] %v5335_v9  ;;  %v2599_v4 = vpop.f32.mrb[50].mxu0  ;;  %v2440_v49 = vpop.f32.mrb[115].mxu1 }
 0x238   :  { %v5338_v25 = vadd.f32 %v2599_v4, %v4969_v18  ;;  %v2601_v38 = vpop.f32.mrb[51].mxu0 }
 0x23c   :  { %v5340_v5 = vpop.f32.mrb[116].mxu1 }
 0x23d   :  { %5729 = vst [vmem:[#allocation10_spill] sm:$0xff] %v5340_v5  ;;  %v2604_v8 = vpop.f32.mrb[52].mxu0  ;;  %v2445_v56 = vpop.f32.mrb[117].mxu1 }
 0x23e   :  { %v5343_v28 = vadd.f32 %v2604_v8, %v4981_v24  ;;  %v2606_v45 = vpop.f32.mrb[53].mxu0  ;;  %v5345_v47 = vpop.f32.mrb[118].mxu1 }
 0x23f   :  { %5730 = vst [vmem:[#allocation11_spill] sm:$0xff] %v5345_v47  ;;  %v2607_v15 = vpop.f32.mrb[54].mxu0  ;;  %v2448_v61 = vpop.f32.mrb[119].mxu1 }
 0x240   :  { %v5348_v34 = vadd.f32 %v2607_v15, %v4986_v27  ;;  %v2609_v49 = vpop.f32.mrb[55].mxu0 }
 0x244   :  { %v5350_v9 = vpop.f32.mrb[120].mxu1 }
 0x245   :  { %5731 = vst [vmem:[#allocation12_spill] sm:$0xff] %v5350_v9  ;;  %v2612_v18 = vpop.f32.mrb[56].mxu0  ;;  %v2453_v4 = vpop.f32.mrb[121].mxu1 }
 0x246   :  { %v5353_v38 = vadd.f32 %v2612_v18, %v4999_v36  ;;  %v2614_v56 = vpop.f32.mrb[57].mxu0  ;;  %v5355_v5 = vpop.f32.mrb[122].mxu1 }
 0x247   :  { %5732 = vst [vmem:[#allocation13_spill] sm:$0xff] %v5355_v5  ;;  %v2615_v24 = vpop.f32.mrb[58].mxu0  ;;  %v2456_v8 = vpop.f32.mrb[123].mxu1 }
 0x248   :  { %v5358_v45 = vadd.f32 %v2615_v24, %v5004_v41  ;;  %v2617_v61 = vpop.f32.mrb[59].mxu0 }
 0x24c   :  { %v5360_v47 = vpop.f32.mrb[124].mxu1 }
 0x24d   :  { %5733 = vst [vmem:[#allocation14_spill] sm:$0xff] %v5360_v47  ;;  %v2620_v27 = vpop.f32.mrb[60].mxu0  ;;  %v2461_v15 = vpop.f32.mrb[125].mxu1 }
 0x24e   :  { %v5363_v49 = vadd.f32 %v2620_v27, %v5017_v50  ;;  %v2622_v4 = vpop.f32.mrb[61].mxu0  ;;  %v5365_v9 = vpop.f32.mrb[126].mxu1 }
 0x24f   :  { %5734 = vst [vmem:[#allocation15_spill] sm:$0xff] %v5365_v9  ;;  %v2623_v36 = vpop.f32.mrb[62].mxu0  ;;  %v2464_v18 = vpop.f32.mrb[127].mxu1 }
 0x250   :  { %v5368_v56 = vadd.f32 %v2623_v36, %v5022_v54  ;;  %v2625_v8 = vpop.f32.mrb[63].mxu0 }
 0x254   :  { %v3482_v5 = vpop.f32.mrb[128].mxu1 }
 0x255   :  { %v2628_v41 = vpop.f32.mrb[64].mxu0  ;;  %v5371_v24 = vadd.f32 %v5203_v12, %v3482_v5  ;;  %v2789_v61 = vpop.f32.mrb[129].mxu1 }
 0x256   :  { %v5374_v15 = vadd.f32 %v2628_v41, %v5035_v1  ;;  %v2630_v50 = vpop.f32.mrb[65].mxu0  ;;  %v5377_v27 = vadd.f32 %v5183_v37, %v2789_v61  ;;  %v3483_v4 = vpop.f32.mrb[130].mxu1 }
 0x257   :  { %v2631_v9 = vpop.f32.mrb[66].mxu0  ;;  %v5380_v18 = vadd.f32 %v5215_v30, %v3483_v4  ;;  %v2792_v54 = vpop.f32.mrb[131].mxu1 }
 0x258   :  { %v5383_v36 = vadd.f32 %v2631_v9, %v5040_v7  ;;  %v2633_v8 = vpop.f32.mrb[67].mxu0  ;;  %v5386_v12 = vadd.f32 %v5195_v62, %v2792_v54 }
 0x25c   :  { %v3486_v5 = vpop.f32.mrb[132].mxu1 }
 0x25d   :  { %v2636_v1 = vpop.f32.mrb[68].mxu0  ;;  %v5389_v41 = vadd.f32 %v5243_v35, %v3486_v5  ;;  %v2805_v37 = vpop.f32.mrb[133].mxu1 }
 0x25e   :  { %v5392_v61 = vadd.f32 %v2636_v1, %v5053_v16  ;;  %v2638_v50 = vpop.f32.mrb[69].mxu0  ;;  %v5395_v30 = vadd.f32 %v5223_v44, %v2805_v37  ;;  %v3487_v4 = vpop.f32.mrb[134].mxu1 }
 0x25f   :  { %v2639_v7 = vpop.f32.mrb[70].mxu0  ;;  %v5398_v9 = vadd.f32 %v5255_v40, %v3487_v4  ;;  %v2808_v62 = vpop.f32.mrb[135].mxu1 }
 0x260   :  { %v5401_v54 = vadd.f32 %v2639_v7, %v5058_v21  ;;  %v2641_v8 = vpop.f32.mrb[71].mxu0  ;;  %v5404_v35 = vadd.f32 %v5235_v32, %v2808_v62 }
 0x264   :  { %v3490_v5 = vpop.f32.mrb[136].mxu1 }
 0x265   :  { %v2644_v16 = vpop.f32.mrb[72].mxu0  ;;  %v5407_v1 = vadd.f32 %v5273_v17, %v3490_v5  ;;  %v2821_v44 = vpop.f32.mrb[137].mxu1 }
 0x266   :  { %v5410_v37 = vadd.f32 %v2644_v16, %v5071_v29  ;;  %v2646_v50 = vpop.f32.mrb[73].mxu0  ;;  %v5413_v40 = vadd.f32 %v5263_v43, %v2821_v44  ;;  %v3491_v4 = vpop.f32.mrb[138].mxu1 }
 0x267   :  { %v2647_v7 = vpop.f32.mrb[74].mxu0  ;;  %v5418_v32 = vadd.f32 %v5276_v51, %v3491_v4  ;;  %v2824_v62 = vpop.f32.mrb[139].mxu1 }
 0x268   :  { %v5423_v8 = vadd.f32 %v2647_v7, %v5076_v33  ;;  %v2649_v29 = vpop.f32.mrb[75].mxu0  ;;  %v5426_v5 = vadd.f32 %v5269_v63, %v2824_v62 }
 0x26a   :  { %5735 = vst [vmem:[#allocation16_spill] sm:$0xff] %v5423_v8 }
 0x26c   :  { %v3494_v44 = vpop.f32.mrb[140].mxu1 }
 0x26d   :  { %v2652_v51 = vpop.f32.mrb[76].mxu0  ;;  %v5433_v50 = vadd.f32 %v5285_v10, %v3494_v44  ;;  %v2837_v4 = vpop.f32.mrb[141].mxu1 }
 0x26e   :  { %v5436_v17 = vadd.f32 %v2652_v51, %v5089_v46  ;;  %v2654_v33 = vpop.f32.mrb[77].mxu0  ;;  %v5439_v7 = vadd.f32 %v5279_v31, %v2837_v4  ;;  %v3495_v63 = vpop.f32.mrb[142].mxu1 }
 0x26f   :  { %v2655_v29 = vpop.f32.mrb[78].mxu0  ;;  %v5444_v16 = vadd.f32 %v5288_v13, %v3495_v63  ;;  %v2840_v43 = vpop.f32.mrb[143].mxu1 }
 0x270   :  { %v5449_v44 = vadd.f32 %v2655_v29, %v5094_v53  ;;  %v2657_v46 = vpop.f32.mrb[79].mxu0  ;;  %v5452_v51 = vadd.f32 %v5282_v57, %v2840_v43 }
 0x274   :  { %v3498_v33 = vpop.f32.mrb[144].mxu1 }
 0x275   :  { %v2660_v13 = vpop.f32.mrb[80].mxu0  ;;  %v2862_v63 = vadd.f32 %v5303_v60, %v3498_v33  ;;  %v2853_v62 = vpop.f32.mrb[145].mxu1 }
 0x276   :  { %v5460_v10 = vadd.f32 %v2660_v13, %v5107_v3  ;;  %v2662_v53 = vpop.f32.mrb[81].mxu0  ;;  %v2854_v29 = vadd.f32 %v5293_v2, %v2853_v62  ;;  %v3499_v46 = vpop.f32.mrb[146].mxu1 }
 0x277   :  { %v2663_v57 = vpop.f32.mrb[82].mxu0  ;;  %v2865_v43 = vadd.f32 %v5308_v20, %v3499_v46  ;;  %v2856_v21 = vpop.f32.mrb[147].mxu1 }
 0x278   :  { %v5465_v31 = vadd.f32 %v2663_v57, %v5112_v11  ;;  %v2665_v4 = vpop.f32.mrb[83].mxu0  ;;  %v2857_v47 = vadd.f32 %v5298_v26, %v2856_v21 }
 0x27c   :  { %v3502_v8 = vpop.f32.mrb[148].mxu1 }
 0x27d   :  { %v2668_v60 = vpop.f32.mrb[84].mxu0  ;;  %v2878_v33 = vadd.f32 %v5323_v22, %v3502_v8  ;;  %v2869_v3 = vpop.f32.mrb[149].mxu1 }
 0x27e   :  { %v5470_v13 = vadd.f32 %v2668_v60, %v5125_v23  ;;  %v2670_v2 = vpop.f32.mrb[85].mxu0  ;;  %v2870_v62 = vadd.f32 %v5313_v39, %v2869_v3  ;;  %v3503_v53 = vpop.f32.mrb[150].mxu1 }
 0x27f   :  { %v2671_v20 = vpop.f32.mrb[86].mxu0  ;;  %v2881_v46 = vadd.f32 %v5328_v58, %v3503_v53  ;;  %v2872_v11 = vpop.f32.mrb[151].mxu1 }
 0x280   :  { %v5475_v4 = vadd.f32 %v2671_v20, %v5130_v0  ;;  %v2673_v26 = vpop.f32.mrb[87].mxu0  ;;  %v2873_v21 = vadd.f32 %v5318_v59, %v2872_v11  ;;  %v5487_v59 = vld [vmem:[%s5719_s2] ss:$0 sm:$0xff] }
 0x284   :  { %v3506_v57 = vpop.f32.mrb[152].mxu1 }
 0x285   :  { %v2676_v22 = vpop.f32.mrb[88].mxu0  ;;  %v2894_v8 = vadd.f32 %v5343_v28, %v3506_v57  ;;  %v2885_v23 = vpop.f32.mrb[153].mxu1 }
 0x286   :  { %v5480_v60 = vadd.f32 %v2676_v22, %v5143_v42  ;;  %v2678_v39 = vpop.f32.mrb[89].mxu0  ;;  %v2886_v3 = vadd.f32 %v5333_v19, %v2885_v23  ;;  %v3507_v2 = vpop.f32.mrb[154].mxu1  ;;  %v5736_v19 = vmax.f32 %v5371_v24, %v5407_v1 }
 0x287   :  { %v3062_v58 = vmax.f32 %v2862_v63, %v2894_v8  ;;  %v2679_v53 = vpop.f32.mrb[90].mxu0  ;;  %v2897_v0 = vadd.f32 %v5348_v34, %v3507_v2  ;;  %v2888_v20 = vpop.f32.mrb[155].mxu1  ;;  %v5737_v34 = vmax.f32 %v5377_v27, %v5413_v40 }
 0x288   :  { %v3060_v11 = vmax.f32 %v2854_v29, %v2886_v3  ;;  %v5490_v28 = vadd.f32 %v2679_v53, %v5148_v52  ;;  %v2681_v42 = vpop.f32.mrb[91].mxu0  ;;  %v2889_v26 = vadd.f32 %v5338_v25, %v2888_v20  ;;  %v5738_v29 = vmax.f32 %v5380_v18, %v5418_v32 }
 0x289   :  { %v3078_v63 = vmax.f32 %v5736_v19, %v3062_v58  ;;  %v3063_v57 = vmax.f32 %v2865_v43, %v2897_v0  ;;  %v5739_v25 = vmax.f32 %v5386_v12, %v5426_v5 }
 0x28a   :  { %v3076_v22 = vmax.f32 %v5737_v34, %v3060_v11  ;;  %v3061_v8 = vmax.f32 %v2857_v47, %v2889_v26  ;;  %v5740_v11 = vmax.f32 %v5389_v41, %v5433_v50 }
 0x28b   :  { %v3101_v23 = vadd.f32 %v5487_v59, %v3078_v63  ;;  %v3079_v52 = vmax.f32 %v5738_v29, %v3063_v57 }
 0x28c   :  { %v3099_v39 = vadd.f32 %v5487_v59, %v3076_v22  ;;  %v3077_v3 = vmax.f32 %v5739_v25, %v3061_v8  ;;  %v3510_v24 = vpop.f32.mrb[156].mxu1  ;;  %v5744_v25 = vld [vmem:[#allocation2_spill] sm:$0xff] }
 0x28d   :  { %3117 = vst.msk [vmem:[%s5720_s3 + $0x10] sm:$0xff] %vm1791_vm0, %v3101_v23  ;;  %v3102_v47 = vadd.f32 %v5487_v59, %v3079_v52  ;;  %v2684_v27 = vpop.f32.mrb[92].mxu0  ;;  %v2910_v1 = vadd.f32 %v5363_v49, %v3510_v24  ;;  %v2901_v40 = vpop.f32.mrb[157].mxu1 }
 0x28e   :  { %3115 = vst.msk [vmem:[%s5720_s3] sm:$0xff] %vm1791_vm0, %v3099_v39  ;;  %v3100_v18 = vadd.f32 %v5487_v59, %v3077_v3  ;;  %v5519_v12 = vadd.f32 %v2684_v27, %v5161_v6  ;;  %v2686_v32 = vpop.f32.mrb[93].mxu0  ;;  %v2902_v5 = vadd.f32 %v5353_v38, %v2901_v40  ;;  %v3511_v43 = vpop.f32.mrb[158].mxu1 }
 0x28f   :  { %3118 = vst.msk [vmem:[%s5720_s3 + $0x18] sm:$0xff] %vm1791_vm0, %v3102_v47  ;;  %v3066_v49 = vmax.f32 %v2878_v33, %v2910_v1  ;;  %v2687_v2 = vpop.f32.mrb[94].mxu0  ;;  %v2913_v58 = vadd.f32 %v5368_v56, %v3511_v43  ;;  %v2904_v53 = vpop.f32.mrb[159].mxu1  ;;  %v5741_v56 = vmax.f32 %v5395_v30, %v5439_v7 }
 0x290   :  { %3116 = vst.msk [vmem:[%s5720_s3 + $0x8] sm:$0xff] %vm1791_vm0, %v3100_v18  ;;  %v3064_v6 = vmax.f32 %v2870_v62, %v2902_v5  ;;  %v5532_v0 = vadd.f32 %v2687_v2, %v5166_v14  ;;  %v2689_v38 = vpop.f32.mrb[95].mxu0  ;;  %v2905_v20 = vadd.f32 %v5358_v45, %v2904_v53  ;;  %v5742_v62 = vmax.f32 %v5398_v9, %v5444_v16  ;;  %v5746_v5 = vld [vmem:[#allocation16_spill] sm:$0xff] }
 0x291   :  { %v3082_v33 = vmax.f32 %v5740_v11, %v3066_v49  ;;  %v3067_v42 = vmax.f32 %v2881_v46, %v2913_v58  ;;  %v5743_v45 = vmax.f32 %v5404_v35, %v5452_v51 }
 0x292   :  { %v3080_v26 = vmax.f32 %v5741_v56, %v3064_v6  ;;  %v3065_v19 = vmax.f32 %v2873_v21, %v2905_v20  ;;  %v5748_v56 = vld [vmem:[#allocation5_spill] sm:$0xff] }
 0x293   :  { %v3105_v63 = vadd.f32 %v5487_v59, %v3082_v33  ;;  %v3083_v14 = vmax.f32 %v5742_v62, %v3067_v42 }
 0x294   :  { %v3103_v57 = vadd.f32 %v5487_v59, %v3080_v26  ;;  %v3081_v34 = vmax.f32 %v5743_v45, %v3065_v19  ;;  %v3514_v41 = vpop.f32.mrb[160].mxu1 }
 0x295   :  { %3121 = vst.msk [vmem:[%s5720_s3 + $0x30] sm:$0xff] %vm1791_vm0, %v3105_v63  ;;  %v3106_v30 = vadd.f32 %v5487_v59, %v3083_v14  ;;  %v2692_v50 = vpop.f32.mrb[96].mxu0  ;;  %v5555_v7 = vadd.f32 %v5392_v61, %v3514_v41  ;;  %v2917_v9 = vpop.f32.mrb[161].mxu1 }
 0x296   :  { %3119 = vst.msk [vmem:[%s5720_s3 + $0x20] sm:$0xff] %vm1791_vm0, %v3103_v57  ;;  %v3104_v35 = vadd.f32 %v5487_v59, %v3081_v34  ;;  %v5563_v16 = vadd.f32 %v2692_v50, %v5290_v48  ;;  %v2694_v51 = vpop.f32.mrb[97].mxu0  ;;  %v5566_v46 = vadd.f32 %v5374_v15, %v2917_v9  ;;  %v3515_v21 = vpop.f32.mrb[162].mxu1  ;;  %v5749_v34 = vld [vmem:[#allocation6_spill] sm:$0xff] }
 0x297   :  { %3122 = vst.msk [vmem:[%s5720_s3 + $0x38] sm:$0xff] %vm1791_vm0, %v3106_v30  ;;  %v2695_v61 = vpop.f32.mrb[98].mxu0  ;;  %v5573_v22 = vadd.f32 %v5401_v54, %v3515_v21  ;;  %v2920_v8 = vpop.f32.mrb[163].mxu1 }
 0x298   :  { %3120 = vst.msk [vmem:[%s5720_s3 + $0x28] sm:$0xff] %vm1791_vm0, %v3104_v35  ;;  %v5580_v48 = vadd.f32 %v2695_v61, %v5295_v55  ;;  %v2697_v15 = vpop.f32.mrb[99].mxu0  ;;  %v5583_v23 = vadd.f32 %v5383_v36, %v2920_v8  ;;  %v5745_v36 = vld [vmem:[#allocation3_spill] sm:$0xff] }
 0x299   :  { %v5750_v61 = vld [vmem:[#allocation7_spill] sm:$0xff] }
 0x29c   :  { %v3518_v29 = vpop.f32.mrb[164].mxu1 }
 0x29d   :  { %v2700_v52 = vpop.f32.mrb[100].mxu0  ;;  %v5586_v39 = vadd.f32 %v5436_v17, %v3518_v29  ;;  %v2933_v54 = vpop.f32.mrb[165].mxu1 }
 0x29e   :  { %v3626_v3 = vadd.f32 %v2700_v52, %v5744_v25  ;;  %v2702_v24 = vpop.f32.mrb[101].mxu0  ;;  %v5590_v47 = vadd.f32 %v5410_v37, %v2933_v54  ;;  %v3519_v27 = vpop.f32.mrb[166].mxu1  ;;  %v5747_v37 = vld [vmem:[#allocation4_spill] sm:$0xff] }
 0x29f   :  { %v2703_v1 = vpop.f32.mrb[102].mxu0  ;;  %v5593_v55 = vadd.f32 %v5449_v44, %v3519_v27  ;;  %v2936_v40 = vpop.f32.mrb[167].mxu1  ;;  %v5751_v27 = vld [vmem:[#allocation8_spill] sm:$0xff] }
 0x2a0   :  { %v3627_v18 = vadd.f32 %v2703_v1, %v5745_v36  ;;  %v2705_v32 = vpop.f32.mrb[103].mxu0  ;;  %v5597_v43 = vadd.f32 %v5746_v5, %v2936_v40 }
 0x2a4   :  { %v3522_v17 = vpop.f32.mrb[168].mxu1 }
 0x2a5   :  { %v2708_v49 = vpop.f32.mrb[104].mxu0  ;;  %v5600_v2 = vadd.f32 %v5470_v13, %v3522_v17  ;;  %v2949_v58 = vpop.f32.mrb[169].mxu1 }
 0x2a6   :  { %v3628_v53 = vadd.f32 %v2708_v49, %v5747_v37  ;;  %v2710_v6 = vpop.f32.mrb[105].mxu0  ;;  %v5604_v38 = vadd.f32 %v5460_v10, %v2949_v58  ;;  %v3523_v44 = vpop.f32.mrb[170].mxu1  ;;  %v5752_v49 = vld [vmem:[#allocation9_spill] sm:$0xff] }
 0x2a7   :  { %v3054_v20 = vmax.f32 %v5555_v7, %v5600_v2  ;;  %v2711_v11 = vpop.f32.mrb[106].mxu0  ;;  %v5609_v33 = vadd.f32 %v5475_v4, %v3523_v44  ;;  %v2952_v42 = vpop.f32.mrb[171].mxu1 }
 0x2a8   :  { %v3052_v13 = vmax.f32 %v5566_v46, %v5604_v38  ;;  %v3629_v26 = vadd.f32 %v2711_v11, %v5748_v56  ;;  %v2713_v19 = vpop.f32.mrb[107].mxu0  ;;  %v5615_v63 = vadd.f32 %v5465_v31, %v2952_v42 }
 0x2a9   :  { %v3055_v10 = vmax.f32 %v5573_v22, %v5609_v33 }
 0x2aa   :  { %v3053_v62 = vmax.f32 %v5583_v23, %v5615_v63 }
 0x2ac   :  { %v3526_v14 = vpop.f32.mrb[172].mxu1 }
 0x2ad   :  { %v2716_v57 = vpop.f32.mrb[108].mxu0  ;;  %v5622_v4 = vadd.f32 %v5519_v12, %v3526_v14  ;;  %v2965_v45 = vpop.f32.mrb[173].mxu1 }
 0x2ae   :  { %v3630_v41 = vadd.f32 %v2716_v57, %v5749_v34  ;;  %v2718_v30 = vpop.f32.mrb[109].mxu0  ;;  %v5626_v50 = vadd.f32 %v5480_v60, %v2965_v45  ;;  %v3527_v31 = vpop.f32.mrb[174].mxu1 }
 0x2af   :  { %v3058_v9 = vmax.f32 %v5586_v39, %v5622_v4  ;;  %v2719_v35 = vpop.f32.mrb[110].mxu0  ;;  %v5631_v51 = vadd.f32 %v5532_v0, %v3527_v31  ;;  %v2968_v21 = vpop.f32.mrb[175].mxu1  ;;  %v5754_v31 = vld [vmem:[#allocation11_spill] sm:$0xff] }
 0x2b0   :  { %v3056_v12 = vmax.f32 %v5590_v47, %v5626_v50  ;;  %v3631_v8 = vadd.f32 %v2719_v35, %v5750_v61  ;;  %v2721_v15 = vpop.f32.mrb[111].mxu0  ;;  %v5637_v29 = vadd.f32 %v5490_v28, %v2968_v21 }
 0x2b1   :  { %v3059_v60 = vmax.f32 %v5593_v55, %v5631_v51 }
 0x2b2   :  { %v3057_v52 = vmax.f32 %v5597_v43, %v5637_v29 }
 0x2b4   :  { %v3530_v54 = vpop.f32.mrb[176].mxu1 }
 0x2b5   :  { %v2724_v25 = vpop.f32.mrb[112].mxu0  ;;  %v2990_v0 = vadd.f32 %v3626_v3, %v3530_v54  ;;  %v2981_v24 = vpop.f32.mrb[177].mxu1  ;;  %v5753_v3 = vld [vmem:[#allocation10_spill] sm:$0xff] }
 0x2b6   :  { %v3632_v1 = vadd.f32 %v2724_v25, %v5751_v27  ;;  %v2726_v40 = vpop.f32.mrb[113].mxu0  ;;  %v2982_v36 = vadd.f32 %v5563_v16, %v2981_v24  ;;  %v3531_v32 = vpop.f32.mrb[178].mxu1  ;;  %v5755_v25 = vld [vmem:[#allocation12_spill] sm:$0xff] }
 0x2b7   :  { %v2727_v5 = vpop.f32.mrb[114].mxu0  ;;  %v2993_v17 = vadd.f32 %v3627_v18, %v3531_v32  ;;  %v2984_v28 = vpop.f32.mrb[179].mxu1 }
 0x2b8   :  { %v3633_v58 = vadd.f32 %v2727_v5, %v5752_v49  ;;  %v2729_v37 = vpop.f32.mrb[115].mxu0  ;;  %v2985_v6 = vadd.f32 %v5580_v48, %v2984_v28 }
 0x2bc   :  { %v3534_v44 = vpop.f32.mrb[180].mxu1 }
 0x2bd   :  { %v2732_v11 = vpop.f32.mrb[116].mxu0  ;;  %v3006_v42 = vadd.f32 %v3630_v41, %v3534_v44  ;;  %v2997_v56 = vpop.f32.mrb[181].mxu1 }
 0x2be   :  { %v3634_v19 = vadd.f32 %v2732_v11, %v5753_v3  ;;  %v2734_v14 = vpop.f32.mrb[117].mxu0  ;;  %v2998_v57 = vadd.f32 %v3628_v53, %v2997_v56  ;;  %v3535_v45 = vpop.f32.mrb[182].mxu1 }
 0x2bf   :  { %v2735_v34 = vpop.f32.mrb[118].mxu0  ;;  %v3009_v16 = vadd.f32 %v3631_v8, %v3535_v45  ;;  %v3000_v30 = vpop.f32.mrb[183].mxu1  ;;  %v5756_v8 = vld [vmem:[#allocation13_spill] sm:$0xff]  ;;  %v5758_v14 = vld [vmem:[#allocation15_spill] sm:$0xff] }
 0x2c0   :  { %v3635_v18 = vadd.f32 %v2735_v34, %v5754_v31  ;;  %v2737_v35 = vpop.f32.mrb[119].mxu0  ;;  %v3001_v21 = vadd.f32 %v3629_v26, %v3000_v30 }
 0x2c4   :  { %v3538_v61 = vpop.f32.mrb[184].mxu1 }
 0x2c5   :  { %v2740_v15 = vpop.f32.mrb[120].mxu0  ;;  %v3022_v54 = vadd.f32 %v3634_v19, %v3538_v61  ;;  %v3013_v48 = vpop.f32.mrb[185].mxu1 }
 0x2c6   :  { %v3636_v24 = vadd.f32 %v2740_v15, %v5755_v25  ;;  %v2742_v41 = vpop.f32.mrb[121].mxu0  ;;  %v3014_v27 = vadd.f32 %v3632_v1, %v3013_v48  ;;  %v3539_v40 = vpop.f32.mrb[186].mxu1 }
 0x2c7   :  { %v3070_v32 = vmax.f32 %v2990_v0, %v3022_v54  ;;  %v2743_v5 = vpop.f32.mrb[122].mxu0  ;;  %v3025_v53 = vadd.f32 %v3635_v18, %v3539_v40  ;;  %v3016_v28 = vpop.f32.mrb[187].mxu1 }
 0x2c8   :  { %v3068_v49 = vmax.f32 %v2982_v36, %v3014_v27  ;;  %v3637_v37 = vadd.f32 %v2743_v5, %v5756_v8  ;;  %v2745_v44 = vpop.f32.mrb[123].mxu0  ;;  %v3017_v11 = vadd.f32 %v3633_v58, %v3016_v28 }
 0x2c9   :  { %v3086_v26 = vmax.f32 %v3054_v20, %v3070_v32  ;;  %v3071_v56 = vmax.f32 %v2993_v17, %v3025_v53  ;;  %v5757_v20 = vld [vmem:[#allocation14_spill] sm:$0xff] }
 0x2ca   :  { %v3084_v3 = vmax.f32 %v3052_v13, %v3068_v49  ;;  %v3069_v1 = vmax.f32 %v2985_v6, %v3017_v11 }
 0x2cb   :  { %v3109_v0 = vadd.f32 %v5487_v59, %v3086_v26  ;;  %v3087_v36 = vmax.f32 %v3055_v10, %v3071_v56 }
 0x2cc   :  { %v3107_v19 = vadd.f32 %v5487_v59, %v3084_v3  ;;  %v3085_v58 = vmax.f32 %v3053_v62, %v3069_v1  ;;  %v3542_v7 = vpop.f32.mrb[188].mxu1 }
 0x2cd   :  { %3125 = vst.msk [vmem:[%s5720_s3 + $0x50] sm:$0xff] %vm1791_vm0, %v3109_v0  ;;  %v3110_v46 = vadd.f32 %v5487_v59, %v3087_v36  ;;  %v2748_v2 = vpop.f32.mrb[124].mxu0  ;;  %v3029_v38 = vpop.f32.mrb[189].mxu1 }
 0x2ce   :  { %3123 = vst.msk [vmem:[%s5720_s3 + $0x40] sm:$0xff] %vm1791_vm0, %v3107_v19  ;;  %v3108_v22 = vadd.f32 %v5487_v59, %v3085_v58  ;;  %v3638_v23 = vadd.f32 %v2748_v2, %v5757_v20  ;;  %v2750_v33 = vpop.f32.mrb[125].mxu0  ;;  %v3030_v13 = vadd.f32 %v3636_v24, %v3029_v38  ;;  %v3543_v63 = vpop.f32.mrb[190].mxu1 }
 0x2cf   :  { %3126 = vst.msk [vmem:[%s5720_s3 + $0x58] sm:$0xff] %vm1791_vm0, %v3110_v46  ;;  %v2751_v10 = vpop.f32.mrb[126].mxu0  ;;  %v3032_v62 = vpop.f32.mrb[191].mxu1 }
 0x2d0   :  { %3124 = vst.msk [vmem:[%s5720_s3 + $0x48] sm:$0xff] %vm1791_vm0, %v3108_v22  ;;  %v3038_v17 = vadd.f32 %v3638_v23, %v3542_v7  ;;  %v3072_v6 = vmax.f32 %v2998_v57, %v3030_v13  ;;  %v3639_v45 = vadd.f32 %v2751_v10, %v5758_v14  ;;  %v2753_v34 = vpop.f32.mrb[127].mxu0  ;;  %v3033_v30 = vadd.f32 %v3637_v37, %v3032_v62 }
 0x2d2   :  { %v3074_v31 = vmax.f32 %v3006_v42, %v3038_v17  ;;  %v3088_v18 = vmax.f32 %v3056_v12, %v3072_v6  ;;  %v3041_v35 = vadd.f32 %v3639_v45, %v3543_v63  ;;  %v3073_v61 = vmax.f32 %v3001_v21, %v3033_v30 }
 0x2d4   :  { %v3090_v15 = vmax.f32 %v3058_v9, %v3074_v31  ;;  %v3111_v54 = vadd.f32 %v5487_v59, %v3088_v18  ;;  %v3075_v48 = vmax.f32 %v3009_v16, %v3041_v35  ;;  %v3089_v57 = vmax.f32 %v3057_v52, %v3073_v61 }
 0x2d6   :  { %v3113_v25 = vadd.f32 %v5487_v59, %v3090_v15  ;;  %3127 = vst.msk [vmem:[%s5720_s3 + $0x60] sm:$0xff] %vm1791_vm0, %v3111_v54  ;;  %v3091_v47 = vmax.f32 %v3059_v60, %v3075_v48  ;;  %v3112_v39 = vadd.f32 %v5487_v59, %v3089_v57 }
 0x2d8   :  { %3129 = vst.msk [vmem:[%s5720_s3 + $0x70] sm:$0xff] %vm1791_vm0, %v3113_v25  ;;  %v3114_v43 = vadd.f32 %v5487_v59, %v3091_v47  ;;  %3128 = vst.msk [vmem:[%s5720_s3 + $0x68] sm:$0xff] %vm1791_vm0, %v3112_v39 }
 0x2da   :  { %3130 = vst.msk [vmem:[%s5720_s3 + $0x78] sm:$0xff] %vm1791_vm0, %v3114_v43 }

// kernel: tudui_forward.6
= control target key start
LH: loop header
LB: loop body
LE: loop exit
PB: predicated region body
PF: predicated region fallthrough
CT: control target
= control target key end

     0   :  { %vm759_vm0 = vcmask 261120   ;;  %vm1195_vm1 = vcmask 523264   ;;  %s2100_s1 = inlined_call_operand.vmem [shape: bf16[800,64], index: 1, kind: input, shape index: {}]   ;;  %s2101_s0 = inlined_call_operand.vmem [shape: bf16[2,4,16,800], index: 0, kind: input, shape index: {}]   ;;  %s2102_s2 = inlined_call_operand.vmem [shape: f32[1,64], index: 2, kind: input, shape index: {}]   ;;  %s2103_s3 = inlined_call_operand.vmem [shape: f32[2,16,64], index: 3, kind: output, shape index: {}]  }
   0x1   :  { %v1557_v0 = vld [vmem:[%s2100_s1 + $0x40] sm:$0xff]   ;;  %v1561_v4 = vld [vmem:[%s2100_s1 + $0x48] sm:$0xff]   ;;  %v1565_v8 = vld [vmem:[%s2100_s1 + $0x50] sm:$0xff]  }
   0x2   :  { %v1558_v1 = vld [vmem:[%s2100_s1 + $0xc0] sm:$0xff]   ;;  %1319 = vmatprep.subr.bf16.mxu0 %v1557_v0  ;;  %v1562_v5 = vld [vmem:[%s2100_s1 + $0xc8] sm:$0xff]   ;;  %v1566_v9 = vld [vmem:[%s2100_s1 + $0xd0] sm:$0xff]  }
   0x3   :  { %v1559_v2 = vld [vmem:[%s2100_s1] sm:$0xff]   ;;  %1383 = vmatprep.subr.bf16.mxu1 %v1558_v1  ;;  %v1563_v6 = vld [vmem:[%s2100_s1 + $0x8] sm:$0xff]   ;;  %v1567_v10 = vld [vmem:[%s2100_s1 + $0x10] sm:$0xff]  }
   0x4   :  { %v1560_v3 = vld [vmem:[%s2100_s1 + $0x80] sm:$0xff]   ;;  %1320 = vmatpush3.bf16.msra.mxu0 %v1559_v2  ;;  %v1564_v7 = vld [vmem:[%s2100_s1 + $0x88] sm:$0xff]   ;;  %v1568_v11 = vld [vmem:[%s2100_s1 + $0x90] sm:$0xff]  }
   0x5   :  { %1384 = vmatpush3.bf16.msra.mxu1 %v1560_v3  ;;  %1321 = vmatprep.subr.bf16.mxu0 %v1561_v4  ;;  %v1569_v12 = vld [vmem:[%s2100_s1 + $0x58] sm:$0xff]   ;;  %v1573_v16 = vld [vmem:[%s2100_s1 + $0x60] sm:$0xff]   ;;  %v1577_v20 = vld [vmem:[%s2100_s1 + $0x68] sm:$0xff]  }
   0x6   :  { %1385 = vmatprep.subr.bf16.mxu1 %v1562_v5  ;;  %v1570_v13 = vld [vmem:[%s2100_s1 + $0xd8] sm:$0xff]   ;;  %v1574_v17 = vld [vmem:[%s2100_s1 + $0xe0] sm:$0xff]   ;;  %v1578_v21 = vld [vmem:[%s2100_s1 + $0xe8] sm:$0xff]  }
   0x7   :  { %v1571_v14 = vld [vmem:[%s2100_s1 + $0x18] sm:$0xff]   ;;  %v1575_v18 = vld [vmem:[%s2100_s1 + $0x20] sm:$0xff]   ;;  %v1579_v22 = vld [vmem:[%s2100_s1 + $0x28] sm:$0xff]  }
   0x8   :  { %1322 = vmatpush3.bf16.msra.mxu0 %v1563_v6  ;;  %v1572_v15 = vld [vmem:[%s2100_s1 + $0x98] sm:$0xff]   ;;  %v1576_v19 = vld [vmem:[%s2100_s1 + $0xa0] sm:$0xff]   ;;  %v1580_v23 = vld [vmem:[%s2100_s1 + $0xa8] sm:$0xff]  }
   0x9   :  { %1386 = vmatpush3.bf16.msra.mxu1 %v1564_v7  ;;  %1323 = vmatprep.subr.bf16.mxu0 %v1565_v8  ;;  %v1581_v24 = vld [vmem:[%s2100_s1 + $0x70] sm:$0xff]   ;;  %v1585_v28 = vld [vmem:[%s2100_s1 + $0x78] sm:$0xff]   ;;  %v1591_v33 = vld [vmem:[%s2101_s0 + $0x4] ss:$28 sps:$4 sm:$0xff]  }
   0xa   :  { %1387 = vmatprep.subr.bf16.mxu1 %v1566_v9  ;;  %v1582_v25 = vld [vmem:[%s2100_s1 + $0xf0] sm:$0xff]   ;;  %v1586_v29 = vld [vmem:[%s2100_s1 + $0xf8] sm:$0xff]   ;;  %v1592_v34 = vld [vmem:[%s2101_s0 + $0x8] ss:$28 sps:$4 sm:$0xff]   ;;  %816 = vmatprep.mubr.bf16.mxu0 %v1591_v33 }
   0xb   :  { %v1583_v26 = vld [vmem:[%s2100_s1 + $0x30] sm:$0xff]   ;;  %v1587_v30 = vld [vmem:[%s2100_s1 + $0x38] sm:$0xff]   ;;  %v1594_v35 = vld [vmem:[%s2101_s0 + $0xc] ss:$28 sps:$4 sm:$0xff]  }
   0xc   :  { %1324 = vmatpush3.bf16.msra.mxu0 %v1567_v10  ;;  %v1584_v27 = vld [vmem:[%s2100_s1 + $0xb0] sm:$0xff]   ;;  %v1588_v31 = vld [vmem:[%s2100_s1 + $0xb8] sm:$0xff]   ;;  %v1595_v36 = vld [vmem:[%s2100_s1 + $0x140] sm:$0xff]   ;;  %913 = vmatprep.mubr.bf16.mxu1 %v1594_v35 }
   0xd   :  { %1388 = vmatpush3.bf16.msra.mxu1 %v1568_v11  ;;  %1325 = vmatprep.subr.bf16.mxu0 %v1569_v12  ;;  %v1589_v32 = vld [vmem:[%s2101_s0] ss:$28 sps:$4 sm:$0xff]   ;;  %v1601_v40 = vld [vmem:[%s2101_s0 + $0x38] ss:$28 sps:$4 sm:$0xff]   ;;  %v1603_v42 = vld [vmem:[%s2100_s1 + $0x148] sm:$0xff]  }
   0xe   :  { %1389 = vmatprep.subr.bf16.mxu1 %v1570_v13  ;;  %v1596_v37 = vld [vmem:[%s2100_s1 + $0x100] sm:$0xff]   ;;  %v1597_v38 = vld [vmem:[%s2101_s0 + $0x3c] ss:$28 sps:$4 sm:$0xff]   ;;  %v1604_v43 = vld [vmem:[%s2100_s1 + $0x108] sm:$0xff]  }
   0xf   :  { %v1599_v39 = vld [vmem:[%s2101_s0 + $0x44] ss:$28 sps:$4 sm:$0xff]   ;;  %v1605_v44 = vld [vmem:[%s2101_s0 + $0x74] ss:$28 sps:$4 sm:$0xff]   ;;  %v1607_v45 = vld [vmem:[%s2101_s0 + $0x7c] ss:$28 sps:$4 sm:$0xff]  }
  0x10   :  { %1326 = vmatpush3.bf16.msra.mxu0 %v1571_v14  ;;  %v1602_v41 = vld [vmem:[%s2101_s0 + $0x40] ss:$28 sps:$4 sm:$0xff]   ;;  %v1611_v46 = vld [vmem:[%s2100_s1 + $0x150] sm:$0xff]   ;;  %v1613_v50 = vld [vmem:[%s2101_s0 + $0xac] ss:$28 sps:$4 sm:$0xff]  }
  0x11   :  { %1390 = vmatpush3.bf16.msra.mxu1 %v1572_v15  ;;  %1327 = vmatprep.subr.bf16.mxu0 %v1573_v16  ;;  %v1612_v47 = vld [vmem:[%s2100_s1 + $0x110] sm:$0xff]   ;;  %v1619_v52 = vld [vmem:[%s2100_s1 + $0x158] sm:$0xff]   ;;  %v1627_v54 = vld [vmem:[%s2100_s1 + $0x160] sm:$0xff]  }
  0x12   :  { %1391 = vmatprep.subr.bf16.mxu1 %v1574_v17  ;;  %v1609_v48 = vld [vmem:[%s2101_s0 + $0x70] ss:$28 sps:$4 sm:$0xff]   ;;  %v1610_v49 = vld [vmem:[%s2101_s0 + $0x78] ss:$28 sps:$4 sm:$0xff]   ;;  %v1628_v55 = vld [vmem:[%s2100_s1 + $0x120] sm:$0xff]  }
  0x13   :  { %v1615_v51 = vld [vmem:[%s2101_s0 + $0xb4] ss:$28 sps:$4 sm:$0xff]   ;;  %v1620_v53 = vld [vmem:[%s2100_s1 + $0x118] sm:$0xff]   ;;  %v1617_v56 = vld [vmem:[%s2101_s0 + $0xa8] ss:$28 sps:$4 sm:$0xff]  }
  0x14   :  { %1328 = vmatpush3.bf16.msra.mxu0 %v1575_v18  ;;  %v1618_v57 = vld [vmem:[%s2101_s0 + $0xb0] ss:$28 sps:$4 sm:$0xff]   ;;  %v1621_v58 = vld [vmem:[%s2101_s0 + $0xe4] ss:$28 sps:$4 sm:$0xff]   ;;  %v1629_v2 = vld [vmem:[%s2101_s0 + $0x11c] ss:$28 sps:$4 sm:$0xff]  }
  0x15   :  { %1392 = vmatpush3.bf16.msra.mxu1 %v1576_v19  ;;  %1329 = vmatprep.subr.bf16.mxu0 %v1577_v20  ;;  %v1623_v59 = vld [vmem:[%s2101_s0 + $0xec] ss:$28 sps:$4 sm:$0xff]   ;;  %v1625_v62 = vld [vmem:[%s2101_s0 + $0xe0] ss:$28 sps:$4 sm:$0xff]   ;;  %v1643_v0 = vld [vmem:[%s2100_s1 + $0x170] sm:$0xff]  }
  0x16   :  { %1393 = vmatprep.subr.bf16.mxu1 %v1578_v21  ;;  %v1635_v60 = vld [vmem:[%s2100_s1 + $0x168] sm:$0xff]   ;;  %v1644_v1 = vld [vmem:[%s2100_s1 + $0x130] sm:$0xff]   ;;  %v1631_v3 = vld [vmem:[%s2101_s0 + $0x124] ss:$28 sps:$4 sm:$0xff]  }
  0x17   :  { %v1636_v61 = vld [vmem:[%s2100_s1 + $0x128] sm:$0xff]   ;;  %v1651_v4 = vld [vmem:[%s2100_s1 + $0x178] sm:$0xff]   ;;  %v1659_v8 = vld [vmem:[%s2100_s1 + $0x180] sm:$0xff]  }
  0x18   :  { %1330 = vmatpush3.bf16.msra.mxu0 %v1579_v22  ;;  %v1626_v63 = vld [vmem:[%s2101_s0 + $0xe8] ss:$28 sps:$4 sm:$0xff]   ;;  %v1652_v5 = vld [vmem:[%s2100_s1 + $0x138] sm:$0xff]   ;;  %v1637_v9 = vld [vmem:[%s2101_s0 + $0x154] ss:$28 sps:$4 sm:$0xff]  }
  0x19   :  { %1394 = vmatpush3.bf16.msra.mxu1 %v1580_v23  ;;  %1331 = vmatprep.subr.bf16.mxu0 %v1581_v24  ;;  %v1633_v6 = vld [vmem:[%s2101_s0 + $0x118] ss:$28 sps:$4 sm:$0xff]   ;;  %v1634_v7 = vld [vmem:[%s2101_s0 + $0x120] ss:$28 sps:$4 sm:$0xff]   ;;  %v1641_v11 = vld [vmem:[%s2101_s0 + $0x150] ss:$28 sps:$4 sm:$0xff]  }
  0x1a   :  { %1395 = vmatprep.subr.bf16.mxu1 %v1582_v25  ;;  %v1639_v10 = vld [vmem:[%s2101_s0 + $0x15c] ss:$28 sps:$4 sm:$0xff]   ;;  %v1645_v13 = vld [vmem:[%s2101_s0 + $0x18c] ss:$28 sps:$4 sm:$0xff]   ;;  %v1647_v14 = vld [vmem:[%s2101_s0 + $0x194] ss:$28 sps:$4 sm:$0xff]  }
  0x1b   :  { %v1642_v12 = vld [vmem:[%s2101_s0 + $0x158] ss:$28 sps:$4 sm:$0xff]   ;;  %v1649_v15 = vld [vmem:[%s2101_s0 + $0x188] ss:$28 sps:$4 sm:$0xff]   ;;  %v1650_v16 = vld [vmem:[%s2101_s0 + $0x190] ss:$28 sps:$4 sm:$0xff]  }
  0x1c   :  { %1332 = vmatpush3.bf16.msra.mxu0 %v1583_v26  ;;  %v1655_v17 = vld [vmem:[%s2101_s0 + $0x14] ss:$28 sps:$4 sm:$0xff]   ;;  %v1658_v18 = vld [vmem:[%s2101_s0 + $0x164] ss:$28 sps:$4 sm:$0xff]   ;;  %v1660_v21 = vld [vmem:[%s2101_s0 + $0x4c] ss:$28 sps:$4 sm:$0xff]  }
  0x1d   :  { %1396 = vmatpush3.bf16.msra.mxu1 %v1584_v27  ;;  %1333 = vmatprep.subr.bf16.mxu0 %v1585_v28  ;;  %v1653_v19 = vld [vmem:[%s2101_s0 + $0x10] ss:$28 sps:$4 sm:$0xff]   ;;  %v1656_v20 = vld [vmem:[%s2101_s0 + $0x160] ss:$28 sps:$4 sm:$0xff]   ;;  %v1664_v24 = vld [vmem:[%s2101_s0 + $0x48] ss:$28 sps:$4 sm:$0xff]  }
  0x1e   :  { %1397 = vmatprep.subr.bf16.mxu1 %v1586_v29  ;;  %v1662_v22 = vld [vmem:[%s2101_s0 + $0x19c] ss:$28 sps:$4 sm:$0xff]   ;;  %v1666_v23 = vld [vmem:[%s2100_s1 + $0x188] sm:$0xff]   ;;  %v1667_v26 = vld [vmem:[%s2101_s0 + $0x84] ss:$28 sps:$4 sm:$0xff]  }
  0x1f   :  { %v1665_v25 = vld [vmem:[%s2101_s0 + $0x198] ss:$28 sps:$4 sm:$0xff]   ;;  %v1670_v28 = vld [vmem:[%s2101_s0 + $0x80] ss:$28 sps:$4 sm:$0xff]   ;;  %v1671_v29 = vld [vmem:[%s2101_s0 + $0x50] ss:$28 sps:$4 sm:$0xff]  }
  0x20   :  { %1334 = vmatpush3.bf16.msra.mxu0 %v1587_v30  ;;  %v1669_v27 = vld [vmem:[%s2101_s0 + $0x18] ss:$28 sps:$4 sm:$0xff]   ;;  %v1676_v33 = vld [vmem:[%s2101_s0 + $0xc0] ss:$28 sps:$4 sm:$0xff]  }
  0x21   :  { %1398 = vmatpush3.bf16.msra.mxu1 %v1588_v31  ;;  %1447 = vmatprep.subr.bf16.mxu0 %v1595_v36  ;;  %v1672_v30 = vld [vmem:[%s2101_s0 + $0xbc] ss:$28 sps:$4 sm:$0xff]   ;;  %v1674_v31 = vld [vmem:[%s2101_s0 + $0x88] ss:$28 sps:$4 sm:$0xff]  }
  0x22   :  { %1541 = vmatprep.subr.bf16.mxu1 %v1595_v36  ;;  %v1679_v35 = vld [vmem:[%s2101_s0 + $0xf8] ss:$28 sps:$4 sm:$0xff]   ;;  %v1680_v36 = vld [vmem:[%s2101_s0 + $0xf0] ss:$28 sps:$4 sm:$0xff]  }
  0x23   :  { %817 = vmatmul.mubr.bf16.vlgmr.msra.gmra.mrb[0].mxu0 %v1589_v32  ;;  %v1675_v32 = vld [vmem:[%s2101_s0 + $0xb8] ss:$28 sps:$4 sm:$0xff]  }
  0x24   :  { %914 = vmatmul.mubr.bf16.vlgmr.msra.gmra.mrb[0].mxu1 %v1592_v34  ;;  %1448 = vmatpush3.bf16.msra.mxu0 %v1596_v37  ;;  %v1677_v34 = vld [vmem:[%s2101_s0 + $0xf4] ss:$28 sps:$4 sm:$0xff]  }
  0x25   :  { %1549 = vmatpush3.bf16.msra.mxu1 %v1596_v37  ;;  %824 = vmatprep.mubr.bf16.mxu0 %v1597_v38  ;;  %v1681_v37 = vld [vmem:[%s2101_s0 + $0x130] ss:$28 sps:$4 sm:$0xff]  }
  0x26   :  { %921 = vmatprep.mubr.bf16.mxu1 %v1599_v39  ;;  %1449 = vmatprep.subr.bf16.mxu0 %v1603_v42  ;;  %v1682_v38 = vld [vmem:[%s2101_s0 + $0x12c] ss:$28 sps:$4 sm:$0xff]  }
  0x27   :  { %1542 = vmatprep.subr.bf16.mxu1 %v1603_v42  ;;  %v1684_v39 = vld [vmem:[%s2101_s0 + $0x168] ss:$28 sps:$4 sm:$0xff]  }
  0x28   :  { %1450 = vmatpush3.bf16.msra.mxu0 %v1604_v43 }
  0x29   :  { %1550 = vmatpush3.bf16.msra.mxu1 %v1604_v43  ;;  %1451 = vmatprep.subr.bf16.mxu0 %v1611_v46 }
  0x2a   :  { %1543 = vmatprep.subr.bf16.mxu1 %v1611_v46 }
  0x2b   :  { %825 = vmatmul.mubr.bf16.gmra.mrb[4].mxu0 %v1601_v40  ;;  %v1685_v40 = vld [vmem:[%s2101_s0 + $0x128] ss:$28 sps:$4 sm:$0xff]  }
  0x2c   :  { %922 = vmatmul.mubr.bf16.gmra.mrb[4].mxu1 %v1602_v41  ;;  %832 = vmatprep.mubr.bf16.mxu0 %v1605_v44  ;;  %v1686_v41 = vld [vmem:[%s2101_s0 + $0x1a0] ss:$28 sps:$4 sm:$0xff]  }
  0x2d   :  { %929 = vmatprep.mubr.bf16.mxu1 %v1607_v45  ;;  %1452 = vmatpush3.bf16.msra.mxu0 %v1612_v47 }
  0x2e   :  { %1551 = vmatpush3.bf16.msra.mxu1 %v1612_v47  ;;  %1453 = vmatprep.subr.bf16.mxu0 %v1619_v52 }
  0x2f   :  { %1544 = vmatprep.subr.bf16.mxu1 %v1619_v52 }
  0x31   :  { %1454 = vmatpush3.bf16.msra.mxu0 %v1620_v53 }
  0x32   :  { %1552 = vmatpush3.bf16.msra.mxu1 %v1620_v53  ;;  %1455 = vmatprep.subr.bf16.mxu0 %v1627_v54 }
  0x33   :  { %833 = vmatmul.mubr.bf16.gmra.mrb[8].mxu0 %v1609_v48  ;;  %1545 = vmatprep.subr.bf16.mxu1 %v1627_v54 }
  0x34   :  { %930 = vmatmul.mubr.bf16.gmra.mrb[8].mxu1 %v1610_v49  ;;  %840 = vmatprep.mubr.bf16.mxu0 %v1613_v50 }
  0x35   :  { %937 = vmatprep.mubr.bf16.mxu1 %v1615_v51  ;;  %1456 = vmatpush3.bf16.msra.mxu0 %v1628_v55 }
  0x36   :  { %1553 = vmatpush3.bf16.msra.mxu1 %v1628_v55  ;;  %1457 = vmatprep.subr.bf16.mxu0 %v1635_v60 }
  0x37   :  { %1546 = vmatprep.subr.bf16.mxu1 %v1635_v60 }
  0x39   :  { %1458 = vmatpush3.bf16.msra.mxu0 %v1636_v61 }
  0x3a   :  { %1554 = vmatpush3.bf16.msra.mxu1 %v1636_v61  ;;  %1459 = vmatprep.subr.bf16.mxu0 %v1643_v0 }
  0x3b   :  { %841 = vmatmul.mubr.bf16.gmra.mrb[12].mxu0 %v1617_v56  ;;  %1547 = vmatprep.subr.bf16.mxu1 %v1643_v0 }
  0x3c   :  { %938 = vmatmul.mubr.bf16.gmra.mrb[12].mxu1 %v1618_v57  ;;  %848 = vmatprep.mubr.bf16.mxu0 %v1621_v58 }
  0x3d   :  { %945 = vmatprep.mubr.bf16.mxu1 %v1623_v59  ;;  %1460 = vmatpush3.bf16.msra.mxu0 %v1644_v1 }
  0x3e   :  { %1555 = vmatpush3.bf16.msra.mxu1 %v1644_v1  ;;  %1461 = vmatprep.subr.bf16.mxu0 %v1651_v4 }
  0x3f   :  { %1548 = vmatprep.subr.bf16.mxu1 %v1651_v4 }
  0x41   :  { %1462 = vmatpush3.bf16.msra.mxu0 %v1652_v5 }
  0x42   :  { %1556 = vmatpush3.bf16.msra.mxu1 %v1652_v5 }
  0x43   :  { %849 = vmatmul.mubr.bf16.gmra.mrb[16].mxu0 %v1625_v62  ;;  %1521 = vmatprep.subr.bf16.mxu1 %v1659_v8 }
  0x44   :  { %946 = vmatmul.mubr.bf16.gmra.mrb[16].mxu1 %v1626_v63  ;;  %856 = vmatprep.mubr.bf16.mxu0 %v1629_v2 }
  0x45   :  { %953 = vmatprep.mubr.bf16.mxu1 %v1631_v3 }
  0x4b   :  { %857 = vmatmul.mubr.bf16.gmra.mrb[20].mxu0 %v1633_v6 }
  0x4c   :  { %954 = vmatmul.mubr.bf16.gmra.mrb[20].mxu1 %v1634_v7  ;;  %864 = vmatprep.mubr.bf16.mxu0 %v1637_v9 }
  0x4d   :  { %961 = vmatprep.mubr.bf16.mxu1 %v1639_v10 }
  0x53   :  { %865 = vmatmul.mubr.bf16.gmra.mrb[24].mxu0 %v1641_v11 }
  0x54   :  { %962 = vmatmul.mubr.bf16.gmra.mrb[24].mxu1 %v1642_v12  ;;  %872 = vmatprep.mubr.bf16.mxu0 %v1645_v13 }
  0x55   :  { %969 = vmatprep.mubr.bf16.mxu1 %v1647_v14 }
  0x5b   :  { %873 = vmatmul.mubr.bf16.gmra.mrb[28].mxu0 %v1649_v15 }
  0x5c   :  { %970 = vmatmul.mubr.bf16.gmra.mrb[28].mxu1 %v1650_v16  ;;  %1010 = vmatprep.mubr.bf16.mxu0 %v1655_v17 }
  0x5d   :  { %1058 = vmatprep.mubr.bf16.mxu1 %v1658_v18 }
  0x63   :  { %1011 = vmatmul.mubr.bf16.vlgmr.msra.gmra.mrb[32].mxu0 %v1653_v19 }
  0x64   :  { %1059 = vmatmul.mubr.bf16.vlgmr.msra.gmra.mrb[32].mxu1 %v1656_v20  ;;  %1018 = vmatprep.mubr.bf16.mxu0 %v1660_v21 }
  0x65   :  { %1522 = vmatpush3.bf16.msra.mxu1 %v1659_v8  ;;  %1066 = vmatprep.mubr.bf16.mxu1 %v1662_v22 }
  0x66   :  { %1523 = vmatprep.subr.bf16.mxu1 %v1666_v23 }
  0x69   :  { %1524 = vmatpush3.bf16.msra.mxu1 %v1666_v23 }
  0x6b   :  { %1019 = vmatmul.mubr.bf16.gmra.mrb[36].mxu0 %v1664_v24 }
  0x6c   :  { %1067 = vmatmul.mubr.bf16.gmra.mrb[36].mxu1 %v1665_v25  ;;  %1026 = vmatprep.mubr.bf16.mxu0 %v1667_v26 }
  0x6d   :  { %1525 = vmatprep.mubr.msk.bf16.mxu1 %vm759_vm0, %v1669_v27 }
  0x73   :  { %1027 = vmatmul.mubr.bf16.gmra.mrb[40].mxu0 %v1670_v28 }
  0x74   :  { %1526 = vmatmul.mubr.msk.bf16.vlgmr.msra.gmra.mrb[40].mxu1 %vm759_vm0, %v1671_v29  ;;  %1034 = vmatprep.mubr.bf16.mxu0 %v1672_v30 }
  0x75   :  { %1529 = vmatprep.mubr.msk.bf16.mxu1 %vm759_vm0, %v1674_v31 }
  0x7b   :  { %1035 = vmatmul.mubr.bf16.gmra.mrb[44].mxu0 %v1675_v32 }
  0x7c   :  { %1530 = vmatmul.mubr.msk.bf16.gmra.mrb[44].mxu1 %vm759_vm0, %v1676_v33  ;;  %1042 = vmatprep.mubr.bf16.mxu0 %v1677_v34 }
  0x7d   :  { %1533 = vmatprep.mubr.msk.bf16.mxu1 %vm759_vm0, %v1679_v35 }
  0x83   :  { %1043 = vmatmul.mubr.bf16.gmra.mrb[48].mxu0 %v1680_v36 }
  0x84   :  { %1534 = vmatmul.mubr.msk.bf16.gmra.mrb[48].mxu1 %vm759_vm0, %v1681_v37  ;;  %1050 = vmatprep.mubr.bf16.mxu0 %v1682_v38 }
  0x85   :  { %1537 = vmatprep.mubr.msk.bf16.mxu1 %vm759_vm0, %v1684_v39 }
  0x8b   :  { %1051 = vmatmul.mubr.bf16.gmra.mrb[52].mxu0 %v1685_v40 }
  0x8c   :  { %1538 = vmatmul.mubr.msk.bf16.gmra.mrb[52].mxu1 %vm759_vm0, %v1686_v41 }
  0xf6   :  { %v1335_v42 = vpop.f32.mrb[0].mxu0 }
  0xf7   :  { %v1399_v43 = vpop.f32.mrb[0].mxu1  ;;  %v1336_v44 = vpop.f32.mrb[1].mxu0 }
  0xf8   :  { %v1337_v45 = vadd.f32 %v1336_v44, %v1335_v42  ;;  %v1400_v46 = vpop.f32.mrb[1].mxu1  ;;  %v1338_v47 = vpop.f32.mrb[2].mxu0 }
  0xf9   :  { %v1401_v48 = vadd.f32 %v1400_v46, %v1399_v43  ;;  %v1402_v49 = vpop.f32.mrb[2].mxu1  ;;  %v1339_v50 = vpop.f32.mrb[3].mxu0 }
  0xfa   :  { %v1340_v51 = vadd.f32 %v1339_v50, %v1338_v47  ;;  %v1403_v52 = vpop.f32.mrb[3].mxu1 }
  0xfb   :  { %v2033_v53 = vadd.f32 %v1401_v48, %v1337_v45  ;;  %v1404_v54 = vadd.f32 %v1403_v52, %v1402_v49 }
  0xfd   :  { %v2035_v55 = vadd.f32 %v1404_v54, %v1340_v51 }
  0xfe   :  { %v1341_v56 = vpop.f32.mrb[4].mxu0 }
  0xff   :  { %v1405_v57 = vpop.f32.mrb[4].mxu1  ;;  %v1342_v58 = vpop.f32.mrb[5].mxu0 }
 0x100   :  { %v1343_v59 = vadd.f32 %v1342_v58, %v1341_v56  ;;  %v1406_v60 = vpop.f32.mrb[5].mxu1  ;;  %v1344_v61 = vpop.f32.mrb[6].mxu0 }
 0x101   :  { %v1407_v62 = vadd.f32 %v1406_v60, %v1405_v57  ;;  %v1408_v63 = vpop.f32.mrb[6].mxu1  ;;  %v1345_v0 = vpop.f32.mrb[7].mxu0 }
 0x102   :  { %v1346_v1 = vadd.f32 %v1345_v0, %v1344_v61  ;;  %v1409_v2 = vpop.f32.mrb[7].mxu1 }
 0x103   :  { %v2037_v3 = vadd.f32 %v1407_v62, %v1343_v59  ;;  %v1410_v4 = vadd.f32 %v1409_v2, %v1408_v63 }
 0x105   :  { %v2039_v5 = vadd.f32 %v1410_v4, %v1346_v1 }
 0x106   :  { %v1347_v6 = vpop.f32.mrb[8].mxu0 }
 0x107   :  { %v1411_v7 = vpop.f32.mrb[8].mxu1  ;;  %v1348_v8 = vpop.f32.mrb[9].mxu0 }
 0x108   :  { %v1349_v9 = vadd.f32 %v1348_v8, %v1347_v6  ;;  %v1412_v10 = vpop.f32.mrb[9].mxu1  ;;  %v1350_v11 = vpop.f32.mrb[10].mxu0 }
 0x109   :  { %v1413_v12 = vadd.f32 %v1412_v10, %v1411_v7  ;;  %v1414_v13 = vpop.f32.mrb[10].mxu1  ;;  %v1351_v14 = vpop.f32.mrb[11].mxu0 }
 0x10a   :  { %v1352_v15 = vadd.f32 %v1351_v14, %v1350_v11  ;;  %v1415_v16 = vpop.f32.mrb[11].mxu1 }
 0x10b   :  { %v2041_v17 = vadd.f32 %v1413_v12, %v1349_v9  ;;  %v1416_v18 = vadd.f32 %v1415_v16, %v1414_v13 }
 0x10d   :  { %v2043_v19 = vadd.f32 %v1416_v18, %v1352_v15 }
 0x10e   :  { %v1353_v20 = vpop.f32.mrb[12].mxu0 }
 0x10f   :  { %v1417_v21 = vpop.f32.mrb[12].mxu1  ;;  %v1354_v22 = vpop.f32.mrb[13].mxu0 }
 0x110   :  { %v1355_v23 = vadd.f32 %v1354_v22, %v1353_v20  ;;  %v1418_v24 = vpop.f32.mrb[13].mxu1  ;;  %v1356_v25 = vpop.f32.mrb[14].mxu0 }
 0x111   :  { %v1419_v26 = vadd.f32 %v1418_v24, %v1417_v21  ;;  %v1420_v27 = vpop.f32.mrb[14].mxu1  ;;  %v1357_v28 = vpop.f32.mrb[15].mxu0 }
 0x112   :  { %v1358_v29 = vadd.f32 %v1357_v28, %v1356_v25  ;;  %v1421_v30 = vpop.f32.mrb[15].mxu1 }
 0x113   :  { %v2045_v31 = vadd.f32 %v1419_v26, %v1355_v23  ;;  %v1422_v32 = vadd.f32 %v1421_v30, %v1420_v27 }
 0x115   :  { %v2047_v33 = vadd.f32 %v1422_v32, %v1358_v29 }
 0x116   :  { %v1359_v34 = vpop.f32.mrb[16].mxu0 }
 0x117   :  { %v1423_v35 = vpop.f32.mrb[16].mxu1  ;;  %v1360_v36 = vpop.f32.mrb[17].mxu0 }
 0x118   :  { %v1361_v37 = vadd.f32 %v1360_v36, %v1359_v34  ;;  %v1424_v38 = vpop.f32.mrb[17].mxu1  ;;  %v1362_v39 = vpop.f32.mrb[18].mxu0 }
 0x119   :  { %v1425_v40 = vadd.f32 %v1424_v38, %v1423_v35  ;;  %v1426_v41 = vpop.f32.mrb[18].mxu1  ;;  %v1363_v42 = vpop.f32.mrb[19].mxu0 }
 0x11a   :  { %v1364_v43 = vadd.f32 %v1363_v42, %v1362_v39  ;;  %v1427_v44 = vpop.f32.mrb[19].mxu1 }
 0x11b   :  { %v2049_v45 = vadd.f32 %v1425_v40, %v1361_v37  ;;  %v1428_v46 = vadd.f32 %v1427_v44, %v1426_v41 }
 0x11d   :  { %v2051_v47 = vadd.f32 %v1428_v46, %v1364_v43 }
 0x11e   :  { %v1365_v48 = vpop.f32.mrb[20].mxu0 }
 0x11f   :  { %v1429_v49 = vpop.f32.mrb[20].mxu1  ;;  %v1366_v50 = vpop.f32.mrb[21].mxu0 }
 0x120   :  { %v1367_v51 = vadd.f32 %v1366_v50, %v1365_v48  ;;  %v1430_v52 = vpop.f32.mrb[21].mxu1  ;;  %v1368_v54 = vpop.f32.mrb[22].mxu0 }
 0x121   :  { %v1431_v56 = vadd.f32 %v1430_v52, %v1429_v49  ;;  %v1432_v57 = vpop.f32.mrb[22].mxu1  ;;  %v1369_v58 = vpop.f32.mrb[23].mxu0 }
 0x122   :  { %v1370_v59 = vadd.f32 %v1369_v58, %v1368_v54  ;;  %v1433_v60 = vpop.f32.mrb[23].mxu1 }
 0x123   :  { %v2053_v61 = vadd.f32 %v1431_v56, %v1367_v51  ;;  %v1434_v62 = vadd.f32 %v1433_v60, %v1432_v57 }
 0x125   :  { %v2055_v63 = vadd.f32 %v1434_v62, %v1370_v59 }
 0x126   :  { %v1371_v0 = vpop.f32.mrb[24].mxu0 }
 0x127   :  { %v1435_v1 = vpop.f32.mrb[24].mxu1  ;;  %v1372_v2 = vpop.f32.mrb[25].mxu0 }
 0x128   :  { %v1373_v4 = vadd.f32 %v1372_v2, %v1371_v0  ;;  %v1436_v6 = vpop.f32.mrb[25].mxu1  ;;  %v1374_v7 = vpop.f32.mrb[26].mxu0 }
 0x129   :  { %v1437_v8 = vadd.f32 %v1436_v6, %v1435_v1  ;;  %v1438_v9 = vpop.f32.mrb[26].mxu1  ;;  %v1375_v10 = vpop.f32.mrb[27].mxu0 }
 0x12a   :  { %v1376_v11 = vadd.f32 %v1375_v10, %v1374_v7  ;;  %v1439_v12 = vpop.f32.mrb[27].mxu1 }
 0x12b   :  { %v964_v13 = vadd.f32 %v1437_v8, %v1373_v4  ;;  %v1440_v14 = vadd.f32 %v1439_v12, %v1438_v9 }
 0x12d   :  { %v967_v15 = vadd.f32 %v1440_v14, %v1376_v11 }
 0x12e   :  { %v1377_v16 = vpop.f32.mrb[28].mxu0 }
 0x12f   :  { %v1441_v18 = vpop.f32.mrb[28].mxu1  ;;  %v1378_v20 = vpop.f32.mrb[29].mxu0 }
 0x130   :  { %v1379_v21 = vadd.f32 %v1378_v20, %v1377_v16  ;;  %v1442_v22 = vpop.f32.mrb[29].mxu1  ;;  %v1380_v23 = vpop.f32.mrb[30].mxu0 }
 0x131   :  { %v1443_v24 = vadd.f32 %v1442_v22, %v1441_v18  ;;  %v1444_v25 = vpop.f32.mrb[30].mxu1  ;;  %v1381_v26 = vpop.f32.mrb[31].mxu0 }
 0x132   :  { %v1382_v27 = vadd.f32 %v1381_v26, %v1380_v23  ;;  %v1445_v28 = vpop.f32.mrb[31].mxu1 }
 0x133   :  { %v972_v29 = vadd.f32 %v1443_v24, %v1379_v21  ;;  %v1446_v30 = vadd.f32 %v1445_v28, %v1444_v25 }
 0x135   :  { %v975_v32 = vadd.f32 %v1446_v30, %v1382_v27 }
 0x136   :  { %v1463_v34 = vpop.f32.mrb[32].mxu0 }
 0x137   :  { %v1499_v35 = vpop.f32.mrb[32].mxu1  ;;  %v1464_v36 = vpop.f32.mrb[33].mxu0 }
 0x138   :  { %v1465_v37 = vadd.f32 %v1464_v36, %v1463_v34  ;;  %v1500_v38 = vpop.f32.mrb[33].mxu1  ;;  %v1466_v39 = vpop.f32.mrb[34].mxu0 }
 0x139   :  { %v1501_v40 = vadd.f32 %v1500_v38, %v1499_v35  ;;  %v1502_v41 = vpop.f32.mrb[34].mxu1  ;;  %v1467_v42 = vpop.f32.mrb[35].mxu0 }
 0x13a   :  { %v1468_v43 = vadd.f32 %v1467_v42, %v1466_v39  ;;  %v1503_v44 = vpop.f32.mrb[35].mxu1  ;;  %v1013_v46 = vadd.f32 %v1465_v37, %v2033_v53 }
 0x13b   :  { %v1504_v48 = vadd.f32 %v1503_v44, %v1502_v41  ;;  %v2058_v49 = vadd.f32 %v1501_v40, %v964_v13  ;;  %v1318_v44 = vld [vmem:[%s2102_s2] ss:$0 sm:$0xff] }
 0x13c   :  { %v1016_v50 = vadd.f32 %v1468_v43, %v2035_v55 }
 0x13d   :  { %v2061_v51 = vadd.f32 %v1504_v48, %v967_v15 }
 0x13e   :  { %v1469_v52 = vpop.f32.mrb[36].mxu0 }
 0x13f   :  { %v1505_v54 = vpop.f32.mrb[36].mxu1  ;;  %v1470_v56 = vpop.f32.mrb[37].mxu0 }
 0x140   :  { %v1471_v57 = vadd.f32 %v1470_v56, %v1469_v52  ;;  %v1506_v58 = vpop.f32.mrb[37].mxu1  ;;  %v1472_v59 = vpop.f32.mrb[38].mxu0 }
 0x141   :  { %v1507_v60 = vadd.f32 %v1506_v58, %v1505_v54  ;;  %v1508_v62 = vpop.f32.mrb[38].mxu1  ;;  %v1473_v0 = vpop.f32.mrb[39].mxu0 }
 0x142   :  { %v1474_v1 = vadd.f32 %v1473_v0, %v1472_v59  ;;  %v1509_v2 = vpop.f32.mrb[39].mxu1  ;;  %v1021_v53 = vadd.f32 %v1471_v57, %v2037_v3 }
 0x143   :  { %v1510_v4 = vadd.f32 %v1509_v2, %v1508_v62  ;;  %v2064_v6 = vadd.f32 %v1507_v60, %v972_v29 }
 0x144   :  { %v1024_v55 = vadd.f32 %v1474_v1, %v2039_v5 }
 0x145   :  { %v2067_v7 = vadd.f32 %v1510_v4, %v975_v32 }
 0x146   :  { %v1475_v8 = vpop.f32.mrb[40].mxu0 }
 0x147   :  { %v1527_v9 = vpop.f32.mrb[40].mxu1  ;;  %v1476_v10 = vpop.f32.mrb[41].mxu0 }
 0x148   :  { %v1118_v11 = vadd.f32 %v1527_v9, %v1021_v53  ;;  %v1477_v12 = vadd.f32 %v1476_v10, %v1475_v8  ;;  %v1109_v13 = vpop.f32.mrb[41].mxu1  ;;  %v1478_v14 = vpop.f32.mrb[42].mxu0 }
 0x149   :  { %v1110_v15 = vadd.f32 %v1109_v13, %v1013_v46  ;;  %v1528_v16 = vpop.f32.mrb[42].mxu1  ;;  %v1479_v18 = vpop.f32.mrb[43].mxu0 }
 0x14a   :  { %v1121_v20 = vadd.f32 %v1528_v16, %v1024_v55  ;;  %v1480_v21 = vadd.f32 %v1479_v18, %v1478_v14  ;;  %v1112_v3 = vpop.f32.mrb[43].mxu1  ;;  %v1029_v22 = vadd.f32 %v1477_v12, %v2041_v17 }
 0x14b   :  { %v1172_v23 = vmax.f32 %v1110_v15, %v1118_v11  ;;  %v1113_v24 = vadd.f32 %v1112_v3, %v1016_v50 }
 0x14c   :  { %v1032_v5 = vadd.f32 %v1480_v21, %v2043_v19 }
 0x14d   :  { %v1173_v25 = vmax.f32 %v1113_v24, %v1121_v20 }
 0x14e   :  { %v1481_v26 = vpop.f32.mrb[44].mxu0 }
 0x14f   :  { %v1531_v27 = vpop.f32.mrb[44].mxu1  ;;  %v1482_v28 = vpop.f32.mrb[45].mxu0 }
 0x150   :  { %v1483_v29 = vadd.f32 %v1482_v28, %v1481_v26  ;;  %v1125_v30 = vpop.f32.mrb[45].mxu1  ;;  %v1484_v32 = vpop.f32.mrb[46].mxu0 }
 0x151   :  { %v1126_v34 = vadd.f32 %v1125_v30, %v1029_v22  ;;  %v1532_v35 = vpop.f32.mrb[46].mxu1  ;;  %v1485_v36 = vpop.f32.mrb[47].mxu0 }
 0x152   :  { %v1037_v37 = vadd.f32 %v1483_v29, %v2045_v31  ;;  %v1486_v38 = vadd.f32 %v1485_v36, %v1484_v32  ;;  %v1128_v39 = vpop.f32.mrb[47].mxu1 }
 0x153   :  { %v1129_v40 = vadd.f32 %v1128_v39, %v1032_v5 }
 0x154   :  { %v1134_v17 = vadd.f32 %v1531_v27, %v1037_v37  ;;  %v1040_v41 = vadd.f32 %v1486_v38, %v2047_v33 }
 0x156   :  { %v1176_v42 = vmax.f32 %v1126_v34, %v1134_v17  ;;  %v1137_v19 = vadd.f32 %v1532_v35, %v1040_v41  ;;  %v1487_v43 = vpop.f32.mrb[48].mxu0 }
 0x157   :  { %v1488_v46 = vpop.f32.mrb[49].mxu0  ;;  %v1535_v48 = vpop.f32.mrb[48].mxu1 }
 0x158   :  { %v1180_v50 = vmax.f32 %v1172_v23, %v1176_v42  ;;  %v1177_v52 = vmax.f32 %v1129_v40, %v1137_v19  ;;  %v1489_v54 = vadd.f32 %v1488_v46, %v1487_v43  ;;  %v1490_v56 = vpop.f32.mrb[50].mxu0  ;;  %v1141_v31 = vpop.f32.mrb[49].mxu1 }
 0x159   :  { %v1491_v57 = vpop.f32.mrb[51].mxu0  ;;  %v1536_v58 = vpop.f32.mrb[50].mxu1 }
 0x15a   :  { %v1191_v59 = vadd.f32 %v1318_v44, %v1180_v50  ;;  %v1181_v60 = vmax.f32 %v1173_v25, %v1177_v52  ;;  %v1492_v33 = vadd.f32 %v1491_v57, %v1490_v56  ;;  %v1045_v62 = vadd.f32 %v1489_v54, %v2049_v45  ;;  %v1144_v0 = vpop.f32.mrb[51].mxu1 }
 0x15c   :  { %1196 = vst.msk [vmem:[%s2103_s3] sm:$0xff] %vm1195_vm1, %v1191_v59  ;;  %v1192_v1 = vadd.f32 %v1318_v44, %v1181_v60  ;;  %v1142_v2 = vadd.f32 %v1141_v31, %v1045_v62  ;;  %v1048_v53 = vadd.f32 %v1492_v33, %v2051_v47 }
 0x15e   :  { %1197 = vst.msk [vmem:[%s2103_s3 + $0x8] sm:$0xff] %vm1195_vm1, %v1192_v1  ;;  %v1145_v4 = vadd.f32 %v1144_v0, %v1048_v53  ;;  %v1493_v55 = vpop.f32.mrb[52].mxu0 }
 0x15f   :  { %v1539_v8 = vpop.f32.mrb[52].mxu1  ;;  %v1494_v9 = vpop.f32.mrb[53].mxu0 }
 0x160   :  { %v1166_v45 = vadd.f32 %v1539_v8, %v2064_v6  ;;  %v1495_v10 = vadd.f32 %v1494_v9, %v1493_v55  ;;  %v1157_v11 = vpop.f32.mrb[53].mxu1  ;;  %v1496_v12 = vpop.f32.mrb[54].mxu0 }
 0x161   :  { %v1158_v13 = vadd.f32 %v1157_v11, %v2058_v49  ;;  %v1540_v14 = vpop.f32.mrb[54].mxu1  ;;  %v1497_v15 = vpop.f32.mrb[55].mxu0 }
 0x162   :  { %v1053_v47 = vadd.f32 %v1495_v10, %v2053_v61  ;;  %v1169_v16 = vadd.f32 %v1540_v14, %v2067_v7  ;;  %v1498_v18 = vadd.f32 %v1497_v15, %v1496_v12  ;;  %v1160_v20 = vpop.f32.mrb[55].mxu1 }
 0x163   :  { %v1178_v21 = vmax.f32 %v1158_v13, %v1166_v45  ;;  %v1161_v3 = vadd.f32 %v1160_v20, %v2061_v51 }
 0x164   :  { %v1150_v22 = vadd.f32 %v1535_v48, %v1053_v47  ;;  %v1056_v23 = vadd.f32 %v1498_v18, %v2055_v63 }
 0x165   :  { %v1179_v6 = vmax.f32 %v1161_v3, %v1169_v16 }
 0x166   :  { %v1174_v24 = vmax.f32 %v1142_v2, %v1150_v22  ;;  %v1153_v5 = vadd.f32 %v1536_v58, %v1056_v23 }
 0x168   :  { %v1182_v25 = vmax.f32 %v1174_v24, %v1178_v21  ;;  %v1175_v26 = vmax.f32 %v1145_v4, %v1153_v5 }
 0x16a   :  { %v1193_v49 = vadd.f32 %v1318_v44, %v1182_v25  ;;  %v1183_v27 = vmax.f32 %v1175_v26, %v1179_v6 }
 0x16c   :  { %1198 = vst.msk [vmem:[%s2103_s3 + $0x10] sm:$0xff] %vm1195_vm1, %v1193_v49  ;;  %v1194_v61 = vadd.f32 %v1318_v44, %v1183_v27 }
 0x16e   :  { %1199 = vst.msk [vmem:[%s2103_s3 + $0x18] sm:$0xff] %vm1195_vm1, %v1194_v61 }

// kernel: tudui_forward.7
= control target key start
LH: loop header
LB: loop body
LE: loop exit
PB: predicated region body
PF: predicated region fallthrough
CT: control target
= control target key end

     0   :  { %v163_v28 = vlaneseq  ;;  %v1132_v36 = vmov 1966171168   ;;  %s1404_s0 = inlined_call_operand.vmem [shape: bf16[2,1024], index: 0, kind: input, shape index: {}]   ;;  %s1405_s1 = inlined_call_operand.vmem [shape: bf16[1024,64], index: 1, kind: input, shape index: {}]   ;;  %s1406_s2 = inlined_call_operand.vmem [shape: f32[1,64], index: 2, kind: input, shape index: {}]   ;;  %s1407_s3 = inlined_call_operand.vmem [shape: bf16[64,128], index: 3, kind: input, shape index: {}]   ;;  %s1408_s4 = inlined_call_operand.vmem [shape: f32[1,128], index: 4, kind: input, shape index: {}]   ;;  %s1409_s5 = inlined_call_operand.hbm [shape: f32[2,128], index: 5, kind: output, shape index: {}]  }
   0x1   :  { %v1039_v0 = vld [vmem:[%s1405_s1 + $0x40] sm:$0xff]   ;;  %v1043_v4 = vld [vmem:[%s1405_s1 + $0x48] sm:$0xff]   ;;  %v1047_v8 = vld [vmem:[%s1405_s1 + $0x50] sm:$0xff]   ;;  %v161_v37 = vunpack.c.l.s4 %v1132_v36 }
   0x2   :  { %v1040_v1 = vld [vmem:[%s1405_s1 + $0xc0] sm:$0xff]   ;;  %930 = vmatprep.subr.bf16.mxu0 %v1039_v0  ;;  %v1044_v5 = vld [vmem:[%s1405_s1 + $0xc8] sm:$0xff]   ;;  %v1048_v9 = vld [vmem:[%s1405_s1 + $0xd0] sm:$0xff]   ;;  %v164_v33 = vshrl.u32 %v163_v28, 7 }
   0x3   :  { %v1041_v2 = vld [vmem:[%s1405_s1] sm:$0xff]   ;;  %952 = vmatprep.subr.bf16.mxu1 %v1040_v1  ;;  %v1045_v6 = vld [vmem:[%s1405_s1 + $0x8] sm:$0xff]   ;;  %v1049_v10 = vld [vmem:[%s1405_s1 + $0x10] sm:$0xff]   ;;  %v162_v40 = vunpack.c.0.s8 %v161_v37 }
   0x4   :  { %v1042_v3 = vld [vmem:[%s1405_s1 + $0x80] sm:$0xff]   ;;  %931 = vmatpush3.bf16.msra.mxu0 %v1041_v2  ;;  %v1046_v7 = vld [vmem:[%s1405_s1 + $0x88] sm:$0xff]   ;;  %v1050_v11 = vld [vmem:[%s1405_s1 + $0x90] sm:$0xff]  }
   0x5   :  { %953 = vmatpush3.bf16.msra.mxu1 %v1042_v3  ;;  %932 = vmatprep.subr.bf16.mxu0 %v1043_v4  ;;  %v1051_v12 = vld [vmem:[%s1405_s1 + $0x58] sm:$0xff]   ;;  %v1055_v16 = vld [vmem:[%s1405_s1 + $0x60] sm:$0xff]   ;;  %v1059_v20 = vld [vmem:[%s1405_s1 + $0x68] sm:$0xff]   ;;  %v1271_v41 = vsub.s32 %v162_v40, %v164_v33 }
   0x6   :  { %954 = vmatprep.subr.bf16.mxu1 %v1044_v5  ;;  %v1052_v13 = vld [vmem:[%s1405_s1 + $0xd8] sm:$0xff]   ;;  %v1056_v17 = vld [vmem:[%s1405_s1 + $0xe0] sm:$0xff]   ;;  %v1060_v21 = vld [vmem:[%s1405_s1 + $0xe8] sm:$0xff]  }
   0x7   :  { %v1053_v14 = vld [vmem:[%s1405_s1 + $0x18] sm:$0xff]   ;;  %v1057_v18 = vld [vmem:[%s1405_s1 + $0x20] sm:$0xff]   ;;  %v1061_v22 = vld [vmem:[%s1405_s1 + $0x28] sm:$0xff]  }
   0x8   :  { %933 = vmatpush3.bf16.msra.mxu0 %v1045_v6  ;;  %v1054_v15 = vld [vmem:[%s1405_s1 + $0x98] sm:$0xff]   ;;  %v1058_v19 = vld [vmem:[%s1405_s1 + $0xa0] sm:$0xff]   ;;  %v1062_v23 = vld [vmem:[%s1405_s1 + $0xa8] sm:$0xff]  }
   0x9   :  { %955 = vmatpush3.bf16.msra.mxu1 %v1046_v7  ;;  %934 = vmatprep.subr.bf16.mxu0 %v1047_v8  ;;  %v1063_v24 = vld [vmem:[%s1405_s1 + $0x70] sm:$0xff]   ;;  %v1067_v29 = vld [vmem:[%s1405_s1 + $0x78] sm:$0xff]   ;;  %v22_v34 = vld [vmem:[%s1404_s0] sm:$0xff] }
   0xa   :  { %956 = vmatprep.subr.bf16.mxu1 %v1048_v9  ;;  %v1064_v25 = vld [vmem:[%s1405_s1 + $0xf0] sm:$0xff]   ;;  %v1068_v30 = vld [vmem:[%s1405_s1 + $0xf8] sm:$0xff]   ;;  %v1072_v35 = vld [vmem:[%s1405_s1 + $0x140] sm:$0xff]   ;;  %v159_v39 = vcombine.high %v22_v34, %v22_v34  ;;  %v166_v42 = vrot.slane %v22_v34, %v1271_v41 }
   0xb   :  { %v1065_v26 = vld [vmem:[%s1405_s1 + $0x30] sm:$0xff]   ;;  %v1069_v31 = vld [vmem:[%s1405_s1 + $0x38] sm:$0xff]   ;;  %v1073_v38 = vld [vmem:[%s1405_s1 + $0x1c0] sm:$0xff]  }
   0xc   :  { %935 = vmatpush3.bf16.msra.mxu0 %v1049_v10  ;;  %v1066_v27 = vld [vmem:[%s1405_s1 + $0xb0] sm:$0xff]   ;;  %v1070_v32 = vld [vmem:[%s1405_s1 + $0xb8] sm:$0xff]   ;;  %v1275_v43 = vrot.slane %v159_v39, %v1271_v41  ;;  %v174_v44 = vcombine.high %v166_v42, %v166_v42  ;;  %v182_v45 = vrot.slane %v166_v42, %v1271_v41  ;;  %v1074_v47 = vld [vmem:[%s1405_s1 + $0x100] sm:$0xff]  }
   0xd   :  { %957 = vmatpush3.bf16.msra.mxu1 %v1050_v11  ;;  %936 = vmatprep.subr.bf16.mxu0 %v1051_v12  ;;  %v1075_v49 = vld [vmem:[%s1405_s1 + $0x180] sm:$0xff]   ;;  %v1076_v52 = vld [vmem:[%s1405_s1 + $0x148] sm:$0xff]   ;;  %v1080_v58 = vld [vmem:[%s1405_s1 + $0x150] sm:$0xff]  }
   0xe   :  { %958 = vmatprep.subr.bf16.mxu1 %v1052_v13  ;;  %v175_v46 = vcombine.high %v1275_v43, %v1275_v43  ;;  %v196_v48 = vrot.slane %v174_v44, %v1271_v41  ;;  %v204_v51 = vcombine.high %v182_v45, %v182_v45  ;;  %v1077_v54 = vld [vmem:[%s1405_s1 + $0x1c8] sm:$0xff]   ;;  %v1081_v59 = vld [vmem:[%s1405_s1 + $0x1d0] sm:$0xff]   ;;  %v1084_v62 = vld [vmem:[%s1405_s1 + $0x158] sm:$0xff]  }
   0xf   :  { %v1078_v55 = vld [vmem:[%s1405_s1 + $0x108] sm:$0xff]   ;;  %v1082_v60 = vld [vmem:[%s1405_s1 + $0x110] sm:$0xff]   ;;  %v1085_v63 = vld [vmem:[%s1405_s1 + $0x1d8] sm:$0xff]  }
  0x10   :  { %937 = vmatpush3.bf16.msra.mxu0 %v1053_v14  ;;  %v203_v50 = vrot.slane %v175_v46, %v1271_v41  ;;  %632 = vmatprep.mubr.bf16.mxu0 %v196_v48  ;;  %v206_v53 = vcombine.high %v196_v48, %v196_v48  ;;  %v1079_v57 = vld [vmem:[%s1405_s1 + $0x188] sm:$0xff]   ;;  %v1083_v61 = vld [vmem:[%s1405_s1 + $0x190] sm:$0xff]   ;;  %v1086_v0 = vld [vmem:[%s1405_s1 + $0x118] sm:$0xff]  }
  0x11   :  { %959 = vmatpush3.bf16.msra.mxu1 %v1054_v15  ;;  %938 = vmatprep.subr.bf16.mxu0 %v1055_v16  ;;  %v1087_v1 = vld [vmem:[%s1405_s1 + $0x198] sm:$0xff]   ;;  %v1088_v2 = vld [vmem:[%s1405_s1 + $0x160] sm:$0xff]   ;;  %v1092_v6 = vld [vmem:[%s1405_s1 + $0x168] sm:$0xff]  }
  0x12   :  { %960 = vmatprep.subr.bf16.mxu1 %v1056_v17  ;;  %v207_v56 = vcombine.high %v203_v50, %v203_v50  ;;  %672 = vmatprep.mubr.bf16.mxu1 %v206_v53  ;;  %v1089_v3 = vld [vmem:[%s1405_s1 + $0x1e0] sm:$0xff]   ;;  %v1093_v7 = vld [vmem:[%s1405_s1 + $0x1e8] sm:$0xff]   ;;  %v1096_v10 = vld [vmem:[%s1405_s1 + $0x170] sm:$0xff]  }
  0x13   :  { %v1090_v4 = vld [vmem:[%s1405_s1 + $0x120] sm:$0xff]   ;;  %v1094_v8 = vld [vmem:[%s1405_s1 + $0x128] sm:$0xff]   ;;  %v1097_v11 = vld [vmem:[%s1405_s1 + $0x1f0] sm:$0xff]  }
  0x14   :  { %939 = vmatpush3.bf16.msra.mxu0 %v1057_v18  ;;  %v1091_v5 = vld [vmem:[%s1405_s1 + $0x1a0] sm:$0xff]   ;;  %v1095_v9 = vld [vmem:[%s1405_s1 + $0x1a8] sm:$0xff]   ;;  %v1098_v12 = vld [vmem:[%s1405_s1 + $0x130] sm:$0xff]  }
  0x15   :  { %961 = vmatpush3.bf16.msra.mxu1 %v1058_v19  ;;  %940 = vmatprep.subr.bf16.mxu0 %v1059_v20 }
  0x16   :  { %962 = vmatprep.subr.bf16.mxu1 %v1060_v21 }
  0x18   :  { %941 = vmatpush3.bf16.msra.mxu0 %v1061_v22 }
  0x19   :  { %963 = vmatpush3.bf16.msra.mxu1 %v1062_v23  ;;  %942 = vmatprep.subr.bf16.mxu0 %v1063_v24 }
  0x1a   :  { %964 = vmatprep.subr.bf16.mxu1 %v1064_v25 }
  0x1c   :  { %943 = vmatpush3.bf16.msra.mxu0 %v1065_v26 }
  0x1d   :  { %965 = vmatpush3.bf16.msra.mxu1 %v1066_v27  ;;  %944 = vmatprep.subr.bf16.mxu0 %v1067_v29 }
  0x1e   :  { %966 = vmatprep.subr.bf16.mxu1 %v1068_v30 }
  0x20   :  { %945 = vmatpush3.bf16.msra.mxu0 %v1069_v31 }
  0x21   :  { %967 = vmatpush3.bf16.msra.mxu1 %v1070_v32  ;;  %974 = vmatprep.subr.bf16.mxu0 %v1072_v35 }
  0x22   :  { %996 = vmatprep.subr.bf16.mxu1 %v1073_v38 }
  0x23   :  { %633 = vmatmul.mubr.bf16.vlgmr.msra.gmra.mrb[0].mxu0 %v182_v45 }
  0x24   :  { %975 = vmatpush3.bf16.msra.mxu0 %v1074_v47  ;;  %673 = vmatmul.mubr.bf16.vlgmr.msra.gmra.mrb[0].mxu1 %v204_v51 }
  0x25   :  { %976 = vmatprep.subr.bf16.mxu0 %v1076_v52  ;;  %997 = vmatpush3.bf16.msra.mxu1 %v1075_v49 }
  0x26   :  { %712 = vmatprep.mubr.bf16.mxu0 %v203_v50  ;;  %998 = vmatprep.subr.bf16.mxu1 %v1077_v54 }
  0x27   :  { %752 = vmatprep.mubr.bf16.mxu1 %v207_v56 }
  0x28   :  { %977 = vmatpush3.bf16.msra.mxu0 %v1078_v55 }
  0x29   :  { %978 = vmatprep.subr.bf16.mxu0 %v1080_v58  ;;  %999 = vmatpush3.bf16.msra.mxu1 %v1079_v57 }
  0x2a   :  { %1000 = vmatprep.subr.bf16.mxu1 %v1081_v59 }
  0x2c   :  { %979 = vmatpush3.bf16.msra.mxu0 %v1082_v60 }
  0x2d   :  { %980 = vmatprep.subr.bf16.mxu0 %v1084_v62  ;;  %1001 = vmatpush3.bf16.msra.mxu1 %v1083_v61 }
  0x2e   :  { %1002 = vmatprep.subr.bf16.mxu1 %v1085_v63 }
  0x30   :  { %981 = vmatpush3.bf16.msra.mxu0 %v1086_v0 }
  0x31   :  { %982 = vmatprep.subr.bf16.mxu0 %v1088_v2  ;;  %1003 = vmatpush3.bf16.msra.mxu1 %v1087_v1 }
  0x32   :  { %1004 = vmatprep.subr.bf16.mxu1 %v1089_v3 }
  0x34   :  { %983 = vmatpush3.bf16.msra.mxu0 %v1090_v4 }
  0x35   :  { %984 = vmatprep.subr.bf16.mxu0 %v1092_v6  ;;  %1005 = vmatpush3.bf16.msra.mxu1 %v1091_v5 }
  0x36   :  { %1006 = vmatprep.subr.bf16.mxu1 %v1093_v7 }
  0x38   :  { %985 = vmatpush3.bf16.msra.mxu0 %v1094_v8 }
  0x39   :  { %10 = vsyncpa [#allocation3], 0  ;;  %986 = vmatprep.subr.bf16.mxu0 %v1096_v10  ;;  %v1100_v13 = vld [vmem:[%s1405_s1 + $0x178] sm:$0xff]   ;;  %1007 = vmatpush3.bf16.msra.mxu1 %v1095_v9  ;;  %v1099_v14 = vld [vmem:[%s1405_s1 + $0x1b0] sm:$0xff]   ;;  %v189_v17 = vrot.slane %v1275_v43, %v1271_v41  ;;  %v1133_v21 = vmov 0.0   ;;  %vm1134_vm0 = vmmov 0  }
  0x3a   :  { %1008 = vmatprep.subr.bf16.mxu1 %v1097_v11  ;;  %v1101_v15 = vld [vmem:[%s1405_s1 + $0x1f8] sm:$0xff]   ;;  %v1104_v20 = vld [vmem:[%s1407_s3] sm:$0xff]   ;;  %v1105_v22 = vld [vmem:[%s1407_s3 + $0x8] sm:$0xff]   ;;  %vm800_vm1 = vcmask 523264   ;;  %s1135_s29 = smov [#allocation2]  }
  0x3b   :  { %v1102_v16 = vld [vmem:[%s1405_s1 + $0x138] sm:$0xff]   ;;  %v205_v19 = vcombine.high %v189_v17, %v189_v17  ;;  %v1106_v23 = vld [vmem:[%s1407_s3 + $0x10] sm:$0xff]   ;;  %v859_v26 = vld [vmem:[%s1406_s2] ss:$0 sm:$0xff]  ;;  %s851_s30 = sshll.u32 %s1135_s29, 4  ;;  %s852_s30 = int_to_ptr.vmem [resolvable:$true] %s851_s30 }
  0x3c   :  { %987 = vmatpush3.bf16.msra.mxu0 %v1098_v12  ;;  %v1103_v18 = vld [vmem:[%s1405_s1 + $0x1b8] sm:$0xff]   ;;  %v924_v51 = vld [vmem:[%s1408_s4] ss:$0 sm:$0xff]  ;;  %s1108_s6 = scalar_lea.vmem %s852_s30, 32  ;;  %p1113_p1 = scmp.lt.s32.totalorder %s852_s30, %s852_s30 }
  0x3d   :  { %988 = vmatprep.subr.bf16.mxu0 %v1100_v13  ;;  %1009 = vmatpush3.bf16.msra.mxu1 %v1099_v14  ;;  %v1107_v24 = vld [vmem:[%s1407_s3 + $0x18] sm:$0xff]   ;;  %p1109_p0 = scmp.ne.s32.totalorder %s852_s30, %s1108_s6  ;;  %p1114_p2 = scmp.lt.s32.totalorder %s1108_s6, %s1108_s6 }
  0x3e   :  { %1010 = vmatprep.subr.bf16.mxu1 %v1101_v15 }
  0x3f   :  { %p1115_p3 = por %p1114_p2, %p1113_p1 }
  0x40   :  { %989 = vmatpush3.bf16.msra.mxu0 %v1102_v16 }
  0x41   :  { %1011 = vmatpush3.bf16.msra.mxu1 %v1103_v18  ;;  %1023 = vmatprep.subr.bf16.mxu0 %v1133_v21  ;;  %p1116_p4 = pnand %p1115_p3, %p1109_p0 }
  0x43   :  { %713 = vmatmul.mubr.bf16.vlgmr.msra.gmra.mrb[4].mxu0 %v189_v17 }
  0x44   :  { %753 = vmatmul.mubr.bf16.vlgmr.msra.gmra.mrb[4].mxu1 %v205_v19  ;;  %1024 = vmatpush3.bf16.msra.mxu0 %v1104_v20 }
  0x45   :  { %1025 = vmatprep.subr.bf16.mxu0 %v1133_v21  ;;  %1031 = vmatprep.mubr.msk.bf16.mxu0 %vm1134_vm0, %v1133_v21 }
  0x48   :  { %1026 = vmatpush3.bf16.msra.mxu0 %v1105_v22 }
  0x49   :  { %1027 = vmatprep.subr.bf16.mxu0 %v1133_v21 }
  0x4c   :  { %1028 = vmatpush3.bf16.msra.mxu0 %v1106_v23 }
  0x4d   :  { %1029 = vmatprep.subr.bf16.mxu0 %v1133_v21 }
  0x50   :  { %1030 = vmatpush3.bf16.msra.mxu0 %v1107_v24 }
  0xf6   :  { %v946_v25 = vpop.f32.mrb[0].mxu0 }
  0xf7   :  { %v947_v27 = vpop.f32.mrb[1].mxu0  ;;  %v968_v28 = vpop.f32.mrb[0].mxu1 }
  0xf8   :  { %v948_v29 = vadd.f32 %v947_v27, %v946_v25  ;;  %v949_v30 = vpop.f32.mrb[2].mxu0  ;;  %v969_v31 = vpop.f32.mrb[1].mxu1 }
  0xf9   :  { %v950_v32 = vpop.f32.mrb[3].mxu0  ;;  %v970_v34 = vadd.f32 %v969_v31, %v968_v28  ;;  %v971_v35 = vpop.f32.mrb[2].mxu1 }
  0xfa   :  { %v635_v33 = vadd.f32 %v948_v29, %v859_v26  ;;  %v972_v36 = vpop.f32.mrb[3].mxu1 }
  0xfc   :  { %v675_v37 = vadd.f32 %v970_v34, %v635_v33 }
 0x116   :  { %v990_v38 = vpop.f32.mrb[4].mxu0 }
 0x117   :  { %v991_v39 = vpop.f32.mrb[5].mxu0  ;;  %v1012_v40 = vpop.f32.mrb[4].mxu1 }
 0x118   :  { %v992_v41 = vadd.f32 %v991_v39, %v990_v38  ;;  %v993_v42 = vpop.f32.mrb[6].mxu0  ;;  %v1013_v43 = vpop.f32.mrb[5].mxu1 }
 0x119   :  { %v994_v44 = vpop.f32.mrb[7].mxu0  ;;  %v1014_v46 = vadd.f32 %v1013_v43, %v1012_v40  ;;  %v1015_v47 = vpop.f32.mrb[6].mxu1 }
 0x11a   :  { %v715_v45 = vadd.f32 %v992_v41, %v675_v37  ;;  %v1016_v48 = vpop.f32.mrb[7].mxu1 }
 0x11c   :  { %v755_v49 = vadd.f32 %v1014_v46, %v715_v45 }
 0x11e   :  { %v760_v50 = vpack.c.bf16 %v755_v49, %v755_v49 }
 0x120   :  { %1032 = vmatmul.mubr.msk.bf16.vlgmr.msra.gmra.mrb[8].mxu0 %vm800_vm1, %v760_v50 }
 0x1f3   :  { %v838_v52 = vpop.f32.mrb[8].mxu0 }
 0x1f4   :  { %v839_v53 = vadd.f32 %v924_v51, %v838_v52  ;;  %v1033_v54 = vpop.f32.mrb[9].mxu0 }
 0x1f5   :  { %v841_v55 = vpop.f32.mrb[10].mxu0 }
 0x1f6   :  { %844 = vst [vmem:[#allocation2] sm:$0x3] %v839_v53  ;;  %v1034_v56 = vpop.f32.mrb[11].mxu0 }
 0x1f7   :  { %1119 = shalt.err (!%p1116_p4)
}
 0x1f8   :  { %s1120_s4 = scalar_lea.hbm %s1409_s5, 32 }
 0x1f9   :  { %p1121_p5 = scmp.ne.s32.totalorder %s1409_s5, %s1120_s4  ;;  %p1124_p6 = scmp.lt.u32.totalorder %s1120_s4, %s1409_s5 }
 0x1fb   :  { %p1126_p7 = pnand %p1124_p6, %p1121_p5 }
 0x1fd   :  { %1129 = shalt.err (!%p1126_p7)
}
 0x1fe   :  { %854 = dma.vmem_to_hbm [thread:$0]  %s852_s30, 32, %s1409_s5, [#allocation3]  }
 0x1ff   :  { %1130 = dma.done.wait [#allocation3], 32  }
 0x200   :  { %1131 = vsyncadd [#allocation3], 4294967264 }
 0x201   :  { %858 = vsyncpa [#allocation3], 1 }

</bundles_post_ra>
